<compile_context>
chip_gen: v7x
topology: tpu7x:2x2x1
jax: 0.10.0
libtpu: 0.0.40
codegen_flags: <defaults>
</compile_context>

<pallas_src>
from functools import partial

import jax
import jax.numpy as jnp
from jax import lax
from jax.experimental import pallas as pl
from jax.experimental.pallas import tpu as pltpu


def _up_fused_kernel(x_ref, w1_ref, b1_ref, w2_ref, b2_ref, o_ref, *, H, W):
    # x_ref : (1, Cin, H*W)   upsampled input, lane-dense flat spatial layout
    # w1_ref: (9, Cm, Cin)    conv1 per-tap weights (BN1 scale folded), k = kh*3 + kw
    # b1_ref: (Cm, 1)         conv1 folded bias
    # w2_ref: (9, Cm, Cm)     conv2 per-tap weights (BN2 scale folded)
    # b2_ref: (Cm, 1)         conv2 folded bias
    # o_ref : (1, Cm, H*W)    lane-dense output tile (== NCHW flattened)
    HW = H * W
    lane = lax.broadcasted_iota(jnp.int32, (1, HW), 1)   # flat index j = y*W + x

    def conv3x3_bn_relu(a, w_ref, b_ref):
        # a: (Cin_, HW).  out[co, j] = relu(sum_k w[k, co, :] @ tap_k[:, j] + b[co])
        acc = None
        for dy in (-1, 0, 1):
            for dx in (-1, 0, 1):
                k = (dy + 1) * 3 + (dx + 1)
                shift = dy * W + dx
                # tap[c, j] = a[c, j + shift] when the source pixel is in
                # bounds, else 0 (SAME padding).  The roll is circular, so the
                # wrapped rows/columns are zeroed with a (1, HW) border mask.
                t = a if shift == 0 else pltpu.roll(a, (-shift) % HW, axis=1)
                conds = []
                if dy == -1:
                    conds.append(lane >= W)              # no source row above y=0
                elif dy == 1:
                    conds.append(lane < HW - W)          # no source row below y=H-1
                if dx == -1:
                    conds.append(lane % W >= 1)          # no source col left of x=0
                elif dx == 1:
                    conds.append(lane % W < W - 1)       # no source col right of x=W-1
                if conds:
                    m = conds[0]
                    for c in conds[1:]:
                        m = jnp.logical_and(m, c)
                    t = t * m.astype(t.dtype)            # (1,HW) mask, sublane-broadcast mul
                d = jnp.dot(w_ref[k], t,
                            preferred_element_type=jnp.float32,
                            precision=lax.Precision.HIGHEST)
                acc = d if acc is None else acc + d
        # Bias broadcast hoisted: added exactly once per conv.
        return jnp.maximum(acc + b_ref[...], 0.0)

    a0 = x_ref[0]                                        # (Cin, HW)
    a1 = conv3x3_bn_relu(a0, w1_ref, b1_ref)             # (Cm, HW), stays in vregs
    a2 = conv3x3_bn_relu(a1, w2_ref, b2_ref)             # (Cm, HW)
    o_ref[0] = a2.astype(o_ref.dtype)                    # one lane-dense store


def up_forward(x_nchw, params1, params2):
    """Forward pass of `Up`: nearest 2x upsample -> ConvBlock -> ConvBlock."""
    N, Cin, Hin, Win = x_nchw.shape
    w1, s1, b1 = params1
    w2, s2, b2 = params2
    Cm = w1.shape[-1]
    H, W = 2 * Hin, 2 * Win
    HW = H * W

    # Fold BN scale into the conv weights; per-tap (Cout, Cin) layout, k = kh*3+kw.
    w1f = jnp.transpose(w1 * s1[0], (0, 1, 3, 2)).reshape(9, Cm, Cin)
    w2f = jnp.transpose(w2 * s2[0], (0, 1, 3, 2)).reshape(9, Cm, Cm)
    b1f = b1.reshape(Cm, 1)
    b2f = b2.reshape(Cm, 1)

    # Nearest 2x upsample kept in contiguous NCHW (no transpose, no thin last
    # dim in HBM); the reshape to (N, Cin, H*W) is free metadata.
    x_up = jnp.repeat(jnp.repeat(x_nchw, 2, axis=2), 2, axis=3).reshape(N, Cin, HW)

    kernel = partial(_up_fused_kernel, H=H, W=W)
    out = pl.pallas_call(
        kernel,
        out_shape=jax.ShapeDtypeStruct((N, Cm, HW), x_nchw.dtype),
        grid_spec=pltpu.PrefetchScalarGridSpec(
            num_scalar_prefetch=0,
            grid=(N,),
            in_specs=[
                pl.BlockSpec((1, Cin, HW), lambda n: (n, 0, 0)),
                pl.BlockSpec((9, Cm, Cin), lambda n: (0, 0, 0)),
                pl.BlockSpec((Cm, 1), lambda n: (0, 0)),
                pl.BlockSpec((9, Cm, Cm), lambda n: (0, 0, 0)),
                pl.BlockSpec((Cm, 1), lambda n: (0, 0)),
            ],
            out_specs=pl.BlockSpec((1, Cm, HW), lambda n: (n, 0, 0)),
        ),
        compiler_params=pltpu.CompilerParams(dimension_semantics=("parallel",)),
    )(x_up, w1f, b1f, w2f, b2f)

    # (N, Cm, H*W) is exactly NCHW flattened -> free reshape, no transpose.
    return out.reshape(N, Cm, H, W)


def init_convblock(key, cin, cout, eps=1e-5):
    """Deterministic ConvBlock params; conv bias + BN folded into scale/bias."""
    kw, kb, kg, kbe, km, kv = jax.random.split(key, 6)
    fan_in = cin * 9
    bound = 1.0 / (fan_in ** 0.5)
    w = jax.random.uniform(kw, (3, 3, cin, cout), jnp.float32, -bound, bound)
    b = jax.random.uniform(kb, (cout,), jnp.float32, -bound, bound)
    gamma = 1.0 + 0.1 * jax.random.normal(kg, (cout,), jnp.float32)
    beta = 0.1 * jax.random.normal(kbe, (cout,), jnp.float32)
    rmean = 0.1 * jax.random.normal(km, (cout,), jnp.float32)
    rvar = 1.0 + 0.1 * jax.random.uniform(kv, (cout,), jnp.float32)
    scale = gamma / jnp.sqrt(rvar + eps)
    bias = (b - rmean) * scale + beta
    return w, scale.reshape(1, cout), bias.reshape(1, cout)


# ---------------- pure-JAX reference for correctness checking ----------------
def _ref_conv_bn_relu(x_nhwc, w, scale, bias):
    y = lax.conv_general_dilated(
        x_nhwc, w, window_strides=(1, 1), padding="SAME",
        dimension_numbers=("NHWC", "HWIO", "NHWC"),
        precision=lax.Precision.HIGHEST,
    )
    y = y * scale[0] + bias[0]
    return jnp.maximum(y, 0.0)


def _ref_up_forward(x_nchw, params1, params2):
    x = jnp.transpose(x_nchw, (0, 2, 3, 1))
    x = jnp.repeat(jnp.repeat(x, 2, axis=1), 2, axis=2)
    x = _ref_conv_bn_relu(x, *params1)
    x = _ref_conv_bn_relu(x, *params2)
    return jnp.transpose(x, (0, 3, 1, 2))


if __name__ == "__main__":
    key = jax.random.PRNGKey(0)
    kx, k1, k2 = jax.random.split(key, 3)

    # Up(in_channels=4, out_channels=8), input NCHW (2, 4, 16, 16)
    in_channels, out_channels = 4, 8
    x = jax.random.normal(kx, (2, in_channels, 16, 16), jnp.float32)

    params1 = init_convblock(k1, in_channels, out_channels)   # cn1
    params2 = init_convblock(k2, out_channels, out_channels)  # cn2

    fwd = jax.jit(up_forward)
    out = jax.block_until_ready(fwd(x, params1, params2))
    assert out.shape == (2, out_channels, 32, 32), out.shape

    ref = jax.block_until_ready(_ref_up_forward(x, params1, params2))
    max_err = float(jnp.max(jnp.abs(out - ref)))
    assert jnp.allclose(out, ref, atol=1e-4, rtol=1e-4), max_err

    print("KERNEL_OK")
</pallas_src>

<mosaic_0001>
module attributes {stable_mosaic.version = 11 : i64} {
  func.func @_up_fused_kernel(%arg0: i32, %arg1: memref<1x4x1024xf32, #tpu.memory_space<vmem>>, %arg2: memref<9x8x4xf32, #tpu.memory_space<vmem>>, %arg3: memref<8x1xf32, #tpu.memory_space<vmem>>, %arg4: memref<9x8x8xf32, #tpu.memory_space<vmem>>, %arg5: memref<8x1xf32, #tpu.memory_space<vmem>>, %arg6: memref<1x8x1024xf32, #tpu.memory_space<vmem>>) attributes {dimension_semantics = [#tpu.dimension_semantics<parallel>], iteration_bounds = array<i64: 2>, scalar_prefetch = 0 : i64, scratch_operands = 0 : i64, tpu.core_type = #tpu.core_type<tc>, window_params = [{transform_indices = @transform_0, window_bounds = array<i64: 1, 4, 1024>}, {pipeline_mode = #tpu.pipeline_mode<synchronous>, transform_indices = @transform_1, window_bounds = array<i64: 9, 8, 4>}, {pipeline_mode = #tpu.pipeline_mode<synchronous>, transform_indices = @transform_2, window_bounds = array<i64: 8, 1>}, {pipeline_mode = #tpu.pipeline_mode<synchronous>, transform_indices = @transform_3, window_bounds = array<i64: 9, 8, 8>}, {pipeline_mode = #tpu.pipeline_mode<synchronous>, transform_indices = @transform_4, window_bounds = array<i64: 8, 1>}, {transform_indices = @transform_5, window_bounds = array<i64: 1, 8, 1024>}]} {
    %0 = tpu.iota {dimensions = array<i32: 1>} : vector<1x1024xi32>
    %c0 = arith.constant 0 : index
    %c0_0 = arith.constant 0 : index
    %c0_1 = arith.constant 0 : index
    %1 = vector.load %arg1[%c0, %c0_0, %c0_1] : memref<1x4x1024xf32, #tpu.memory_space<vmem>>, vector<1x4x1024xf32>
    %2 = vector.shape_cast %1 : vector<1x4x1024xf32> to vector<4x1024xf32>
    %c33_i32 = arith.constant 33 : i32
    %3 = tpu.dynamic_rotate %2 by %c33_i32 dim 1 : vector<4x1024xf32>, i32 -> vector<4x1024xf32>
    %c32_i32 = arith.constant 32 : i32
    %4 = vector.broadcast %c32_i32 : i32 to vector<1x1024xi32>
    %5 = arith.cmpi sge, %0, %4 : vector<1x1024xi32>
    %c32_i32_2 = arith.constant 32 : i32
    %c0_i32 = arith.constant 0 : i32
    %6 = arith.cmpi eq, %c32_i32_2, %c0_i32 : i32
    %c1_i32 = arith.constant 1 : i32
    %7 = arith.select %6, %c1_i32, %c32_i32_2 : i32
    %8 = vector.broadcast %7 : i32 to vector<1x1024xi32>
    %9 = arith.remsi %0, %8 : vector<1x1024xi32>
    %c0_i32_3 = arith.constant 0 : i32
    %10 = vector.broadcast %c0_i32_3 : i32 to vector<1x1024xi32>
    %11 = arith.cmpi ne, %9, %10 : vector<1x1024xi32>
    %c0_i32_4 = arith.constant 0 : i32
    %12 = vector.broadcast %c0_i32_4 : i32 to vector<1x1024xi32>
    %13 = arith.cmpi slt, %9, %12 : vector<1x1024xi32>
    %c0_i32_5 = arith.constant 0 : i32
    %14 = arith.cmpi slt, %7, %c0_i32_5 : i32
    %15 = vector.broadcast %14 : i1 to vector<1x1024xi1>
    %16 = vector.broadcast %15 : vector<1x1024xi1> to vector<1x1024xi1>
    %17 = arith.xori %13, %16 : vector<1x1024xi1>
    %18 = arith.andi %17, %11 : vector<1x1024xi1>
    %19 = vector.broadcast %7 : i32 to vector<1x1024xi32>
    %20 = arith.addi %9, %19 : vector<1x1024xi32>
    %21 = arith.select %18, %20, %9 : vector<1x1024xi1>, vector<1x1024xi32>
    %c1_i32_6 = arith.constant 1 : i32
    %22 = vector.broadcast %c1_i32_6 : i32 to vector<1x1024xi32>
    %23 = arith.cmpi sge, %21, %22 : vector<1x1024xi32>
    %24 = arith.andi %5, %23 : vector<1x1024xi1>
    %25 = arith.extui %24 : vector<1x1024xi1> to vector<1x1024xi32>
    %26 = arith.sitofp %25 : vector<1x1024xi32> to vector<1x1024xf32>
    %27 = vector.broadcast %26 : vector<1x1024xf32> to vector<4x1024xf32>
    %28 = arith.mulf %3, %27 : vector<4x1024xf32>
    %c0_7 = arith.constant 0 : index
    %c0_8 = arith.constant 0 : index
    %c0_9 = arith.constant 0 : index
    %29 = vector.load %arg2[%c0_7, %c0_8, %c0_9] : memref<9x8x4xf32, #tpu.memory_space<vmem>>, vector<1x8x4xf32>
    %30 = vector.shape_cast %29 : vector<1x8x4xf32> to vector<8x4xf32>
    %cst = arith.constant dense<0.000000e+00> : vector<8x1024xf32>
    %31 = tpu.matmul %30, %28, %cst {dimension_numbers = #tpu.dot_dimension_numbers<[1], [0], [0], [1], [0, 0, 1, 1], [], []>, precision = #tpu.contract_precision<fp32>} : vector<8x4xf32>, vector<4x1024xf32>, vector<8x1024xf32> -> vector<8x1024xf32>
    %c32_i32_10 = arith.constant 32 : i32
    %32 = tpu.dynamic_rotate %2 by %c32_i32_10 dim 1 : vector<4x1024xf32>, i32 -> vector<4x1024xf32>
    %c32_i32_11 = arith.constant 32 : i32
    %33 = vector.broadcast %c32_i32_11 : i32 to vector<1x1024xi32>
    %34 = arith.cmpi sge, %0, %33 : vector<1x1024xi32>
    %35 = arith.extui %34 : vector<1x1024xi1> to vector<1x1024xi32>
    %36 = arith.sitofp %35 : vector<1x1024xi32> to vector<1x1024xf32>
    %37 = vector.broadcast %36 : vector<1x1024xf32> to vector<4x1024xf32>
    %38 = arith.mulf %32, %37 : vector<4x1024xf32>
    %c1 = arith.constant 1 : index
    %c0_12 = arith.constant 0 : index
    %c0_13 = arith.constant 0 : index
    %39 = vector.load %arg2[%c1, %c0_12, %c0_13] : memref<9x8x4xf32, #tpu.memory_space<vmem>>, vector<1x8x4xf32>
    %40 = vector.shape_cast %39 : vector<1x8x4xf32> to vector<8x4xf32>
    %cst_14 = arith.constant dense<0.000000e+00> : vector<8x1024xf32>
    %41 = tpu.matmul %40, %38, %cst_14 {dimension_numbers = #tpu.dot_dimension_numbers<[1], [0], [0], [1], [0, 0, 1, 1], [], []>, precision = #tpu.contract_precision<fp32>} : vector<8x4xf32>, vector<4x1024xf32>, vector<8x1024xf32> -> vector<8x1024xf32>
    %42 = arith.addf %31, %41 : vector<8x1024xf32>
    %c31_i32 = arith.constant 31 : i32
    %43 = tpu.dynamic_rotate %2 by %c31_i32 dim 1 : vector<4x1024xf32>, i32 -> vector<4x1024xf32>
    %c32_i32_15 = arith.constant 32 : i32
    %44 = vector.broadcast %c32_i32_15 : i32 to vector<1x1024xi32>
    %45 = arith.cmpi sge, %0, %44 : vector<1x1024xi32>
    %c32_i32_16 = arith.constant 32 : i32
    %c0_i32_17 = arith.constant 0 : i32
    %46 = arith.cmpi eq, %c32_i32_16, %c0_i32_17 : i32
    %c1_i32_18 = arith.constant 1 : i32
    %47 = arith.select %46, %c1_i32_18, %c32_i32_16 : i32
    %48 = vector.broadcast %47 : i32 to vector<1x1024xi32>
    %49 = arith.remsi %0, %48 : vector<1x1024xi32>
    %c0_i32_19 = arith.constant 0 : i32
    %50 = vector.broadcast %c0_i32_19 : i32 to vector<1x1024xi32>
    %51 = arith.cmpi ne, %49, %50 : vector<1x1024xi32>
    %c0_i32_20 = arith.constant 0 : i32
    %52 = vector.broadcast %c0_i32_20 : i32 to vector<1x1024xi32>
    %53 = arith.cmpi slt, %49, %52 : vector<1x1024xi32>
    %c0_i32_21 = arith.constant 0 : i32
    %54 = arith.cmpi slt, %47, %c0_i32_21 : i32
    %55 = vector.broadcast %54 : i1 to vector<1x1024xi1>
    %56 = vector.broadcast %55 : vector<1x1024xi1> to vector<1x1024xi1>
    %57 = arith.xori %53, %56 : vector<1x1024xi1>
    %58 = arith.andi %57, %51 : vector<1x1024xi1>
    %59 = vector.broadcast %47 : i32 to vector<1x1024xi32>
    %60 = arith.addi %49, %59 : vector<1x1024xi32>
    %61 = arith.select %58, %60, %49 : vector<1x1024xi1>, vector<1x1024xi32>
    %c31_i32_22 = arith.constant 31 : i32
    %62 = vector.broadcast %c31_i32_22 : i32 to vector<1x1024xi32>
    %63 = arith.cmpi slt, %61, %62 : vector<1x1024xi32>
    %64 = arith.andi %45, %63 : vector<1x1024xi1>
    %65 = arith.extui %64 : vector<1x1024xi1> to vector<1x1024xi32>
    %66 = arith.sitofp %65 : vector<1x1024xi32> to vector<1x1024xf32>
    %67 = vector.broadcast %66 : vector<1x1024xf32> to vector<4x1024xf32>
    %68 = arith.mulf %43, %67 : vector<4x1024xf32>
    %c2 = arith.constant 2 : index
    %c0_23 = arith.constant 0 : index
    %c0_24 = arith.constant 0 : index
    %69 = vector.load %arg2[%c2, %c0_23, %c0_24] : memref<9x8x4xf32, #tpu.memory_space<vmem>>, vector<1x8x4xf32>
    %70 = vector.shape_cast %69 : vector<1x8x4xf32> to vector<8x4xf32>
    %cst_25 = arith.constant dense<0.000000e+00> : vector<8x1024xf32>
    %71 = tpu.matmul %70, %68, %cst_25 {dimension_numbers = #tpu.dot_dimension_numbers<[1], [0], [0], [1], [0, 0, 1, 1], [], []>, precision = #tpu.contract_precision<fp32>} : vector<8x4xf32>, vector<4x1024xf32>, vector<8x1024xf32> -> vector<8x1024xf32>
    %72 = arith.addf %42, %71 : vector<8x1024xf32>
    %c1_i32_26 = arith.constant 1 : i32
    %73 = tpu.dynamic_rotate %2 by %c1_i32_26 dim 1 : vector<4x1024xf32>, i32 -> vector<4x1024xf32>
    %c32_i32_27 = arith.constant 32 : i32
    %c0_i32_28 = arith.constant 0 : i32
    %74 = arith.cmpi eq, %c32_i32_27, %c0_i32_28 : i32
    %c1_i32_29 = arith.constant 1 : i32
    %75 = arith.select %74, %c1_i32_29, %c32_i32_27 : i32
    %76 = vector.broadcast %75 : i32 to vector<1x1024xi32>
    %77 = arith.remsi %0, %76 : vector<1x1024xi32>
    %c0_i32_30 = arith.constant 0 : i32
    %78 = vector.broadcast %c0_i32_30 : i32 to vector<1x1024xi32>
    %79 = arith.cmpi ne, %77, %78 : vector<1x1024xi32>
    %c0_i32_31 = arith.constant 0 : i32
    %80 = vector.broadcast %c0_i32_31 : i32 to vector<1x1024xi32>
    %81 = arith.cmpi slt, %77, %80 : vector<1x1024xi32>
    %c0_i32_32 = arith.constant 0 : i32
    %82 = arith.cmpi slt, %75, %c0_i32_32 : i32
    %83 = vector.broadcast %82 : i1 to vector<1x1024xi1>
    %84 = vector.broadcast %83 : vector<1x1024xi1> to vector<1x1024xi1>
    %85 = arith.xori %81, %84 : vector<1x1024xi1>
    %86 = arith.andi %85, %79 : vector<1x1024xi1>
    %87 = vector.broadcast %75 : i32 to vector<1x1024xi32>
    %88 = arith.addi %77, %87 : vector<1x1024xi32>
    %89 = arith.select %86, %88, %77 : vector<1x1024xi1>, vector<1x1024xi32>
    %c1_i32_33 = arith.constant 1 : i32
    %90 = vector.broadcast %c1_i32_33 : i32 to vector<1x1024xi32>
    %91 = arith.cmpi sge, %89, %90 : vector<1x1024xi32>
    %92 = arith.extui %91 : vector<1x1024xi1> to vector<1x1024xi32>
    %93 = arith.sitofp %92 : vector<1x1024xi32> to vector<1x1024xf32>
    %94 = vector.broadcast %93 : vector<1x1024xf32> to vector<4x1024xf32>
    %95 = arith.mulf %73, %94 : vector<4x1024xf32>
    %c3 = arith.constant 3 : index
    %c0_34 = arith.constant 0 : index
    %c0_35 = arith.constant 0 : index
    %96 = vector.load %arg2[%c3, %c0_34, %c0_35] : memref<9x8x4xf32, #tpu.memory_space<vmem>>, vector<1x8x4xf32>
    %97 = vector.shape_cast %96 : vector<1x8x4xf32> to vector<8x4xf32>
    %cst_36 = arith.constant dense<0.000000e+00> : vector<8x1024xf32>
    %98 = tpu.matmul %97, %95, %cst_36 {dimension_numbers = #tpu.dot_dimension_numbers<[1], [0], [0], [1], [0, 0, 1, 1], [], []>, precision = #tpu.contract_precision<fp32>} : vector<8x4xf32>, vector<4x1024xf32>, vector<8x1024xf32> -> vector<8x1024xf32>
    %99 = arith.addf %72, %98 : vector<8x1024xf32>
    %c4 = arith.constant 4 : index
    %c0_37 = arith.constant 0 : index
    %c0_38 = arith.constant 0 : index
    %100 = vector.load %arg2[%c4, %c0_37, %c0_38] : memref<9x8x4xf32, #tpu.memory_space<vmem>>, vector<1x8x4xf32>
    %101 = vector.shape_cast %100 : vector<1x8x4xf32> to vector<8x4xf32>
    %cst_39 = arith.constant dense<0.000000e+00> : vector<8x1024xf32>
    %102 = tpu.matmul %101, %2, %cst_39 {dimension_numbers = #tpu.dot_dimension_numbers<[1], [0], [0], [1], [0, 0, 1, 1], [], []>, precision = #tpu.contract_precision<fp32>} : vector<8x4xf32>, vector<4x1024xf32>, vector<8x1024xf32> -> vector<8x1024xf32>
    %103 = arith.addf %99, %102 : vector<8x1024xf32>
    %c1023_i32 = arith.constant 1023 : i32
    %104 = tpu.dynamic_rotate %2 by %c1023_i32 dim 1 : vector<4x1024xf32>, i32 -> vector<4x1024xf32>
    %c32_i32_40 = arith.constant 32 : i32
    %c0_i32_41 = arith.constant 0 : i32
    %105 = arith.cmpi eq, %c32_i32_40, %c0_i32_41 : i32
    %c1_i32_42 = arith.constant 1 : i32
    %106 = arith.select %105, %c1_i32_42, %c32_i32_40 : i32
    %107 = vector.broadcast %106 : i32 to vector<1x1024xi32>
    %108 = arith.remsi %0, %107 : vector<1x1024xi32>
    %c0_i32_43 = arith.constant 0 : i32
    %109 = vector.broadcast %c0_i32_43 : i32 to vector<1x1024xi32>
    %110 = arith.cmpi ne, %108, %109 : vector<1x1024xi32>
    %c0_i32_44 = arith.constant 0 : i32
    %111 = vector.broadcast %c0_i32_44 : i32 to vector<1x1024xi32>
    %112 = arith.cmpi slt, %108, %111 : vector<1x1024xi32>
    %c0_i32_45 = arith.constant 0 : i32
    %113 = arith.cmpi slt, %106, %c0_i32_45 : i32
    %114 = vector.broadcast %113 : i1 to vector<1x1024xi1>
    %115 = vector.broadcast %114 : vector<1x1024xi1> to vector<1x1024xi1>
    %116 = arith.xori %112, %115 : vector<1x1024xi1>
    %117 = arith.andi %116, %110 : vector<1x1024xi1>
    %118 = vector.broadcast %106 : i32 to vector<1x1024xi32>
    %119 = arith.addi %108, %118 : vector<1x1024xi32>
    %120 = arith.select %117, %119, %108 : vector<1x1024xi1>, vector<1x1024xi32>
    %c31_i32_46 = arith.constant 31 : i32
    %121 = vector.broadcast %c31_i32_46 : i32 to vector<1x1024xi32>
    %122 = arith.cmpi slt, %120, %121 : vector<1x1024xi32>
    %123 = arith.extui %122 : vector<1x1024xi1> to vector<1x1024xi32>
    %124 = arith.sitofp %123 : vector<1x1024xi32> to vector<1x1024xf32>
    %125 = vector.broadcast %124 : vector<1x1024xf32> to vector<4x1024xf32>
    %126 = arith.mulf %104, %125 : vector<4x1024xf32>
    %c5 = arith.constant 5 : index
    %c0_47 = arith.constant 0 : index
    %c0_48 = arith.constant 0 : index
    %127 = vector.load %arg2[%c5, %c0_47, %c0_48] : memref<9x8x4xf32, #tpu.memory_space<vmem>>, vector<1x8x4xf32>
    %128 = vector.shape_cast %127 : vector<1x8x4xf32> to vector<8x4xf32>
    %cst_49 = arith.constant dense<0.000000e+00> : vector<8x1024xf32>
    %129 = tpu.matmul %128, %126, %cst_49 {dimension_numbers = #tpu.dot_dimension_numbers<[1], [0], [0], [1], [0, 0, 1, 1], [], []>, precision = #tpu.contract_precision<fp32>} : vector<8x4xf32>, vector<4x1024xf32>, vector<8x1024xf32> -> vector<8x1024xf32>
    %130 = arith.addf %103, %129 : vector<8x1024xf32>
    %c993_i32 = arith.constant 993 : i32
    %131 = tpu.dynamic_rotate %2 by %c993_i32 dim 1 : vector<4x1024xf32>, i32 -> vector<4x1024xf32>
    %c992_i32 = arith.constant 992 : i32
    %132 = vector.broadcast %c992_i32 : i32 to vector<1x1024xi32>
    %133 = arith.cmpi slt, %0, %132 : vector<1x1024xi32>
    %c32_i32_50 = arith.constant 32 : i32
    %c0_i32_51 = arith.constant 0 : i32
    %134 = arith.cmpi eq, %c32_i32_50, %c0_i32_51 : i32
    %c1_i32_52 = arith.constant 1 : i32
    %135 = arith.select %134, %c1_i32_52, %c32_i32_50 : i32
    %136 = vector.broadcast %135 : i32 to vector<1x1024xi32>
    %137 = arith.remsi %0, %136 : vector<1x1024xi32>
    %c0_i32_53 = arith.constant 0 : i32
    %138 = vector.broadcast %c0_i32_53 : i32 to vector<1x1024xi32>
    %139 = arith.cmpi ne, %137, %138 : vector<1x1024xi32>
    %c0_i32_54 = arith.constant 0 : i32
    %140 = vector.broadcast %c0_i32_54 : i32 to vector<1x1024xi32>
    %141 = arith.cmpi slt, %137, %140 : vector<1x1024xi32>
    %c0_i32_55 = arith.constant 0 : i32
    %142 = arith.cmpi slt, %135, %c0_i32_55 : i32
    %143 = vector.broadcast %142 : i1 to vector<1x1024xi1>
    %144 = vector.broadcast %143 : vector<1x1024xi1> to vector<1x1024xi1>
    %145 = arith.xori %141, %144 : vector<1x1024xi1>
    %146 = arith.andi %145, %139 : vector<1x1024xi1>
    %147 = vector.broadcast %135 : i32 to vector<1x1024xi32>
    %148 = arith.addi %137, %147 : vector<1x1024xi32>
    %149 = arith.select %146, %148, %137 : vector<1x1024xi1>, vector<1x1024xi32>
    %c1_i32_56 = arith.constant 1 : i32
    %150 = vector.broadcast %c1_i32_56 : i32 to vector<1x1024xi32>
    %151 = arith.cmpi sge, %149, %150 : vector<1x1024xi32>
    %152 = arith.andi %133, %151 : vector<1x1024xi1>
    %153 = arith.extui %152 : vector<1x1024xi1> to vector<1x1024xi32>
    %154 = arith.sitofp %153 : vector<1x1024xi32> to vector<1x1024xf32>
    %155 = vector.broadcast %154 : vector<1x1024xf32> to vector<4x1024xf32>
    %156 = arith.mulf %131, %155 : vector<4x1024xf32>
    %c6 = arith.constant 6 : index
    %c0_57 = arith.constant 0 : index
    %c0_58 = arith.constant 0 : index
    %157 = vector.load %arg2[%c6, %c0_57, %c0_58] : memref<9x8x4xf32, #tpu.memory_space<vmem>>, vector<1x8x4xf32>
    %158 = vector.shape_cast %157 : vector<1x8x4xf32> to vector<8x4xf32>
    %cst_59 = arith.constant dense<0.000000e+00> : vector<8x1024xf32>
    %159 = tpu.matmul %158, %156, %cst_59 {dimension_numbers = #tpu.dot_dimension_numbers<[1], [0], [0], [1], [0, 0, 1, 1], [], []>, precision = #tpu.contract_precision<fp32>} : vector<8x4xf32>, vector<4x1024xf32>, vector<8x1024xf32> -> vector<8x1024xf32>
    %160 = arith.addf %130, %159 : vector<8x1024xf32>
    %c992_i32_60 = arith.constant 992 : i32
    %161 = tpu.dynamic_rotate %2 by %c992_i32_60 dim 1 : vector<4x1024xf32>, i32 -> vector<4x1024xf32>
    %c992_i32_61 = arith.constant 992 : i32
    %162 = vector.broadcast %c992_i32_61 : i32 to vector<1x1024xi32>
    %163 = arith.cmpi slt, %0, %162 : vector<1x1024xi32>
    %164 = arith.extui %163 : vector<1x1024xi1> to vector<1x1024xi32>
    %165 = arith.sitofp %164 : vector<1x1024xi32> to vector<1x1024xf32>
    %166 = vector.broadcast %165 : vector<1x1024xf32> to vector<4x1024xf32>
    %167 = arith.mulf %161, %166 : vector<4x1024xf32>
    %c7 = arith.constant 7 : index
    %c0_62 = arith.constant 0 : index
    %c0_63 = arith.constant 0 : index
    %168 = vector.load %arg2[%c7, %c0_62, %c0_63] : memref<9x8x4xf32, #tpu.memory_space<vmem>>, vector<1x8x4xf32>
    %169 = vector.shape_cast %168 : vector<1x8x4xf32> to vector<8x4xf32>
    %cst_64 = arith.constant dense<0.000000e+00> : vector<8x1024xf32>
    %170 = tpu.matmul %169, %167, %cst_64 {dimension_numbers = #tpu.dot_dimension_numbers<[1], [0], [0], [1], [0, 0, 1, 1], [], []>, precision = #tpu.contract_precision<fp32>} : vector<8x4xf32>, vector<4x1024xf32>, vector<8x1024xf32> -> vector<8x1024xf32>
    %171 = arith.addf %160, %170 : vector<8x1024xf32>
    %c991_i32 = arith.constant 991 : i32
    %172 = tpu.dynamic_rotate %2 by %c991_i32 dim 1 : vector<4x1024xf32>, i32 -> vector<4x1024xf32>
    %c992_i32_65 = arith.constant 992 : i32
    %173 = vector.broadcast %c992_i32_65 : i32 to vector<1x1024xi32>
    %174 = arith.cmpi slt, %0, %173 : vector<1x1024xi32>
    %c32_i32_66 = arith.constant 32 : i32
    %c0_i32_67 = arith.constant 0 : i32
    %175 = arith.cmpi eq, %c32_i32_66, %c0_i32_67 : i32
    %c1_i32_68 = arith.constant 1 : i32
    %176 = arith.select %175, %c1_i32_68, %c32_i32_66 : i32
    %177 = vector.broadcast %176 : i32 to vector<1x1024xi32>
    %178 = arith.remsi %0, %177 : vector<1x1024xi32>
    %c0_i32_69 = arith.constant 0 : i32
    %179 = vector.broadcast %c0_i32_69 : i32 to vector<1x1024xi32>
    %180 = arith.cmpi ne, %178, %179 : vector<1x1024xi32>
    %c0_i32_70 = arith.constant 0 : i32
    %181 = vector.broadcast %c0_i32_70 : i32 to vector<1x1024xi32>
    %182 = arith.cmpi slt, %178, %181 : vector<1x1024xi32>
    %c0_i32_71 = arith.constant 0 : i32
    %183 = arith.cmpi slt, %176, %c0_i32_71 : i32
    %184 = vector.broadcast %183 : i1 to vector<1x1024xi1>
    %185 = vector.broadcast %184 : vector<1x1024xi1> to vector<1x1024xi1>
    %186 = arith.xori %182, %185 : vector<1x1024xi1>
    %187 = arith.andi %186, %180 : vector<1x1024xi1>
    %188 = vector.broadcast %176 : i32 to vector<1x1024xi32>
    %189 = arith.addi %178, %188 : vector<1x1024xi32>
    %190 = arith.select %187, %189, %178 : vector<1x1024xi1>, vector<1x1024xi32>
    %c31_i32_72 = arith.constant 31 : i32
    %191 = vector.broadcast %c31_i32_72 : i32 to vector<1x1024xi32>
    %192 = arith.cmpi slt, %190, %191 : vector<1x1024xi32>
    %193 = arith.andi %174, %192 : vector<1x1024xi1>
    %194 = arith.extui %193 : vector<1x1024xi1> to vector<1x1024xi32>
    %195 = arith.sitofp %194 : vector<1x1024xi32> to vector<1x1024xf32>
    %196 = vector.broadcast %195 : vector<1x1024xf32> to vector<4x1024xf32>
    %197 = arith.mulf %172, %196 : vector<4x1024xf32>
    %c8 = arith.constant 8 : index
    %c0_73 = arith.constant 0 : index
    %c0_74 = arith.constant 0 : index
    %198 = vector.load %arg2[%c8, %c0_73, %c0_74] : memref<9x8x4xf32, #tpu.memory_space<vmem>>, vector<1x8x4xf32>
    %199 = vector.shape_cast %198 : vector<1x8x4xf32> to vector<8x4xf32>
    %cst_75 = arith.constant dense<0.000000e+00> : vector<8x1024xf32>
    %200 = tpu.matmul %199, %197, %cst_75 {dimension_numbers = #tpu.dot_dimension_numbers<[1], [0], [0], [1], [0, 0, 1, 1], [], []>, precision = #tpu.contract_precision<fp32>} : vector<8x4xf32>, vector<4x1024xf32>, vector<8x1024xf32> -> vector<8x1024xf32>
    %201 = arith.addf %171, %200 : vector<8x1024xf32>
    %c0_76 = arith.constant 0 : index
    %c0_77 = arith.constant 0 : index
    %202 = vector.load %arg3[%c0_76, %c0_77] : memref<8x1xf32, #tpu.memory_space<vmem>>, vector<8x1xf32>
    %203 = vector.broadcast %202 : vector<8x1xf32> to vector<8x1024xf32>
    %204 = arith.addf %201, %203 : vector<8x1024xf32>
    %cst_78 = arith.constant 0.000000e+00 : f32
    %205 = vector.broadcast %cst_78 : f32 to vector<8x1024xf32>
    %206 = arith.maximumf %204, %205 : vector<8x1024xf32>
    %c33_i32_79 = arith.constant 33 : i32
    %207 = tpu.dynamic_rotate %206 by %c33_i32_79 dim 1 : vector<8x1024xf32>, i32 -> vector<8x1024xf32>
    %c32_i32_80 = arith.constant 32 : i32
    %208 = vector.broadcast %c32_i32_80 : i32 to vector<1x1024xi32>
    %209 = arith.cmpi sge, %0, %208 : vector<1x1024xi32>
    %c32_i32_81 = arith.constant 32 : i32
    %c0_i32_82 = arith.constant 0 : i32
    %210 = arith.cmpi eq, %c32_i32_81, %c0_i32_82 : i32
    %c1_i32_83 = arith.constant 1 : i32
    %211 = arith.select %210, %c1_i32_83, %c32_i32_81 : i32
    %212 = vector.broadcast %211 : i32 to vector<1x1024xi32>
    %213 = arith.remsi %0, %212 : vector<1x1024xi32>
    %c0_i32_84 = arith.constant 0 : i32
    %214 = vector.broadcast %c0_i32_84 : i32 to vector<1x1024xi32>
    %215 = arith.cmpi ne, %213, %214 : vector<1x1024xi32>
    %c0_i32_85 = arith.constant 0 : i32
    %216 = vector.broadcast %c0_i32_85 : i32 to vector<1x1024xi32>
    %217 = arith.cmpi slt, %213, %216 : vector<1x1024xi32>
    %c0_i32_86 = arith.constant 0 : i32
    %218 = arith.cmpi slt, %211, %c0_i32_86 : i32
    %219 = vector.broadcast %218 : i1 to vector<1x1024xi1>
    %220 = vector.broadcast %219 : vector<1x1024xi1> to vector<1x1024xi1>
    %221 = arith.xori %217, %220 : vector<1x1024xi1>
    %222 = arith.andi %221, %215 : vector<1x1024xi1>
    %223 = vector.broadcast %211 : i32 to vector<1x1024xi32>
    %224 = arith.addi %213, %223 : vector<1x1024xi32>
    %225 = arith.select %222, %224, %213 : vector<1x1024xi1>, vector<1x1024xi32>
    %c1_i32_87 = arith.constant 1 : i32
    %226 = vector.broadcast %c1_i32_87 : i32 to vector<1x1024xi32>
    %227 = arith.cmpi sge, %225, %226 : vector<1x1024xi32>
    %228 = arith.andi %209, %227 : vector<1x1024xi1>
    %229 = arith.extui %228 : vector<1x1024xi1> to vector<1x1024xi32>
    %230 = arith.sitofp %229 : vector<1x1024xi32> to vector<1x1024xf32>
    %231 = vector.broadcast %230 : vector<1x1024xf32> to vector<8x1024xf32>
    %232 = arith.mulf %207, %231 : vector<8x1024xf32>
    %c0_88 = arith.constant 0 : index
    %c0_89 = arith.constant 0 : index
    %c0_90 = arith.constant 0 : index
    %233 = vector.load %arg4[%c0_88, %c0_89, %c0_90] : memref<9x8x8xf32, #tpu.memory_space<vmem>>, vector<1x8x8xf32>
    %234 = vector.shape_cast %233 : vector<1x8x8xf32> to vector<8x8xf32>
    %cst_91 = arith.constant dense<0.000000e+00> : vector<8x1024xf32>
    %235 = tpu.matmul %234, %232, %cst_91 {dimension_numbers = #tpu.dot_dimension_numbers<[1], [0], [0], [1], [0, 0, 1, 1], [], []>, precision = #tpu.contract_precision<fp32>} : vector<8x8xf32>, vector<8x1024xf32>, vector<8x1024xf32> -> vector<8x1024xf32>
    %c32_i32_92 = arith.constant 32 : i32
    %236 = tpu.dynamic_rotate %206 by %c32_i32_92 dim 1 : vector<8x1024xf32>, i32 -> vector<8x1024xf32>
    %c32_i32_93 = arith.constant 32 : i32
    %237 = vector.broadcast %c32_i32_93 : i32 to vector<1x1024xi32>
    %238 = arith.cmpi sge, %0, %237 : vector<1x1024xi32>
    %239 = arith.extui %238 : vector<1x1024xi1> to vector<1x1024xi32>
    %240 = arith.sitofp %239 : vector<1x1024xi32> to vector<1x1024xf32>
    %241 = vector.broadcast %240 : vector<1x1024xf32> to vector<8x1024xf32>
    %242 = arith.mulf %236, %241 : vector<8x1024xf32>
    %c1_94 = arith.constant 1 : index
    %c0_95 = arith.constant 0 : index
    %c0_96 = arith.constant 0 : index
    %243 = vector.load %arg4[%c1_94, %c0_95, %c0_96] : memref<9x8x8xf32, #tpu.memory_space<vmem>>, vector<1x8x8xf32>
    %244 = vector.shape_cast %243 : vector<1x8x8xf32> to vector<8x8xf32>
    %cst_97 = arith.constant dense<0.000000e+00> : vector<8x1024xf32>
    %245 = tpu.matmul %244, %242, %cst_97 {dimension_numbers = #tpu.dot_dimension_numbers<[1], [0], [0], [1], [0, 0, 1, 1], [], []>, precision = #tpu.contract_precision<fp32>} : vector<8x8xf32>, vector<8x1024xf32>, vector<8x1024xf32> -> vector<8x1024xf32>
    %246 = arith.addf %235, %245 : vector<8x1024xf32>
    %c31_i32_98 = arith.constant 31 : i32
    %247 = tpu.dynamic_rotate %206 by %c31_i32_98 dim 1 : vector<8x1024xf32>, i32 -> vector<8x1024xf32>
    %c32_i32_99 = arith.constant 32 : i32
    %248 = vector.broadcast %c32_i32_99 : i32 to vector<1x1024xi32>
    %249 = arith.cmpi sge, %0, %248 : vector<1x1024xi32>
    %c32_i32_100 = arith.constant 32 : i32
    %c0_i32_101 = arith.constant 0 : i32
    %250 = arith.cmpi eq, %c32_i32_100, %c0_i32_101 : i32
    %c1_i32_102 = arith.constant 1 : i32
    %251 = arith.select %250, %c1_i32_102, %c32_i32_100 : i32
    %252 = vector.broadcast %251 : i32 to vector<1x1024xi32>
    %253 = arith.remsi %0, %252 : vector<1x1024xi32>
    %c0_i32_103 = arith.constant 0 : i32
    %254 = vector.broadcast %c0_i32_103 : i32 to vector<1x1024xi32>
    %255 = arith.cmpi ne, %253, %254 : vector<1x1024xi32>
    %c0_i32_104 = arith.constant 0 : i32
    %256 = vector.broadcast %c0_i32_104 : i32 to vector<1x1024xi32>
    %257 = arith.cmpi slt, %253, %256 : vector<1x1024xi32>
    %c0_i32_105 = arith.constant 0 : i32
    %258 = arith.cmpi slt, %251, %c0_i32_105 : i32
    %259 = vector.broadcast %258 : i1 to vector<1x1024xi1>
    %260 = vector.broadcast %259 : vector<1x1024xi1> to vector<1x1024xi1>
    %261 = arith.xori %257, %260 : vector<1x1024xi1>
    %262 = arith.andi %261, %255 : vector<1x1024xi1>
    %263 = vector.broadcast %251 : i32 to vector<1x1024xi32>
    %264 = arith.addi %253, %263 : vector<1x1024xi32>
    %265 = arith.select %262, %264, %253 : vector<1x1024xi1>, vector<1x1024xi32>
    %c31_i32_106 = arith.constant 31 : i32
    %266 = vector.broadcast %c31_i32_106 : i32 to vector<1x1024xi32>
    %267 = arith.cmpi slt, %265, %266 : vector<1x1024xi32>
    %268 = arith.andi %249, %267 : vector<1x1024xi1>
    %269 = arith.extui %268 : vector<1x1024xi1> to vector<1x1024xi32>
    %270 = arith.sitofp %269 : vector<1x1024xi32> to vector<1x1024xf32>
    %271 = vector.broadcast %270 : vector<1x1024xf32> to vector<8x1024xf32>
    %272 = arith.mulf %247, %271 : vector<8x1024xf32>
    %c2_107 = arith.constant 2 : index
    %c0_108 = arith.constant 0 : index
    %c0_109 = arith.constant 0 : index
    %273 = vector.load %arg4[%c2_107, %c0_108, %c0_109] : memref<9x8x8xf32, #tpu.memory_space<vmem>>, vector<1x8x8xf32>
    %274 = vector.shape_cast %273 : vector<1x8x8xf32> to vector<8x8xf32>
    %cst_110 = arith.constant dense<0.000000e+00> : vector<8x1024xf32>
    %275 = tpu.matmul %274, %272, %cst_110 {dimension_numbers = #tpu.dot_dimension_numbers<[1], [0], [0], [1], [0, 0, 1, 1], [], []>, precision = #tpu.contract_precision<fp32>} : vector<8x8xf32>, vector<8x1024xf32>, vector<8x1024xf32> -> vector<8x1024xf32>
    %276 = arith.addf %246, %275 : vector<8x1024xf32>
    %c1_i32_111 = arith.constant 1 : i32
    %277 = tpu.dynamic_rotate %206 by %c1_i32_111 dim 1 : vector<8x1024xf32>, i32 -> vector<8x1024xf32>
    %c32_i32_112 = arith.constant 32 : i32
    %c0_i32_113 = arith.constant 0 : i32
    %278 = arith.cmpi eq, %c32_i32_112, %c0_i32_113 : i32
    %c1_i32_114 = arith.constant 1 : i32
    %279 = arith.select %278, %c1_i32_114, %c32_i32_112 : i32
    %280 = vector.broadcast %279 : i32 to vector<1x1024xi32>
    %281 = arith.remsi %0, %280 : vector<1x1024xi32>
    %c0_i32_115 = arith.constant 0 : i32
    %282 = vector.broadcast %c0_i32_115 : i32 to vector<1x1024xi32>
    %283 = arith.cmpi ne, %281, %282 : vector<1x1024xi32>
    %c0_i32_116 = arith.constant 0 : i32
    %284 = vector.broadcast %c0_i32_116 : i32 to vector<1x1024xi32>
    %285 = arith.cmpi slt, %281, %284 : vector<1x1024xi32>
    %c0_i32_117 = arith.constant 0 : i32
    %286 = arith.cmpi slt, %279, %c0_i32_117 : i32
    %287 = vector.broadcast %286 : i1 to vector<1x1024xi1>
    %288 = vector.broadcast %287 : vector<1x1024xi1> to vector<1x1024xi1>
    %289 = arith.xori %285, %288 : vector<1x1024xi1>
    %290 = arith.andi %289, %283 : vector<1x1024xi1>
    %291 = vector.broadcast %279 : i32 to vector<1x1024xi32>
    %292 = arith.addi %281, %291 : vector<1x1024xi32>
    %293 = arith.select %290, %292, %281 : vector<1x1024xi1>, vector<1x1024xi32>
    %c1_i32_118 = arith.constant 1 : i32
    %294 = vector.broadcast %c1_i32_118 : i32 to vector<1x1024xi32>
    %295 = arith.cmpi sge, %293, %294 : vector<1x1024xi32>
    %296 = arith.extui %295 : vector<1x1024xi1> to vector<1x1024xi32>
    %297 = arith.sitofp %296 : vector<1x1024xi32> to vector<1x1024xf32>
    %298 = vector.broadcast %297 : vector<1x1024xf32> to vector<8x1024xf32>
    %299 = arith.mulf %277, %298 : vector<8x1024xf32>
    %c3_119 = arith.constant 3 : index
    %c0_120 = arith.constant 0 : index
    %c0_121 = arith.constant 0 : index
    %300 = vector.load %arg4[%c3_119, %c0_120, %c0_121] : memref<9x8x8xf32, #tpu.memory_space<vmem>>, vector<1x8x8xf32>
    %301 = vector.shape_cast %300 : vector<1x8x8xf32> to vector<8x8xf32>
    %cst_122 = arith.constant dense<0.000000e+00> : vector<8x1024xf32>
    %302 = tpu.matmul %301, %299, %cst_122 {dimension_numbers = #tpu.dot_dimension_numbers<[1], [0], [0], [1], [0, 0, 1, 1], [], []>, precision = #tpu.contract_precision<fp32>} : vector<8x8xf32>, vector<8x1024xf32>, vector<8x1024xf32> -> vector<8x1024xf32>
    %303 = arith.addf %276, %302 : vector<8x1024xf32>
    %c4_123 = arith.constant 4 : index
    %c0_124 = arith.constant 0 : index
    %c0_125 = arith.constant 0 : index
    %304 = vector.load %arg4[%c4_123, %c0_124, %c0_125] : memref<9x8x8xf32, #tpu.memory_space<vmem>>, vector<1x8x8xf32>
    %305 = vector.shape_cast %304 : vector<1x8x8xf32> to vector<8x8xf32>
    %cst_126 = arith.constant dense<0.000000e+00> : vector<8x1024xf32>
    %306 = tpu.matmul %305, %206, %cst_126 {dimension_numbers = #tpu.dot_dimension_numbers<[1], [0], [0], [1], [0, 0, 1, 1], [], []>, precision = #tpu.contract_precision<fp32>} : vector<8x8xf32>, vector<8x1024xf32>, vector<8x1024xf32> -> vector<8x1024xf32>
    %307 = arith.addf %303, %306 : vector<8x1024xf32>
    %c1023_i32_127 = arith.constant 1023 : i32
    %308 = tpu.dynamic_rotate %206 by %c1023_i32_127 dim 1 : vector<8x1024xf32>, i32 -> vector<8x1024xf32>
    %c32_i32_128 = arith.constant 32 : i32
    %c0_i32_129 = arith.constant 0 : i32
    %309 = arith.cmpi eq, %c32_i32_128, %c0_i32_129 : i32
    %c1_i32_130 = arith.constant 1 : i32
    %310 = arith.select %309, %c1_i32_130, %c32_i32_128 : i32
    %311 = vector.broadcast %310 : i32 to vector<1x1024xi32>
    %312 = arith.remsi %0, %311 : vector<1x1024xi32>
    %c0_i32_131 = arith.constant 0 : i32
    %313 = vector.broadcast %c0_i32_131 : i32 to vector<1x1024xi32>
    %314 = arith.cmpi ne, %312, %313 : vector<1x1024xi32>
    %c0_i32_132 = arith.constant 0 : i32
    %315 = vector.broadcast %c0_i32_132 : i32 to vector<1x1024xi32>
    %316 = arith.cmpi slt, %312, %315 : vector<1x1024xi32>
    %c0_i32_133 = arith.constant 0 : i32
    %317 = arith.cmpi slt, %310, %c0_i32_133 : i32
    %318 = vector.broadcast %317 : i1 to vector<1x1024xi1>
    %319 = vector.broadcast %318 : vector<1x1024xi1> to vector<1x1024xi1>
    %320 = arith.xori %316, %319 : vector<1x1024xi1>
    %321 = arith.andi %320, %314 : vector<1x1024xi1>
    %322 = vector.broadcast %310 : i32 to vector<1x1024xi32>
    %323 = arith.addi %312, %322 : vector<1x1024xi32>
    %324 = arith.select %321, %323, %312 : vector<1x1024xi1>, vector<1x1024xi32>
    %c31_i32_134 = arith.constant 31 : i32
    %325 = vector.broadcast %c31_i32_134 : i32 to vector<1x1024xi32>
    %326 = arith.cmpi slt, %324, %325 : vector<1x1024xi32>
    %327 = arith.extui %326 : vector<1x1024xi1> to vector<1x1024xi32>
    %328 = arith.sitofp %327 : vector<1x1024xi32> to vector<1x1024xf32>
    %329 = vector.broadcast %328 : vector<1x1024xf32> to vector<8x1024xf32>
    %330 = arith.mulf %308, %329 : vector<8x1024xf32>
    %c5_135 = arith.constant 5 : index
    %c0_136 = arith.constant 0 : index
    %c0_137 = arith.constant 0 : index
    %331 = vector.load %arg4[%c5_135, %c0_136, %c0_137] : memref<9x8x8xf32, #tpu.memory_space<vmem>>, vector<1x8x8xf32>
    %332 = vector.shape_cast %331 : vector<1x8x8xf32> to vector<8x8xf32>
    %cst_138 = arith.constant dense<0.000000e+00> : vector<8x1024xf32>
    %333 = tpu.matmul %332, %330, %cst_138 {dimension_numbers = #tpu.dot_dimension_numbers<[1], [0], [0], [1], [0, 0, 1, 1], [], []>, precision = #tpu.contract_precision<fp32>} : vector<8x8xf32>, vector<8x1024xf32>, vector<8x1024xf32> -> vector<8x1024xf32>
    %334 = arith.addf %307, %333 : vector<8x1024xf32>
    %c993_i32_139 = arith.constant 993 : i32
    %335 = tpu.dynamic_rotate %206 by %c993_i32_139 dim 1 : vector<8x1024xf32>, i32 -> vector<8x1024xf32>
    %c992_i32_140 = arith.constant 992 : i32
    %336 = vector.broadcast %c992_i32_140 : i32 to vector<1x1024xi32>
    %337 = arith.cmpi slt, %0, %336 : vector<1x1024xi32>
    %c32_i32_141 = arith.constant 32 : i32
    %c0_i32_142 = arith.constant 0 : i32
    %338 = arith.cmpi eq, %c32_i32_141, %c0_i32_142 : i32
    %c1_i32_143 = arith.constant 1 : i32
    %339 = arith.select %338, %c1_i32_143, %c32_i32_141 : i32
    %340 = vector.broadcast %339 : i32 to vector<1x1024xi32>
    %341 = arith.remsi %0, %340 : vector<1x1024xi32>
    %c0_i32_144 = arith.constant 0 : i32
    %342 = vector.broadcast %c0_i32_144 : i32 to vector<1x1024xi32>
    %343 = arith.cmpi ne, %341, %342 : vector<1x1024xi32>
    %c0_i32_145 = arith.constant 0 : i32
    %344 = vector.broadcast %c0_i32_145 : i32 to vector<1x1024xi32>
    %345 = arith.cmpi slt, %341, %344 : vector<1x1024xi32>
    %c0_i32_146 = arith.constant 0 : i32
    %346 = arith.cmpi slt, %339, %c0_i32_146 : i32
    %347 = vector.broadcast %346 : i1 to vector<1x1024xi1>
    %348 = vector.broadcast %347 : vector<1x1024xi1> to vector<1x1024xi1>
    %349 = arith.xori %345, %348 : vector<1x1024xi1>
    %350 = arith.andi %349, %343 : vector<1x1024xi1>
    %351 = vector.broadcast %339 : i32 to vector<1x1024xi32>
    %352 = arith.addi %341, %351 : vector<1x1024xi32>
    %353 = arith.select %350, %352, %341 : vector<1x1024xi1>, vector<1x1024xi32>
    %c1_i32_147 = arith.constant 1 : i32
    %354 = vector.broadcast %c1_i32_147 : i32 to vector<1x1024xi32>
    %355 = arith.cmpi sge, %353, %354 : vector<1x1024xi32>
    %356 = arith.andi %337, %355 : vector<1x1024xi1>
    %357 = arith.extui %356 : vector<1x1024xi1> to vector<1x1024xi32>
    %358 = arith.sitofp %357 : vector<1x1024xi32> to vector<1x1024xf32>
    %359 = vector.broadcast %358 : vector<1x1024xf32> to vector<8x1024xf32>
    %360 = arith.mulf %335, %359 : vector<8x1024xf32>
    %c6_148 = arith.constant 6 : index
    %c0_149 = arith.constant 0 : index
    %c0_150 = arith.constant 0 : index
    %361 = vector.load %arg4[%c6_148, %c0_149, %c0_150] : memref<9x8x8xf32, #tpu.memory_space<vmem>>, vector<1x8x8xf32>
    %362 = vector.shape_cast %361 : vector<1x8x8xf32> to vector<8x8xf32>
    %cst_151 = arith.constant dense<0.000000e+00> : vector<8x1024xf32>
    %363 = tpu.matmul %362, %360, %cst_151 {dimension_numbers = #tpu.dot_dimension_numbers<[1], [0], [0], [1], [0, 0, 1, 1], [], []>, precision = #tpu.contract_precision<fp32>} : vector<8x8xf32>, vector<8x1024xf32>, vector<8x1024xf32> -> vector<8x1024xf32>
    %364 = arith.addf %334, %363 : vector<8x1024xf32>
    %c992_i32_152 = arith.constant 992 : i32
    %365 = tpu.dynamic_rotate %206 by %c992_i32_152 dim 1 : vector<8x1024xf32>, i32 -> vector<8x1024xf32>
    %c992_i32_153 = arith.constant 992 : i32
    %366 = vector.broadcast %c992_i32_153 : i32 to vector<1x1024xi32>
    %367 = arith.cmpi slt, %0, %366 : vector<1x1024xi32>
    %368 = arith.extui %367 : vector<1x1024xi1> to vector<1x1024xi32>
    %369 = arith.sitofp %368 : vector<1x1024xi32> to vector<1x1024xf32>
    %370 = vector.broadcast %369 : vector<1x1024xf32> to vector<8x1024xf32>
    %371 = arith.mulf %365, %370 : vector<8x1024xf32>
    %c7_154 = arith.constant 7 : index
    %c0_155 = arith.constant 0 : index
    %c0_156 = arith.constant 0 : index
    %372 = vector.load %arg4[%c7_154, %c0_155, %c0_156] : memref<9x8x8xf32, #tpu.memory_space<vmem>>, vector<1x8x8xf32>
    %373 = vector.shape_cast %372 : vector<1x8x8xf32> to vector<8x8xf32>
    %cst_157 = arith.constant dense<0.000000e+00> : vector<8x1024xf32>
    %374 = tpu.matmul %373, %371, %cst_157 {dimension_numbers = #tpu.dot_dimension_numbers<[1], [0], [0], [1], [0, 0, 1, 1], [], []>, precision = #tpu.contract_precision<fp32>} : vector<8x8xf32>, vector<8x1024xf32>, vector<8x1024xf32> -> vector<8x1024xf32>
    %375 = arith.addf %364, %374 : vector<8x1024xf32>
    %c991_i32_158 = arith.constant 991 : i32
    %376 = tpu.dynamic_rotate %206 by %c991_i32_158 dim 1 : vector<8x1024xf32>, i32 -> vector<8x1024xf32>
    %c992_i32_159 = arith.constant 992 : i32
    %377 = vector.broadcast %c992_i32_159 : i32 to vector<1x1024xi32>
    %378 = arith.cmpi slt, %0, %377 : vector<1x1024xi32>
    %c32_i32_160 = arith.constant 32 : i32
    %c0_i32_161 = arith.constant 0 : i32
    %379 = arith.cmpi eq, %c32_i32_160, %c0_i32_161 : i32
    %c1_i32_162 = arith.constant 1 : i32
    %380 = arith.select %379, %c1_i32_162, %c32_i32_160 : i32
    %381 = vector.broadcast %380 : i32 to vector<1x1024xi32>
    %382 = arith.remsi %0, %381 : vector<1x1024xi32>
    %c0_i32_163 = arith.constant 0 : i32
    %383 = vector.broadcast %c0_i32_163 : i32 to vector<1x1024xi32>
    %384 = arith.cmpi ne, %382, %383 : vector<1x1024xi32>
    %c0_i32_164 = arith.constant 0 : i32
    %385 = vector.broadcast %c0_i32_164 : i32 to vector<1x1024xi32>
    %386 = arith.cmpi slt, %382, %385 : vector<1x1024xi32>
    %c0_i32_165 = arith.constant 0 : i32
    %387 = arith.cmpi slt, %380, %c0_i32_165 : i32
    %388 = vector.broadcast %387 : i1 to vector<1x1024xi1>
    %389 = vector.broadcast %388 : vector<1x1024xi1> to vector<1x1024xi1>
    %390 = arith.xori %386, %389 : vector<1x1024xi1>
    %391 = arith.andi %390, %384 : vector<1x1024xi1>
    %392 = vector.broadcast %380 : i32 to vector<1x1024xi32>
    %393 = arith.addi %382, %392 : vector<1x1024xi32>
    %394 = arith.select %391, %393, %382 : vector<1x1024xi1>, vector<1x1024xi32>
    %c31_i32_166 = arith.constant 31 : i32
    %395 = vector.broadcast %c31_i32_166 : i32 to vector<1x1024xi32>
    %396 = arith.cmpi slt, %394, %395 : vector<1x1024xi32>
    %397 = arith.andi %378, %396 : vector<1x1024xi1>
    %398 = arith.extui %397 : vector<1x1024xi1> to vector<1x1024xi32>
    %399 = arith.sitofp %398 : vector<1x1024xi32> to vector<1x1024xf32>
    %400 = vector.broadcast %399 : vector<1x1024xf32> to vector<8x1024xf32>
    %401 = arith.mulf %376, %400 : vector<8x1024xf32>
    %c8_167 = arith.constant 8 : index
    %c0_168 = arith.constant 0 : index
    %c0_169 = arith.constant 0 : index
    %402 = vector.load %arg4[%c8_167, %c0_168, %c0_169] : memref<9x8x8xf32, #tpu.memory_space<vmem>>, vector<1x8x8xf32>
    %403 = vector.shape_cast %402 : vector<1x8x8xf32> to vector<8x8xf32>
    %cst_170 = arith.constant dense<0.000000e+00> : vector<8x1024xf32>
    %404 = tpu.matmul %403, %401, %cst_170 {dimension_numbers = #tpu.dot_dimension_numbers<[1], [0], [0], [1], [0, 0, 1, 1], [], []>, precision = #tpu.contract_precision<fp32>} : vector<8x8xf32>, vector<8x1024xf32>, vector<8x1024xf32> -> vector<8x1024xf32>
    %405 = arith.addf %375, %404 : vector<8x1024xf32>
    %c0_171 = arith.constant 0 : index
    %c0_172 = arith.constant 0 : index
    %406 = vector.load %arg5[%c0_171, %c0_172] : memref<8x1xf32, #tpu.memory_space<vmem>>, vector<8x1xf32>
    %407 = vector.broadcast %406 : vector<8x1xf32> to vector<8x1024xf32>
    %408 = arith.addf %405, %407 : vector<8x1024xf32>
    %cst_173 = arith.constant 0.000000e+00 : f32
    %409 = vector.broadcast %cst_173 : f32 to vector<8x1024xf32>
    %410 = arith.maximumf %408, %409 : vector<8x1024xf32>
    %c0_174 = arith.constant 0 : index
    %c0_175 = arith.constant 0 : index
    %c0_176 = arith.constant 0 : index
    %411 = vector.load %arg6[%c0_174, %c0_175, %c0_176] : memref<1x8x1024xf32, #tpu.memory_space<vmem>>, vector<1x8x1024xf32>
    %412 = vector.shape_cast %411 : vector<1x8x1024xf32> to vector<8x1024xf32>
    %413 = vector.shape_cast %410 : vector<8x1024xf32> to vector<1x8x1024xf32>
    tpu.vector_store %arg6[%c0_174, %c0_175, %c0_176], %413 {strides = array<i32>} : memref<1x8x1024xf32, #tpu.memory_space<vmem>>, vector<1x8x1024xf32>,
    return
  }
  func.func @transform_0(%arg0: i32) -> (i32, i32, i32) {
    %c0_i32 = arith.constant 0 : i32
    %c0_i32_0 = arith.constant 0 : i32
    %c0_i32_1 = arith.constant 0 : i32
    return %arg0, %c0_i32, %c0_i32_0 : i32, i32, i32
  }
  func.func @transform_1(%arg0: i32) -> (i32, i32, i32) {
    %c0_i32 = arith.constant 0 : i32
    %c0_i32_0 = arith.constant 0 : i32
    %c0_i32_1 = arith.constant 0 : i32
    %c0_i32_2 = arith.constant 0 : i32
    return %c0_i32, %c0_i32_0, %c0_i32_1 : i32, i32, i32
  }
  func.func @transform_2(%arg0: i32) -> (i32, i32) {
    %c0_i32 = arith.constant 0 : i32
    %c0_i32_0 = arith.constant 0 : i32
    %c0_i32_1 = arith.constant 0 : i32
    return %c0_i32, %c0_i32_0 : i32, i32
  }
  func.func @transform_3(%arg0: i32) -> (i32, i32, i32) {
    %c0_i32 = arith.constant 0 : i32
    %c0_i32_0 = arith.constant 0 : i32
    %c0_i32_1 = arith.constant 0 : i32
    %c0_i32_2 = arith.constant 0 : i32
    return %c0_i32, %c0_i32_0, %c0_i32_1 : i32, i32, i32
  }
  func.func @transform_4(%arg0: i32) -> (i32, i32) {
    %c0_i32 = arith.constant 0 : i32
    %c0_i32_0 = arith.constant 0 : i32
    %c0_i32_1 = arith.constant 0 : i32
    return %c0_i32, %c0_i32_0 : i32, i32
  }
  func.func @transform_5(%arg0: i32) -> (i32, i32, i32) {
    %c0_i32 = arith.constant 0 : i32
    %c0_i32_0 = arith.constant 0 : i32
    %c0_i32_1 = arith.constant 0 : i32
    return %arg0, %c0_i32, %c0_i32_0 : i32, i32, i32
  }
}

</mosaic_0001>

<bundles_post_ra>
// kernel: up_forward.1
= control target key start
LH: loop header
LB: loop body
LE: loop exit
PB: predicated region body
PF: predicated region fallthrough
CT: control target
= control target key end

     0   :  { %s36058_s18 = smov 0   ;;  %s39969_s0 = inlined_call_operand.vmem [shape: f32[2,4,1024], index: 0, kind: input, shape index: {}]   ;;  %s39970_s1 = inlined_call_operand.vmem [shape: f32[9,8,4], index: 1, kind: input, shape index: {}]   ;;  %s39971_s2 = inlined_call_operand.vmem [shape: f32[8,1], index: 2, kind: input, shape index: {}]   ;;  %s39972_s3 = inlined_call_operand.vmem [shape: f32[9,8,8], index: 3, kind: input, shape index: {}]   ;;  %s39973_s4 = inlined_call_operand.vmem [shape: f32[8,1], index: 4, kind: input, shape index: {}]   ;;  %s39974_s5 = inlined_call_operand.vmem [shape: f32[2,8,1024], index: 5, kind: output, shape index: {}]  }
   0x1 LB: > { %s35056_s19 = sadd.s32 4294967295, %s36016_s18   ;;  %p35060_p0 = scmp.ge.s32.totalorder %s36016_s18, 1  ;;  %s36016_s18 = sphi %s36058_s18, %s15_s18  }
   0x2   : > { %p187_p1 = scmp.lt.s32.totalorder %s36016_s18, 3 }
   0x4   : > { %p188_p2 = pnand %p35060_p0, %p187_p1 }
   0x5   : > { %p215_p3 = scmp.lt.s32.totalorder (!%p188_p2), %s35056_s19, 1  ;;  %v36018_v0 = vmov (!%p188_p2), 0.0   ;;  %s36019_s24 = smov (!%p188_p2), 32   ;;  %v35074_v9 = vld [vmem:[%s39970_s1 + $0x8] sm:$0xff] (!%p188_p2)  ;;  %vm471_vm0 = vcmask (!%p188_p2), 31744   ;;  %v225_v12 = vlaneseq (!%p188_p2)  ;;  %vm475_vm2 = vcmask (!%p188_p2), 1043456  }
   0x6   : > { %191 = sbr.rel (%p188_p2) target bundleno = 2278 (0x8e6), region = 40  ;;  %1031 = vmatprep.mubr.f32.mxu1 (!%p188_p2), %v36018_v0  ;;  %566 = vmatprep.mubr.f32.mxu0 (!%p188_p2), %v36018_v0  ;;  %s36020_s25 = smov (!%p188_p2), 33   ;;  %v473_v10 = vsel (!%p188_p2), %vm471_vm0, %v35074_v9, 0 }
   0x7   : > { %s36021_s26 = smov (!%p188_p2), 31   ;;  %s36022_s27 = smov (!%p188_p2), 1   ;;  %v36172_v11 = vand.u32 (!%p188_p2), 4294901760, %v473_v10  ;;  %v36177_v14 = vand.u32 (!%p188_p2), 127, %v225_v12 }
   0x8   : > { %s36023_s9 = smov (!%p188_p2), 127   ;;  %s36024_s10 = smov (!%p188_p2), 97  }
   0x9   : > { %v36175_v13 = vsub.f32 (!%p188_p2), %v473_v10, %v36172_v11  ;;  %vm436_vm1 = vcmp.lt.s32.totalorder (!%p188_p2), %v36177_v14, 32  ;;  %vm275_vm3 = vcmp.ge.s32.totalorder (!%p188_p2), %v36177_v14, 32  ;;  %vm266_vm4 = vcmp.lt.s32.totalorder (!%p188_p2), %v36177_v14, 33  ;;  %s36025_s15 = smov (!%p188_p2), 96   ;;  %s36026_s16 = smov (!%p188_p2), 95  }
   0xa   : > { %v36214_v33 = vsel (!%p188_p2), %vm275_vm3, 1.0, %v36018_v0  ;;  %vm4263_vm14 = vcmp.lt.s32.totalorder (!%p188_p2), %v36177_v14, 31 }
   0xb   : > { %v36180_v15 = vand.u32 (!%p188_p2), 4294901760, %v36175_v13 }
   0xd   : > { %s39984_s19 = smov (!%p215_p3, %s35056_s19), 1  ;;  %v570_v19 = vsub.f32 %v36175_v13, %v36180_v15 }
   0xe   : > { %s35133_s20 = sshll.u32 %s39984_s19, 5  ;;  %s35134_s30 = sshll.u32 %s39984_s19, 6 }
   0xf   : > { %s36074_s23 = scalar_lea.vmem %s39969_s0, %s35133_s20  ;;  %v36204_v29 = vand.u32 4294901760, %v570_v19 }
  0x10   : > { %v36077_v1 = vld [vmem:[%s36074_s23 + $0x8] sm:$0xff]  ;;  %v36080_v2 = vld [vmem:[%s36074_s23] sm:$0xff]  ;;  %v36095_v5 = vld [vmem:[%s36074_s23 + $0x18] sm:$0xff] }
  0x11   : > { %424 = vrot.lane.b32.xlu0 %v36077_v1, %s36019_s24  ;;  %v36086_v3 = vcombine.high %v36080_v2, %v36080_v2  ;;  %v36090_v4 = vcombine.high %v36077_v1, %v36077_v1  ;;  %v36100_v6 = vld [vmem:[%s36074_s23 + $0x10] sm:$0xff]  ;;  %v36106_v7 = vcombine.high %v36095_v5, %v36095_v5 }
  0x12   : > { %v36112_v8 = vcombine.high %v36100_v6, %v36100_v6 }
  0x13   : > { %422 = vrot.lane.b32.xlu1 %v36086_v3, %s36019_s24 }
  0x15   : > { %426 = vrot.lane.b32.xlu0 %v36090_v4, %s36019_s24 }
  0x17   : > { %420 = vrot.lane.b32.xlu1 %v36080_v2, %s36019_s24 }
  0x19   : > { %432 = vrot.lane.b32.xlu0 %v36095_v5, %s36019_s24 }
  0x1b   : > { %434 = vrot.lane.b32.xlu1 %v36106_v7, %s36019_s24 }
  0x1d   : > { %430 = vrot.lane.b32.xlu0 %v36112_v8, %s36019_s24 }
  0x1f   : > { %254 = vrot.lane.b32.xlu1 %v36077_v1, %s36020_s25 }
  0x21   : > { %256 = vrot.lane.b32.xlu0 %v36090_v4, %s36020_s25 }
  0x23   : > { %252 = vrot.lane.b32.xlu1 %v36086_v3, %s36020_s25 }
  0x25   : > { %428 = vrot.lane.b32.xlu0 %v36100_v6, %s36019_s24 }
  0x27   : > { %262 = vrot.lane.b32.xlu1 %v36095_v5, %s36020_s25 }
  0x29   : > { %264 = vrot.lane.b32.xlu0 %v36106_v7, %s36020_s25 }
  0x2b   : > { %250 = vrot.lane.b32.xlu1 %v36080_v2, %s36020_s25 }
  0x2d   : > { %260 = vrot.lane.b32.xlu0 %v36112_v8, %s36020_s25 }
  0x2f   : > { %4251 = vrot.lane.b32.xlu1 %v36077_v1, %s36021_s26 }
  0x31   : > { %4253 = vrot.lane.b32.xlu0 %v36090_v4, %s36021_s26 }
  0x33   : > { %258 = vrot.lane.b32.xlu1 %v36100_v6, %s36020_s25 }
  0x35   : > { %4249 = vrot.lane.b32.xlu0 %v36086_v3, %s36021_s26 }
  0x37   : > { %4259 = vrot.lane.b32.xlu1 %v36095_v5, %s36021_s26 }
  0x39   : > { %4261 = vrot.lane.b32.xlu0 %v36106_v7, %s36021_s26 }
  0x3b   : > { %4247 = vrot.lane.b32.xlu1 %v36080_v2, %s36021_s26 }
  0x3d   : > { %4257 = vrot.lane.b32.xlu0 %v36112_v8, %s36021_s26 }
  0x3f   : > { %6213 = vrot.lane.b32.xlu1 %v36077_v1, %s36022_s27 }
  0x41   : > { %6215 = vrot.lane.b32.xlu0 %v36090_v4, %s36022_s27 }
  0x43   : > { %4255 = vrot.lane.b32.xlu1 %v36100_v6, %s36021_s26 }
  0x45   : > { %6211 = vrot.lane.b32.xlu0 %v36086_v3, %s36022_s27 }
  0x47   : > { %6221 = vrot.lane.b32.xlu1 %v36095_v5, %s36022_s27 }
  0x49   : > { %6223 = vrot.lane.b32.xlu0 %v36106_v7, %s36022_s27 }
  0x4b   : > { %6209 = vrot.lane.b32.xlu1 %v36080_v2, %s36022_s27 }
  0x4d   : > { %6219 = vrot.lane.b32.xlu0 %v36112_v8, %s36022_s27 }
  0x4f   : > { %6217 = vrot.lane.b32.xlu1 %v36100_v6, %s36022_s27 }
  0x51   : > { %10050 = vrot.lane.b32.xlu0 %v36090_v4, %s36023_s9 }
  0x53   : > { %10052 = vrot.lane.b32.xlu1 %v36100_v6, %s36023_s9 }
  0x55   : > { %10048 = vrot.lane.b32.xlu0 %v36077_v1, %s36023_s9 }
  0x57   : > { %10044 = vrot.lane.b32.xlu1 %v36080_v2, %s36023_s9 }
  0x59   : > { %10058 = vrot.lane.b32.xlu0 %v36106_v7, %s36023_s9 }
  0x5b   : > { %10046 = vrot.lane.b32.xlu1 %v36086_v3, %s36023_s9 }
  0x5d   : > { %10056 = vrot.lane.b32.xlu0 %v36095_v5, %s36023_s9 }
  0x5f   : > { %11996 = vrot.lane.b32.xlu1 %v36090_v4, %s36024_s10 }
  0x63   : > { %10054 = vrot.lane.b32.xlu1 %v36112_v8, %s36023_s9 }
  0x83   : > { %v425_v16 = vpop.permute.xlu0 %424 }
  0x85   : > { %v423_v17 = vpop.permute.xlu1 %422 }
  0x86   : > { %v442_v18 = vsel %vm436_vm1, %v423_v17, %v425_v16 }
  0x87   : > { %v483_v20 = vsel %vm475_vm2, %v442_v18, 0  ;;  %v36188_v21 = vpop.permute.xlu0 %426 }
  0x88   : > { %v36190_v22 = vand.u32 4294901760, %v483_v20  ;;  %v441_v23 = vsel %vm436_vm1, %v425_v16, %v36188_v21 }
  0x89   : > { %v486_v24 = vsel %vm475_vm2, %v441_v23, 0  ;;  %v421_v25 = vpop.permute.xlu1 %420 }
  0x8a   : > { %v36198_v26 = vsub.f32 %v483_v20, %v36190_v22  ;;  %v36200_v27 = vand.u32 4294901760, %v486_v24  ;;  %v443_v28 = vsel %vm436_vm1, %v421_v25, %v423_v17 }
  0x8b   : > { %v480_v30 = vsel %vm475_vm2, %v443_v28, 0  ;;  %v433_v44 = vpop.permute.xlu0 %432 }
  0x8c   : > { %v1044_v31 = vsub.f32 %v486_v24, %v36200_v27  ;;  %v36208_v32 = vand.u32 4294901760, %v480_v30  ;;  %966 = vmatprep.subr.mxu1 %v36200_v27  ;;  %v1051_v34 = vand.u32 4294901760, %v36198_v26 }
  0x8d   : > { %968 = vmatpush1.msra.mxu1 %v36190_v22  ;;  %v435_v35 = vpop.permute.xlu1 %434 }
  0x8e   : > { %v579_v36 = vsub.f32 %v480_v30, %v36208_v32  ;;  %v444_v37 = vsel %vm436_vm1, %v435_v35, %v421_v25  ;;  %501 = vmatprep.subr.mxu0 %v36208_v32  ;;  %1037 = vmatmul.mubr.f32.vlgmr.msra.gmra.mrb[0].mxu1 %v36204_v29  ;;  %v1045_v38 = vand.u32 4294901760, %v1044_v31  ;;  %v1052_v40 = vsub.f32 %v36198_v26, %v1051_v34 }
  0x8f   : > { %v461_v39 = vmul.f32 %v36214_v33, %v444_v37  ;;  %1117 = vmatprep.mubr.f32.mxu1 %v36018_v0  ;;  %v431_v52 = vpop.permute.xlu0 %430  ;;  %v437_v55 = vsel %vm436_vm1, %v433_v44, %v435_v35  ;;  %v36313_v35 = vadd.s32 384, %v36177_v14  ;;  %v36324_v37 = vadd.s32 256, %v36177_v14 }
  0x90   : > { %v1046_v41 = vsub.f32 %v1044_v31, %v1045_v38  ;;  %v580_v42 = vand.u32 4294901760, %v579_v36  ;;  %v1053_v47 = vand.u32 4294901760, %v1052_v40  ;;  %v498_v57 = vsel %vm475_vm2, %v437_v55, 0 }
  0x91   : > { %v477_v43 = vsel %vm475_vm2, %v461_v39, 0  ;;  %v438_v58 = vsel %vm436_vm1, %v431_v52, %v433_v44  ;;  %v36250_v59 = vand.u32 4294901760, %v498_v57 }
  0x92   : > { %v36227_v45 = vand.u32 4294901760, %v477_v43  ;;  %v1047_v46 = vand.u32 4294901760, %v1046_v41  ;;  %v581_v48 = vsub.f32 %v579_v36, %v580_v42  ;;  %v495_v60 = vsel %vm475_vm2, %v438_v58, 0 }
  0x93   : > { %v36240_v56 = vpop.permute.xlu0 %256  ;;  %v36258_v63 = vand.u32 4294901760, %v495_v60  ;;  %v36261_v9 = vsub.f32 %v498_v57, %v36250_v59  ;;  %v301_v41 = vand.u32 31, %v36324_v37 }
  0x94   : > { %v585_v49 = vsub.f32 %v477_v43, %v36227_v45  ;;  %503 = vmatpush1.msra.mxu0 %v36227_v45  ;;  %1048 = vmatprep.subr.mxu1 %v1047_v46  ;;  %v582_v50 = vand.u32 4294901760, %v581_v48 }
  0x95   : > { %572 = vmatmul.mubr.f32.vlgmr.msra.gmra.mrb[0].mxu0 %v36204_v29  ;;  %1054 = vmatpush1.msra.mxu1 %v1053_v47  ;;  %v36271_v16 = vsub.f32 %v495_v60, %v36258_v63  ;;  %v1975_v18 = vand.u32 4294901760, %v36261_v9  ;;  %vm381_vm6 = vcmp.ge.s32.totalorder %v301_v41, 1 }
  0x96   : > { %1119 = vmatmul.mubr.f32.vlgmr.msra.gmra.mrb[0].mxu1 %v36172_v11  ;;  %1127 = vmatprep.subr.mxu1 %v1044_v31  ;;  %v586_v51 = vand.u32 4294901760, %v585_v49  ;;  %v36355_v48 = vsel %vm381_vm6, 1.0, %v36018_v0 }
  0x97   : > { %583 = vmatprep.subr.mxu0 %v582_v50  ;;  %1130 = vmatpush1.msra.mxu1 %v36198_v26  ;;  %v429_v61 = vpop.permute.xlu0 %428  ;;  %v1976_v24 = vsub.f32 %v36261_v9, %v1975_v18 }
  0x98   : > { %1203 = vmatprep.subr.mxu1 %v36200_v27  ;;  %v587_v53 = vsub.f32 %v585_v49, %v586_v51  ;;  %652 = vmatprep.mubr.f32.mxu0 %v36018_v0  ;;  %v439_v62 = vsel %vm436_vm1, %v429_v61, %v431_v52  ;;  %v440_v12 = vsel %vm436_vm1, %v36188_v21, %v429_v61  ;;  %v1981_v21 = vand.u32 4294901760, %v36271_v16 }
  0x99   : > { %1193 = vmatprep.mubr.f32.mxu1 %v36018_v0  ;;  %v492_v10 = vsel %vm475_vm2, %v439_v62, 0  ;;  %v489_v19 = vsel %vm475_vm2, %v440_v12, 0 }
  0x9a   : > { %v588_v54 = vand.u32 4294901760, %v587_v53  ;;  %v36273_v17 = vand.u32 4294901760, %v492_v10  ;;  %v36285_v23 = vand.u32 4294901760, %v489_v19  ;;  %v1982_v25 = vsub.f32 %v36271_v16, %v1981_v21  ;;  %v419_v53 = vld [vmem:[%s39970_s1] sm:$0xff] }
  0x9b   : > { %v36390_v58 = vpop.permute.xlu0 %264  ;;  %v2361_v61 = vsel %vm471_vm0, %v419_v53, 0 }
  0x9c   : > { %589 = vmatpush1.msra.mxu0 %v588_v54  ;;  %v36280_v20 = vsub.f32 %v492_v10, %v36273_v17  ;;  %v36298_v26 = vsub.f32 %v489_v19, %v36285_v23  ;;  %v1983_v28 = vand.u32 4294901760, %v1982_v25 }
  0x9d   : > { %654 = vmatmul.mubr.f32.vlgmr.msra.gmra.mrb[0].mxu0 %v36172_v11  ;;  %662 = vmatprep.subr.mxu0 %v579_v36 }
  0x9e   : > { %665 = vmatpush1.msra.mxu0 %v585_v49  ;;  %1196 = vmatmul.mubr.f32.vlgmr.msra.gmra.mrb[0].mxu1 %v36175_v13  ;;  %v1516_v31 = vand.u32 4294901760, %v36298_v26 }
  0x9f   : > { %1205 = vmatpush1.msra.mxu1 %v36190_v22  ;;  %738 = vmatprep.subr.mxu0 %v36208_v32 }
  0xa0   : > { %1281 = vmatprep.subr.mxu1 %v1045_v38  ;;  %728 = vmatprep.mubr.f32.mxu0 %v36018_v0  ;;  %v1517_v36 = vsub.f32 %v36298_v26, %v1516_v31  ;;  %v308_v38 = vand.u32 31, %v36313_v35 }
  0xa1   : > { %1268 = vmatprep.mubr.f32.mxu1 %v36018_v0 }
  0xa2   : > { %v1518_v39 = vand.u32 4294901760, %v1517_v36  ;;  %vm382_vm5 = vcmp.ge.s32.totalorder %v308_v38, 1  ;;  %vm4275_vm15 = vcmp.lt.s32.totalorder %v308_v38, 31 }
  0xa3   : > { %v36343_v43 = vsel %vm382_vm5, 1.0, %v36018_v0  ;;  %vm4274_vm5 = vcmp.lt.s32.totalorder %v301_v41, 31 }
  0xa4   : > { %v36670_v38 = vsel %vm4274_vm5, 1.0, %v36018_v0  ;;  %vm12006_vm5 = vcmp.lt.s32.totalorder %v36177_v14, 97 }
  0xa5   : > { %731 = vmatmul.mubr.f32.vlgmr.msra.gmra.mrb[0].mxu0 %v36175_v13 }
  0xa6   : > { %740 = vmatpush1.msra.mxu0 %v36227_v45  ;;  %1272 = vmatmul.mubr.f32.vlgmr.msra.gmra.mrb[0].mxu1 %v36180_v15 }
  0xa7   : > { %816 = vmatprep.subr.mxu0 %v580_v42  ;;  %1285 = vmatpush1.msra.mxu1 %v1051_v34  ;;  %v36331_v42 = vadd.s32 128, %v36177_v14 }
  0xa8   : > { %1357 = vmatprep.subr.mxu1 %v36200_v27  ;;  %803 = vmatprep.mubr.f32.mxu0 %v36018_v0  ;;  %v1977_v27 = vand.u32 4294901760, %v1976_v24 }
  0xa9   : > { %1348 = vmatprep.mubr.f32.mxu1 %v36018_v0  ;;  %v294_v46 = vand.u32 31, %v36331_v42 }
  0xab   : > { %vm380_vm8 = vcmp.ge.s32.totalorder %v294_v46, 1  ;;  %vm4273_vm6 = vcmp.lt.s32.totalorder %v294_v46, 31 }
  0xac   : > { %v36385_v55 = vsel %vm380_vm8, 1.0, %v36018_v0  ;;  %v36683_v46 = vsel %vm4273_vm6, 1.0, %v36018_v0 }
  0xad   : > { %807 = vmatmul.mubr.f32.vlgmr.msra.gmra.mrb[0].mxu0 %v36180_v15 }
  0xae   : > { %820 = vmatpush1.msra.mxu0 %v586_v51  ;;  %1350 = vmatmul.mubr.f32.vlgmr.msra.gmra.mrb[0].mxu1 %v36172_v11 }
  0xaf   : > { %892 = vmatprep.subr.mxu0 %v36208_v32  ;;  %1359 = vmatpush1.msra.mxu1 %v36190_v22  ;;  %v1510_v22 = vand.u32 4294901760, %v36280_v20  ;;  %v255_v32 = vpop.permute.xlu1 %254 }
  0xb0   : > { %883 = vmatprep.mubr.f32.mxu0 %v36018_v0  ;;  %1896 = vmatprep.subr.mxu1 %v36250_v59  ;;  %v271_v44 = vsel %vm266_vm4, %v255_v32, %v36240_v56 }
  0xb1   : > { %1422 = vmatprep.mubr.f32.mxu1 %v36018_v0  ;;  %v1511_v30 = vsub.f32 %v36280_v20, %v1510_v22  ;;  %v414_v47 = vmul.f32 %v36343_v43, %v271_v44 }
  0xb3   : > { %v1512_v34 = vand.u32 4294901760, %v1511_v30  ;;  %v253_v40 = vpop.permute.xlu1 %252  ;;  %v2373_v54 = vsel %vm475_vm2, %v414_v47, 0 }
  0xb4   : > { %v272_v49 = vsel %vm266_vm4, %v253_v40, %v255_v32  ;;  %v36396_v62 = vand.u32 4294901760, %v2373_v54 }
  0xb5   : > { %885 = vmatmul.mubr.f32.vlgmr.msra.gmra.mrb[0].mxu0 %v36172_v11  ;;  %v413_v51 = vmul.f32 %v36355_v48, %v272_v49  ;;  %v36482_v49 = vadd.s32 896, %v36177_v14 }
  0xb6   : > { %894 = vmatpush1.msra.mxu0 %v36227_v45  ;;  %1424 = vmatmul.mubr.f32.vlgmr.msra.gmra.mrb[0].mxu1 %v36172_v11  ;;  %v36416_v25 = vsub.f32 %v2373_v54, %v36396_v62  ;;  %v36494_v54 = vadd.s32 640, %v36177_v14 }
  0xb7   : > { %1898 = vmatpush1.msra.mxu1 %v36258_v63  ;;  %1431 = vmatprep.subr.mxu0 %v36273_v17  ;;  %v36350_v45 = vpop.permute.xlu1 %262  ;;  %v336_v53 = vand.u32 31, %v36482_v49  ;;  %vm12022_vm6 = vcmp.lt.s32.totalorder %v36482_v49, 992 }
  0xb8   : > { %1978 = vmatprep.subr.mxu1 %v1977_v27  ;;  %1961 = vmatprep.mubr.f32.mxu1 %v36018_v0 }
  0xb9   : > { %957 = vmatprep.mubr.f32.mxu0 %v36018_v0  ;;  %vm36503_vm10 = vcmp.ge.s32.totalorder %v336_v53, 1 }
  0xba   : > { %1967 = vmatmul.mubr.f32.vlgmr.msra.gmra.mrb[2].mxu1 %v36204_v29 }
  0xbb   : > { %1984 = vmatpush1.msra.mxu1 %v1983_v28  ;;  %2047 = vmatprep.mubr.f32.mxu1 %v36018_v0  ;;  %v251_v52 = vpop.permute.xlu1 %250 }
  0xbc   : > { %2057 = vmatprep.subr.mxu1 %v36261_v9  ;;  %v273_v57 = vsel %vm266_vm4, %v251_v52, %v253_v40  ;;  %v2370_v9 = vsel %vm475_vm2, %v413_v51, 0  ;;  %v274_v12 = vsel %vm266_vm4, %v36390_v58, %v251_v52  ;;  %v36488_v52 = vadd.s32 768, %v36177_v14 }
  0xbd   : > { %959 = vmatmul.mubr.f32.vlgmr.msra.gmra.mrb[0].mxu0 %v36172_v11  ;;  %v412_v10 = vmul.f32 %v36385_v55, %v273_v57  ;;  %v36408_v19 = vand.u32 4294901760, %v2370_v9 }
  0xbe   : > { %1433 = vmatpush1.msra.mxu0 %v36285_v23  ;;  %1496 = vmatprep.mubr.f32.mxu0 %v36018_v0 }
  0xbf   : > { %1513 = vmatprep.subr.mxu0 %v1512_v34 }
  0xc1   : > { %1502 = vmatmul.mubr.f32.vlgmr.msra.gmra.mrb[2].mxu0 %v36204_v29  ;;  %v287_v29 = vand.u32 31, %v36177_v14 }
  0xc2   : > { %1519 = vmatpush1.msra.mxu0 %v1518_v39  ;;  %2049 = vmatmul.mubr.f32.vlgmr.msra.gmra.mrb[2].mxu1 %v36172_v11 }
  0xc3   : > { %1592 = vmatprep.subr.mxu0 %v36280_v20  ;;  %2060 = vmatpush1.msra.mxu1 %v36271_v16  ;;  %vm36362_vm7 = vcmp.ge.s32.totalorder %v287_v29, 1  ;;  %v36426_v20 = vsub.f32 %v2370_v9, %v36408_v19  ;;  %v322_v9 = vand.u32 31, %v36494_v54  ;;  %vm36662_vm8 = vcmp.lt.s32.totalorder %v287_v29, 31  ;;  %v35083_v29 = vld [vmem:[%s39970_s1 + $0x10] sm:$0xff] }
  0xc4   : > { %2133 = vmatprep.subr.mxu1 %v36250_v59  ;;  %1582 = vmatprep.mubr.f32.mxu0 %v36018_v0  ;;  %vm387_vm9 = vmand %vm275_vm3, %vm36362_vm7 }
  0xc5   : > { %2123 = vmatprep.mubr.f32.mxu1 %v36018_v0  ;;  %v36393_v60 = vsel %vm387_vm9, 1.0, %v36018_v0  ;;  %v2938_v32 = vand.u32 4294901760, %v36426_v20  ;;  %vm384_vm12 = vcmp.ge.s32.totalorder %v322_v9, 1  ;;  %vm4280_vm9 = vmand %vm275_vm3, %vm36662_vm8  ;;  %vm36809_vm3 = vcmp.lt.s32.totalorder %v336_v53, 31 }
  0xc6   : > { %v411_v24 = vmul.f32 %v36393_v60, %v274_v12  ;;  %v36517_v12 = vsel %vm36503_vm10, 1.0, %v36018_v0 }
  0xc9   : > { %1584 = vmatmul.mubr.f32.vlgmr.msra.gmra.mrb[2].mxu0 %v36172_v11 }
  0xca   : > { %1595 = vmatpush1.msra.mxu0 %v36298_v26  ;;  %2126 = vmatmul.mubr.f32.vlgmr.msra.gmra.mrb[2].mxu1 %v36175_v13 }
  0xcb   : > { %1668 = vmatprep.subr.mxu0 %v36273_v17  ;;  %2135 = vmatpush1.msra.mxu1 %v36258_v63 }
  0xcc   : > { %2211 = vmatprep.subr.mxu1 %v1975_v18  ;;  %1658 = vmatprep.mubr.f32.mxu0 %v36018_v0  ;;  %v36406_v18 = vand.u32 4294901760, %v2361_v61 }
  0xcd   : > { %2198 = vmatprep.mubr.f32.mxu1 %v36018_v0 }
  0xce   : > { %v36423_v27 = vsub.f32 %v2361_v61, %v36406_v18  ;;  %v36508_v61 = vpop.permute.xlu1 %4251 }
  0xd0   : > { %v36439_v28 = vand.u32 4294901760, %v36423_v27 }
  0xd1   : > { %1661 = vmatmul.mubr.f32.vlgmr.msra.gmra.mrb[2].mxu0 %v36175_v13  ;;  %v2367_v13 = vsel %vm475_vm2, %v412_v10, 0  ;;  %v36512_v10 = vadd.s32 512, %v36177_v14 }
  0xd2   : > { %1670 = vmatpush1.msra.mxu0 %v36285_v23  ;;  %2202 = vmatmul.mubr.f32.vlgmr.msra.gmra.mrb[2].mxu1 %v36180_v15  ;;  %v36428_v16 = vand.u32 4294901760, %v2367_v13 }
  0xd3   : > { %1746 = vmatprep.subr.mxu0 %v1510_v22  ;;  %2215 = vmatpush1.msra.mxu1 %v1981_v21  ;;  %v2364_v21 = vsel %vm475_vm2, %v411_v24, 0  ;;  %v2932_v22 = vand.u32 4294901760, %v36416_v25  ;;  %v267_v24 = vsel %vm266_vm4, %v36350_v45, %v36390_v58 }
  0xd4   : > { %2287 = vmatprep.subr.mxu1 %v36250_v59  ;;  %1733 = vmatprep.mubr.f32.mxu0 %v36018_v0  ;;  %v36436_v59 = vand.u32 4294901760, %v2364_v21  ;;  %v36442_v30 = vsub.f32 %v2367_v13, %v36428_v16  ;;  %v261_v13 = vpop.permute.xlu0 %260 }
  0xd5   : > { %2278 = vmatprep.mubr.f32.mxu1 %v36018_v0 }
  0xd6   : > { %v36454_v26 = vsub.f32 %v2364_v21, %v36436_v59  ;;  %v315_v21 = vand.u32 31, %v36512_v10 }
  0xd8   : > { %v2473_v39 = vand.u32 4294901760, %v36454_v26  ;;  %vm383_vm13 = vcmp.ge.s32.totalorder %v315_v21, 1 }
  0xd9   : > { %1737 = vmatmul.mubr.f32.vlgmr.msra.gmra.mrb[2].mxu0 %v36180_v15  ;;  %v2933_v15 = vsub.f32 %v36416_v25, %v2932_v22 }
  0xda   : > { %1750 = vmatpush1.msra.mxu0 %v1516_v31  ;;  %2280 = vmatmul.mubr.f32.vlgmr.msra.gmra.mrb[2].mxu1 %v36172_v11  ;;  %v2467_v31 = vand.u32 4294901760, %v36442_v30 }
  0xdb   : > { %1822 = vmatprep.subr.mxu0 %v36273_v17  ;;  %2289 = vmatpush1.msra.mxu1 %v36258_v63  ;;  %v2457_v17 = vsub.f32 %v36423_v27, %v36439_v28  ;;  %v2939_v63 = vsub.f32 %v36426_v20, %v2938_v32  ;;  %v2934_v34 = vand.u32 4294901760, %v2933_v15  ;;  %v418_v15 = vmul.f32 %v36517_v12, %v267_v24 }
  0xdc   : > { %2853 = vmatprep.subr.mxu1 %v36396_v62  ;;  %1813 = vmatprep.mubr.f32.mxu0 %v36018_v0  ;;  %v2468_v44 = vsub.f32 %v36442_v30, %v2467_v31 }
  0xdd   : > { %2352 = vmatprep.mubr.f32.mxu1 %v36018_v0  ;;  %v36465_v36 = vand.u32 4294901760, %v2457_v17  ;;  %v2940_v40 = vand.u32 4294901760, %v2939_v63  ;;  %v268_v17 = vsel %vm266_vm4, %v261_v13, %v36350_v45  ;;  %v259_v63 = vpop.permute.xlu1 %258  ;;  %v2385_v45 = vsel %vm475_vm2, %v418_v15, 0 }
  0xde   : > { %v2469_v47 = vand.u32 4294901760, %v2468_v44 }
  0xe1   : > { %1815 = vmatmul.mubr.f32.vlgmr.msra.gmra.mrb[2].mxu0 %v36172_v11 }
  0xe2   : > { %1824 = vmatpush1.msra.mxu0 %v36285_v23  ;;  %2354 = vmatmul.mubr.f32.vlgmr.msra.gmra.mrb[2].mxu1 %v36172_v11  ;;  %v2474_v23 = vsub.f32 %v36454_v26, %v2473_v39 }
  0xe3   : > { %2855 = vmatpush1.msra.mxu1 %v36408_v19  ;;  %2388 = vmatprep.subr.mxu0 %v36428_v16 }
  0xe4   : > { %2935 = vmatprep.subr.mxu1 %v2934_v34  ;;  %2918 = vmatprep.mubr.f32.mxu1 %v36018_v0  ;;  %v2475_v51 = vand.u32 4294901760, %v2474_v23  ;;  %v36545_v34 = vsel %vm384_vm12, 1.0, %v36018_v0  ;;  %v270_v23 = vsel %vm266_vm4, %v36240_v56, %v259_v63  ;;  %vm4277_vm12 = vcmp.lt.s32.totalorder %v322_v9, 31 }
  0xe5   : > { %1887 = vmatprep.mubr.f32.mxu0 %v36018_v0  ;;  %v36855_v54 = vsel %vm4277_vm12, 1.0, %v36018_v0 }
  0xe6   : > { %2924 = vmatmul.mubr.f32.vlgmr.msra.gmra.mrb[0].mxu1 %v36465_v36 }
  0xe7   : > { %2941 = vmatpush1.msra.mxu1 %v2940_v40  ;;  %3004 = vmatprep.mubr.f32.mxu1 %v36018_v0  ;;  %v269_v40 = vsel %vm266_vm4, %v259_v63, %v261_v13 }
  0xe8   : > { %3014 = vmatprep.subr.mxu1 %v36416_v25  ;;  %v416_v25 = vmul.f32 %v36545_v34, %v269_v40 }
  0xe9   : > { %1889 = vmatmul.mubr.f32.vlgmr.msra.gmra.mrb[2].mxu0 %v36172_v11  ;;  %v329_v11 = vand.u32 31, %v36488_v52 }
  0xea   : > { %2390 = vmatpush1.msra.mxu0 %v36436_v59  ;;  %2453 = vmatprep.mubr.f32.mxu0 %v36018_v0  ;;  %v2379_v24 = vsel %vm475_vm2, %v416_v25, 0 }
  0xeb   : > { %2470 = vmatprep.subr.mxu0 %v2469_v47  ;;  %vm385_vm11 = vcmp.ge.s32.totalorder %v329_v11, 1  ;;  %v36561_v47 = vand.u32 4294901760, %v2385_v45 }
  0xec   : > { %v36535_v58 = vsel %vm385_vm11, 1.0, %v36018_v0  ;;  %vm4278_vm11 = vcmp.lt.s32.totalorder %v329_v11, 31 }
  0xed   : > { %2459 = vmatmul.mubr.f32.vlgmr.msra.gmra.mrb[0].mxu0 %v36465_v36  ;;  %v417_v44 = vmul.f32 %v36535_v58, %v268_v17  ;;  %v36578_v15 = vsub.f32 %v2385_v45, %v36561_v47  ;;  %v36845_v52 = vsel %vm4278_vm11, 1.0, %v36018_v0 }
  0xee   : > { %2476 = vmatpush1.msra.mxu0 %v2475_v51  ;;  %3006 = vmatmul.mubr.f32.vlgmr.msra.gmra.mrb[0].mxu1 %v36406_v18 }
  0xef   : > { %2549 = vmatprep.subr.mxu0 %v36442_v30  ;;  %3017 = vmatpush1.msra.mxu1 %v36426_v20  ;;  %v2382_v51 = vsel %vm475_vm2, %v417_v44, 0  ;;  %v36580_v30 = vand.u32 4294901760, %v2379_v24 }
  0xf0   : > { %3090 = vmatprep.subr.mxu1 %v36396_v62  ;;  %2539 = vmatprep.mubr.f32.mxu0 %v36018_v0  ;;  %v36574_v13 = vand.u32 4294901760, %v2382_v51 }
  0xf1   : > { %3080 = vmatprep.mubr.f32.mxu1 %v36018_v0 }
  0xf5   : > { %2541 = vmatmul.mubr.f32.vlgmr.msra.gmra.mrb[0].mxu0 %v36406_v18 }
  0xf6   : > { %2552 = vmatpush1.msra.mxu0 %v36454_v26  ;;  %3083 = vmatmul.mubr.f32.vlgmr.msra.gmra.mrb[0].mxu1 %v36423_v27 }
  0xf7   : > { %2625 = vmatprep.subr.mxu0 %v36428_v16  ;;  %3092 = vmatpush1.msra.mxu1 %v36408_v19 }
  0xf8   : > { %3168 = vmatprep.subr.mxu1 %v2932_v22  ;;  %2615 = vmatprep.mubr.f32.mxu0 %v36018_v0  ;;  %v36556_v22 = vsel %vm383_vm13, 1.0, %v36018_v0  ;;  %vm4276_vm13 = vcmp.lt.s32.totalorder %v315_v21, 31 }
  0xf9   : > { %3155 = vmatprep.mubr.f32.mxu1 %v36018_v0  ;;  %v415_v56 = vmul.f32 %v36556_v22, %v270_v23 }
  0xfb   : > { %v2376_v20 = vsel %vm475_vm2, %v415_v56, 0  ;;  %v36647_v56 = vsel %vm4275_vm15, 1.0, %v36018_v0  ;;  %vm6225_vm15 = vcmp.lt.s32.totalorder %v36177_v14, 1 }
  0xfc   : > { %v36596_v17 = vand.u32 4294901760, %v2376_v20 }
  0xfd   : > { %2618 = vmatmul.mubr.f32.vlgmr.msra.gmra.mrb[0].mxu0 %v36423_v27 }
  0xfe   : > { %2627 = vmatpush1.msra.mxu0 %v36436_v59  ;;  %3159 = vmatmul.mubr.f32.vlgmr.msra.gmra.mrb[0].mxu1 %v36439_v28 }
  0xff   : > { %2703 = vmatprep.subr.mxu0 %v2467_v31  ;;  %3172 = vmatpush1.msra.mxu1 %v2938_v32  ;;  %v36584_v32 = vsub.f32 %v2382_v51, %v36574_v13  ;;  %v36592_v31 = vsub.f32 %v2379_v24, %v36580_v30  ;;  %v36634_v24 = vpop.permute.xlu0 %4253 }
 0x100   : > { %3244 = vmatprep.subr.mxu1 %v36396_v62  ;;  %2690 = vmatprep.mubr.f32.mxu0 %v36018_v0  ;;  %v3862_v62 = vand.u32 4294901760, %v36578_v15 }
 0x101   : > { %3235 = vmatprep.mubr.f32.mxu1 %v36018_v0  ;;  %v3868_v26 = vand.u32 4294901760, %v36584_v32  ;;  %v3397_v63 = vand.u32 4294901760, %v36592_v31 }
 0x103   : > { %v3398_v44 = vsub.f32 %v36592_v31, %v3397_v63 }
 0x105   : > { %2694 = vmatmul.mubr.f32.vlgmr.msra.gmra.mrb[0].mxu0 %v36439_v28 }
 0x106   : > { %2707 = vmatpush1.msra.mxu0 %v2473_v39  ;;  %3237 = vmatmul.mubr.f32.vlgmr.msra.gmra.mrb[0].mxu1 %v36406_v18  ;;  %v3863_v39 = vsub.f32 %v36578_v15, %v3862_v62 }
 0x107   : > { %2779 = vmatprep.subr.mxu0 %v36428_v16  ;;  %3246 = vmatpush1.msra.mxu1 %v36408_v19  ;;  %v36607_v16 = vsub.f32 %v2376_v20, %v36596_v17  ;;  %v3869_v19 = vsub.f32 %v36584_v32, %v3868_v26  ;;  %v4268_v20 = vsel %vm4263_vm14, %v36508_v61, %v36634_v24 }
 0x108   : > { %3783 = vmatprep.subr.mxu1 %v36561_v47  ;;  %2770 = vmatprep.mubr.f32.mxu0 %v36018_v0  ;;  %v3864_v40 = vand.u32 4294901760, %v3863_v39  ;;  %v4250_v39 = vpop.permute.xlu0 %4249  ;;  %v4307_v37 = vmul.f32 %v36647_v56, %v4268_v20 }
 0x109   : > { %3309 = vmatprep.mubr.f32.mxu1 %v36018_v0  ;;  %v3403_v45 = vand.u32 4294901760, %v36607_v16  ;;  %v3870_v25 = vand.u32 4294901760, %v3869_v19  ;;  %v4269_v41 = vsel %vm4263_vm14, %v4250_v39, %v36508_v61 }
 0x10b   : > { %v3404_v23 = vsub.f32 %v36607_v16, %v3403_v45 }
 0x10c   : > { %v36691_v61 = vpop.permute.xlu0 %4261 }
 0x10d   : > { %2772 = vmatmul.mubr.f32.vlgmr.msra.gmra.mrb[0].mxu0 %v36406_v18  ;;  %v3405_v51 = vand.u32 4294901760, %v3404_v23 }
 0x10e   : > { %2781 = vmatpush1.msra.mxu0 %v36436_v59  ;;  %3311 = vmatmul.mubr.f32.vlgmr.msra.gmra.mrb[0].mxu1 %v36406_v18  ;;  %v3399_v59 = vand.u32 4294901760, %v3398_v44 }
 0x10f   : > { %3785 = vmatpush1.msra.mxu1 %v36574_v13  ;;  %3318 = vmatprep.subr.mxu0 %v36580_v30 }
 0x110   : > { %3865 = vmatprep.subr.mxu1 %v3864_v40  ;;  %3848 = vmatprep.mubr.f32.mxu1 %v36018_v0  ;;  %v4315_v40 = vsel %vm471_vm0, %v35083_v29, 0 }
 0x111   : > { %2844 = vmatprep.mubr.f32.mxu0 %v36018_v0  ;;  %v36709_v20 = vand.u32 4294901760, %v4315_v40 }
 0x112   : > { %3854 = vmatmul.mubr.f32.vlgmr.msra.gmra.mrb[2].mxu1 %v36465_v36 }
 0x113   : > { %3871 = vmatpush1.msra.mxu1 %v3870_v25  ;;  %3934 = vmatprep.mubr.f32.mxu1 %v36018_v0  ;;  %v36698_v25 = vsel %vm4280_vm9, 1.0, %v36018_v0  ;;  %vm15914_vm9 = vcmp.lt.s32.totalorder %v36177_v14, 95 }
 0x114   : > { %3944 = vmatprep.subr.mxu1 %v36578_v15  ;;  %v4306_v15 = vmul.f32 %v36670_v38, %v4269_v41 }
 0x115   : > { %2846 = vmatmul.mubr.f32.vlgmr.msra.gmra.mrb[0].mxu0 %v36406_v18 }
 0x116   : > { %3320 = vmatpush1.msra.mxu0 %v36596_v17  ;;  %3383 = vmatprep.mubr.f32.mxu0 %v36018_v0 }
 0x117   : > { %3400 = vmatprep.subr.mxu0 %v3399_v59 }
 0x119   : > { %3389 = vmatmul.mubr.f32.vlgmr.msra.gmra.mrb[2].mxu0 %v36465_v36  ;;  %v36644_v36 = vpop.permute.xlu1 %4259 }
 0x11a   : > { %3406 = vmatpush1.msra.mxu0 %v3405_v51  ;;  %3936 = vmatmul.mubr.f32.vlgmr.msra.gmra.mrb[2].mxu1 %v36406_v18  ;;  %v4324_v51 = vsel %vm475_vm2, %v4306_v15, 0  ;;  %v4264_v53 = vsel %vm4263_vm14, %v36644_v36, %v36691_v61 }
 0x11b   : > { %3479 = vmatprep.subr.mxu0 %v36592_v31  ;;  %3947 = vmatpush1.msra.mxu1 %v36584_v32  ;;  %v36726_v31 = vsub.f32 %v4315_v40, %v36709_v20 }
 0x11c   : > { %4020 = vmatprep.subr.mxu1 %v36561_v47  ;;  %3469 = vmatprep.mubr.f32.mxu0 %v36018_v0 }
 0x11d   : > { %4010 = vmatprep.mubr.f32.mxu1 %v36018_v0  ;;  %v4248_v42 = vpop.permute.xlu1 %4247  ;;  %v36742_v29 = vand.u32 4294901760, %v36726_v31 }
 0x11e   : > { %v4270_v19 = vsel %vm4263_vm14, %v4248_v42, %v4250_v39  ;;  %v4271_v59 = vsel %vm4263_vm14, %v36691_v61, %v4248_v42 }
 0x11f   : > { %v4305_v44 = vmul.f32 %v36683_v46, %v4270_v19  ;;  %v4304_v39 = vmul.f32 %v36698_v25, %v4271_v59 }
 0x121   : > { %3471 = vmatmul.mubr.f32.vlgmr.msra.gmra.mrb[2].mxu0 %v36406_v18 }
 0x122   : > { %3482 = vmatpush1.msra.mxu0 %v36607_v16  ;;  %4013 = vmatmul.mubr.f32.vlgmr.msra.gmra.mrb[2].mxu1 %v36423_v27 }
 0x123   : > { %3555 = vmatprep.subr.mxu0 %v36580_v30  ;;  %4022 = vmatpush1.msra.mxu1 %v36574_v13 }
 0x124   : > { %4098 = vmatprep.subr.mxu1 %v3862_v62  ;;  %3545 = vmatprep.mubr.f32.mxu0 %v36018_v0  ;;  %v4327_v62 = vsel %vm475_vm2, %v4307_v37, 0  ;;  %v36719_v37 = vand.u32 4294901760, %v4324_v51 }
 0x125   : > { %4085 = vmatprep.mubr.f32.mxu1 %v36018_v0  ;;  %v36704_v23 = vand.u32 4294901760, %v4327_v62 }
 0x127   : > { %v36723_v41 = vsub.f32 %v4327_v62, %v36704_v23 }
 0x129   : > { %3548 = vmatmul.mubr.f32.vlgmr.msra.gmra.mrb[2].mxu0 %v36423_v27  ;;  %v4321_v27 = vsel %vm475_vm2, %v4305_v44, 0  ;;  %v4886_v42 = vand.u32 4294901760, %v36723_v41 }
 0x12a   : > { %3557 = vmatpush1.msra.mxu0 %v36596_v17  ;;  %4089 = vmatmul.mubr.f32.vlgmr.msra.gmra.mrb[2].mxu1 %v36439_v28  ;;  %v36728_v32 = vand.u32 4294901760, %v4321_v27 }
 0x12b   : > { %3633 = vmatprep.subr.mxu0 %v3397_v63  ;;  %4102 = vmatpush1.msra.mxu1 %v3868_v26  ;;  %v4318_v26 = vsel %vm475_vm2, %v4304_v39, 0  ;;  %v36732_v63 = vsub.f32 %v4324_v51, %v36719_v37  ;;  %v36823_v39 = vsel %vm36809_vm3, 1.0, %v36018_v0 }
 0x12c   : > { %4174 = vmatprep.subr.mxu1 %v36561_v47  ;;  %3620 = vmatprep.mubr.f32.mxu0 %v36018_v0  ;;  %v36738_v47 = vand.u32 4294901760, %v4318_v26  ;;  %v36745_v19 = vsub.f32 %v4321_v27, %v36728_v32  ;;  %v4258_v27 = vpop.permute.xlu0 %4257  ;;  %v4311_v5 = vmul.f32 %v36823_v39, %v4264_v53 }
 0x12d   : > { %4165 = vmatprep.mubr.f32.mxu1 %v36018_v0  ;;  %v4265_v11 = vsel %vm4263_vm14, %v4258_v27, %v36644_v36 }
 0x12e   : > { %v36754_v16 = vsub.f32 %v4318_v26, %v36738_v47  ;;  %v36833_v26 = vld [vmem:[%s36074_s23] sm:$0xff]  ;;  %v4310_v36 = vmul.f32 %v36845_v52, %v4265_v11 }
 0x12f   : > { %11990 = vrot.lane.b32.xlu1 %v36833_v26, %s36024_s10 }
 0x130   : > { %v4427_v44 = vand.u32 4294901760, %v36754_v16  ;;  %v4336_v21 = vsel %vm475_vm2, %v4310_v36, 0 }
 0x131   : > { %3624 = vmatmul.mubr.f32.vlgmr.msra.gmra.mrb[2].mxu0 %v36439_v28  ;;  %v4892_v28 = vand.u32 4294901760, %v36732_v63 }
 0x132   : > { %3637 = vmatpush1.msra.mxu0 %v3403_v45  ;;  %4167 = vmatmul.mubr.f32.vlgmr.msra.gmra.mrb[2].mxu1 %v36406_v18  ;;  %v4887_v45 = vsub.f32 %v36723_v41, %v4886_v42 }
 0x133   : > { %3709 = vmatprep.subr.mxu0 %v36580_v30  ;;  %4176 = vmatpush1.msra.mxu1 %v36574_v13  ;;  %v4411_v30 = vsub.f32 %v36726_v31, %v36742_v29  ;;  %v4421_v13 = vand.u32 4294901760, %v36745_v19  ;;  %v4893_v15 = vsub.f32 %v36732_v63, %v4892_v28 }
 0x134   : > { %4807 = vmatprep.subr.mxu1 %v36704_v23  ;;  %3700 = vmatprep.mubr.f32.mxu0 %v36018_v0  ;;  %v4888_v62 = vand.u32 4294901760, %v4887_v45  ;;  %v36860_v45 = vld [vmem:[%s36074_s23 + $0x10] sm:$0xff] }
 0x135   : > { %4239 = vmatprep.mubr.f32.mxu1 %v36018_v0  ;;  %v36772_v40 = vand.u32 4294901760, %v4411_v30  ;;  %v4422_v6 = vsub.f32 %v36745_v19, %v4421_v13  ;;  %v4894_v59 = vand.u32 4294901760, %v4893_v15  ;;  %11998 = vrot.lane.b32.xlu0 %v36860_v45, %s36024_s10  ;;  %v36873_v30 = vld [vmem:[%s36074_s23 + $0x8] sm:$0xff]  ;;  %v36878_v15 = vsel %vm4276_vm13, 1.0, %v36018_v0 }
 0x136   : > { %11992 = vrot.lane.b32.xlu1 %v36086_v3, %s36024_s10 }
 0x137   : > { %v4423_v51 = vand.u32 4294901760, %v4422_v6 }
 0x139   : > { %3702 = vmatmul.mubr.f32.vlgmr.msra.gmra.mrb[2].mxu0 %v36406_v18  ;;  %11994 = vrot.lane.b32.xlu0 %v36873_v30, %s36024_s10 }
 0x13a   : > { %3711 = vmatpush1.msra.mxu0 %v36596_v17  ;;  %4241 = vmatmul.mubr.f32.vlgmr.msra.gmra.mrb[2].mxu1 %v36406_v18  ;;  %v4428_v17 = vsub.f32 %v36754_v16, %v4427_v44 }
 0x13b   : > { %4809 = vmatpush1.msra.mxu1 %v36719_v37  ;;  %4342 = vmatprep.subr.mxu0 %v36728_v32 }
 0x13c   : > { %4889 = vmatprep.subr.mxu1 %v4888_v62  ;;  %4872 = vmatprep.mubr.f32.mxu1 %v36018_v0  ;;  %v4429_v2 = vand.u32 4294901760, %v4428_v17 }
 0x13d   : > { %3774 = vmatprep.mubr.f32.mxu0 %v36018_v0  ;;  %12000 = vrot.lane.b32.xlu1 %v36112_v8, %s36024_s10 }
 0x13e   : > { %4878 = vmatmul.mubr.f32.vlgmr.msra.gmra.mrb[0].mxu1 %v36772_v40  ;;  %12004 = vrot.lane.b32.xlu0 %v36106_v7, %s36024_s10 }
 0x13f   : > { %4895 = vmatpush1.msra.mxu1 %v4894_v59  ;;  %4958 = vmatprep.mubr.f32.mxu1 %v36018_v0  ;;  %v36896_v59 = vand.u32 4294901760, %v4336_v21 }
 0x140   : > { %4968 = vmatprep.subr.mxu1 %v36723_v41  ;;  %v4339_v41 = vsel %vm475_vm2, %v4311_v5, 0 }
 0x141   : > { %3776 = vmatmul.mubr.f32.vlgmr.msra.gmra.mrb[2].mxu0 %v36406_v18  ;;  %v36816_v18 = vpop.permute.xlu1 %6213  ;;  %v36883_v10 = vand.u32 4294901760, %v4339_v41  ;;  %13960 = vrot.lane.b32.xlu1 %v36860_v45, %s36025_s15 }
 0x142   : > { %4344 = vmatpush1.msra.mxu0 %v36738_v47  ;;  %4407 = vmatprep.mubr.f32.mxu0 %v36018_v0 }
 0x143   : > { %4424 = vmatprep.subr.mxu0 %v4423_v51 }
 0x145   : > { %4413 = vmatmul.mubr.f32.vlgmr.msra.gmra.mrb[0].mxu0 %v36772_v40  ;;  %v4256_v61 = vpop.permute.xlu1 %4255  ;;  %13952 = vrot.lane.b32.xlu1 %v36833_v26, %s36025_s15 }
 0x146   : > { %4430 = vmatpush1.msra.mxu0 %v4429_v2  ;;  %4960 = vmatmul.mubr.f32.vlgmr.msra.gmra.mrb[0].mxu1 %v36709_v20  ;;  %v4266_v9 = vsel %vm4263_vm14, %v4256_v61, %v4258_v27  ;;  %v4267_v62 = vsel %vm4263_vm14, %v36634_v24, %v4256_v61 }
 0x147   : > { %4503 = vmatprep.subr.mxu0 %v36745_v19  ;;  %4971 = vmatpush1.msra.mxu1 %v36732_v63  ;;  %v4308_v24 = vmul.f32 %v36878_v15, %v4267_v62  ;;  %v36902_v19 = vsub.f32 %v4339_v41, %v36883_v10  ;;  %v36963_v41 = vpop.permute.xlu0 %6215 }
 0x148   : > { %5044 = vmatprep.subr.mxu1 %v36704_v23  ;;  %4493 = vmatprep.mubr.f32.mxu0 %v36018_v0 }
 0x149   : > { %5034 = vmatprep.mubr.f32.mxu1 %v36018_v0  ;;  %13954 = vrot.lane.b32.xlu1 %v36086_v3, %s36025_s15 }
 0x14b   : > { %v6212_v62 = vpop.permute.xlu0 %6211 }
 0x14d   : > { %4495 = vmatmul.mubr.f32.vlgmr.msra.gmra.mrb[0].mxu0 %v36709_v20  ;;  %15904 = vrot.lane.b32.xlu1 %v36090_v4, %s36026_s16 }
 0x14e   : > { %4506 = vmatpush1.msra.mxu0 %v36754_v16  ;;  %5037 = vmatmul.mubr.f32.vlgmr.msra.gmra.mrb[0].mxu1 %v36726_v31 }
 0x14f   : > { %4579 = vmatprep.subr.mxu0 %v36728_v32  ;;  %5046 = vmatpush1.msra.mxu1 %v36719_v37 }
 0x150   : > { %5122 = vmatprep.subr.mxu1 %v4886_v42  ;;  %4569 = vmatprep.mubr.f32.mxu0 %v36018_v0  ;;  %v4309_v42 = vmul.f32 %v36855_v54, %v4266_v9 }
 0x151   : > { %5109 = vmatprep.mubr.f32.mxu1 %v36018_v0  ;;  %15902 = vrot.lane.b32.xlu1 %v36873_v30, %s36026_s16 }
 0x152   : > { %v4333_v6 = vsel %vm475_vm2, %v4309_v42, 0  ;;  %v36971_v42 = vpop.permute.xlu1 %6221 }
 0x153   : > { %v36906_v63 = vand.u32 4294901760, %v4333_v6 }
 0x155   : > { %4572 = vmatmul.mubr.f32.vlgmr.msra.gmra.mrb[0].mxu0 %v36726_v31  ;;  %v36918_v17 = vsub.f32 %v4333_v6, %v36906_v63  ;;  %v6231_v6 = vsel %vm6225_vm15, %v6212_v62, %v36816_v18  ;;  %15898 = vrot.lane.b32.xlu1 %v36833_v26, %s36026_s16 }
 0x156   : > { %4581 = vmatpush1.msra.mxu0 %v36738_v47  ;;  %5113 = vmatmul.mubr.f32.vlgmr.msra.gmra.mrb[0].mxu1 %v36742_v29 }
 0x157   : > { %4657 = vmatprep.subr.mxu0 %v4421_v13  ;;  %5126 = vmatpush1.msra.mxu1 %v4892_v28  ;;  %v36910_v28 = vsub.f32 %v4336_v21, %v36896_v59  ;;  %v5816_v13 = vand.u32 4294901760, %v36902_v19 }
 0x158   : > { %5198 = vmatprep.subr.mxu1 %v36704_v23  ;;  %4644 = vmatprep.mubr.f32.mxu0 %v36018_v0  ;;  %v4330_v23 = vsel %vm475_vm2, %v4308_v24, 0  ;;  %v6210_v24 = vpop.permute.xlu1 %6209 }
 0x159   : > { %5189 = vmatprep.mubr.f32.mxu1 %v36018_v0  ;;  %v36922_v51 = vand.u32 4294901760, %v4330_v23  ;;  %v5822_v16 = vand.u32 4294901760, %v36910_v28  ;;  %v5817_v2 = vsub.f32 %v36902_v19, %v5816_v13  ;;  %15900 = vrot.lane.b32.xlu1 %v36086_v3, %s36026_s16 }
 0x15b   : > { %v5823_v53 = vsub.f32 %v36910_v28, %v5822_v16  ;;  %v5818_v27 = vand.u32 4294901760, %v5817_v2  ;;  %v36993_v2 = vpop.permute.xlu0 %6223 }
 0x15d   : > { %4648 = vmatmul.mubr.f32.vlgmr.msra.gmra.mrb[0].mxu0 %v36742_v29  ;;  %v5824_v61 = vand.u32 4294901760, %v5823_v53  ;;  %v6252_v53 = vmul.f32 %v36355_v48, %v6231_v6  ;;  %15908 = vrot.lane.b32.xlu1 %v36112_v8, %s36026_s16 }
 0x15e   : > { %4661 = vmatpush1.msra.mxu0 %v4427_v44  ;;  %5191 = vmatmul.mubr.f32.vlgmr.msra.gmra.mrb[0].mxu1 %v36709_v20  ;;  %v36929_v44 = vld [vmem:[%s36074_s23 + $0x18] sm:$0xff] }
 0x15f   : > { %4733 = vmatprep.subr.mxu0 %v36728_v32  ;;  %5200 = vmatpush1.msra.mxu1 %v36719_v37  ;;  %v5351_v32 = vand.u32 4294901760, %v36918_v17  ;;  %v36936_v37 = vsub.f32 %v4330_v23, %v36922_v51  ;;  %v6232_v23 = vsel %vm6225_vm15, %v6210_v24, %v6212_v62 }
 0x160   : > { %5737 = vmatprep.subr.mxu1 %v36883_v10  ;;  %4724 = vmatprep.mubr.f32.mxu0 %v36018_v0 }
 0x161   : > { %5263 = vmatprep.mubr.f32.mxu1 %v36018_v0  ;;  %12002 = vrot.lane.b32.xlu0 %v36929_v44, %s36024_s10  ;;  %v5352_v5 = vsub.f32 %v36918_v17, %v5351_v32  ;;  %v5357_v11 = vand.u32 4294901760, %v36936_v37 }
 0x163   : > { %v5358_v9 = vsub.f32 %v36936_v37, %v5357_v11 }
 0x165   : > { %4726 = vmatmul.mubr.f32.vlgmr.msra.gmra.mrb[0].mxu0 %v36709_v20  ;;  %v5359_v36 = vand.u32 4294901760, %v5358_v9  ;;  %v6270_v9 = vsel %vm475_vm2, %v6252_v53, 0  ;;  %13958 = vrot.lane.b32.xlu0 %v36090_v4, %s36025_s15 }
 0x166   : > { %4735 = vmatpush1.msra.mxu0 %v36738_v47  ;;  %5265 = vmatmul.mubr.f32.vlgmr.msra.gmra.mrb[0].mxu1 %v36709_v20  ;;  %v5353_v47 = vand.u32 4294901760, %v5352_v5  ;;  %v37002_v5 = vsel %vm36362_vm7, 1.0, %v36018_v0  ;;  %vm10060_vm7 = vcmp.lt.s32.totalorder %v36177_v14, 127 }
 0x167   : > { %5739 = vmatpush1.msra.mxu1 %v36896_v59  ;;  %5272 = vmatprep.subr.mxu0 %v36906_v63 }
 0x168   : > { %5819 = vmatprep.subr.mxu1 %v5818_v27  ;;  %5802 = vmatprep.mubr.f32.mxu1 %v36018_v0 }
 0x169   : > { %4798 = vmatprep.mubr.f32.mxu0 %v36018_v0  ;;  %13956 = vrot.lane.b32.xlu0 %v36873_v30, %s36025_s15 }
 0x16a   : > { %5808 = vmatmul.mubr.f32.vlgmr.msra.gmra.mrb[2].mxu1 %v36772_v40 }
 0x16b   : > { %5825 = vmatpush1.msra.mxu1 %v5824_v61  ;;  %5888 = vmatprep.mubr.f32.mxu1 %v36018_v0  ;;  %v6233_v61 = vsel %vm6225_vm15, %v36993_v2, %v6210_v24 }
 0x16c   : > { %5898 = vmatprep.subr.mxu1 %v36902_v19  ;;  %v35092_v19 = vld [vmem:[%s39970_s1 + $0x18] sm:$0xff]  ;;  %v6250_v50 = vmul.f32 %v37002_v5, %v6233_v61 }
 0x16d   : > { %4800 = vmatmul.mubr.f32.vlgmr.msra.gmra.mrb[0].mxu0 %v36709_v20  ;;  %13966 = vrot.lane.b32.xlu0 %v36106_v7, %s36025_s15 }
 0x16e   : > { %5274 = vmatpush1.msra.mxu0 %v36922_v51  ;;  %5337 = vmatprep.mubr.f32.mxu0 %v36018_v0 }
 0x16f   : > { %5354 = vmatprep.subr.mxu0 %v5353_v47 }
 0x171   : > { %5343 = vmatmul.mubr.f32.vlgmr.msra.gmra.mrb[2].mxu0 %v36772_v40  ;;  %v6230_v40 = vsel %vm6225_vm15, %v36816_v18, %v36963_v41  ;;  %v6261_v18 = vsel %vm471_vm0, %v35092_v19, 0  ;;  %13964 = vrot.lane.b32.xlu0 %v36929_v44, %s36025_s15 }
 0x172   : > { %5360 = vmatpush1.msra.mxu0 %v5359_v36  ;;  %5890 = vmatmul.mubr.f32.vlgmr.msra.gmra.mrb[2].mxu1 %v36709_v20  ;;  %v6253_v21 = vmul.f32 %v36343_v43, %v6230_v40  ;;  %v37013_v36 = vand.u32 4294901760, %v6261_v18  ;;  %v37023_v40 = vand.u32 4294901760, %v6270_v9 }
 0x173   : > { %5433 = vmatprep.subr.mxu0 %v36918_v17  ;;  %5901 = vmatpush1.msra.mxu1 %v36910_v28 }
 0x174   : > { %5974 = vmatprep.subr.mxu1 %v36883_v10  ;;  %5423 = vmatprep.mubr.f32.mxu0 %v36018_v0  ;;  %v6273_v27 = vsel %vm475_vm2, %v6253_v21, 0  ;;  %v37030_v17 = vsub.f32 %v6261_v18, %v37013_v36 }
 0x175   : > { %5964 = vmatprep.mubr.f32.mxu1 %v36018_v0  ;;  %v37008_v47 = vand.u32 4294901760, %v6273_v27  ;;  %15906 = vrot.lane.b32.xlu0 %v36860_v45, %s36026_s16 }
 0x176   : > { %v37046_v6 = vand.u32 4294901760, %v37030_v17 }
 0x177   : > { %v37027_v62 = vsub.f32 %v6273_v27, %v37008_v47 }
 0x178   : > { %v6357_v19 = vsub.f32 %v37030_v17, %v37046_v6 }
 0x179   : > { %5425 = vmatmul.mubr.f32.vlgmr.msra.gmra.mrb[2].mxu0 %v36709_v20  ;;  %v6832_v21 = vand.u32 4294901760, %v37027_v62  ;;  %13962 = vrot.lane.b32.xlu0 %v36112_v8, %s36025_s15 }
 0x17a   : > { %5436 = vmatpush1.msra.mxu0 %v36936_v37  ;;  %5967 = vmatmul.mubr.f32.vlgmr.msra.gmra.mrb[2].mxu1 %v36726_v31  ;;  %v37068_v53 = vand.u32 4294901760, %v6357_v19 }
 0x17b   : > { %5509 = vmatprep.subr.mxu0 %v36906_v63  ;;  %5976 = vmatpush1.msra.mxu1 %v36896_v59 }
 0x17c   : > { %6052 = vmatprep.subr.mxu1 %v5816_v13  ;;  %5499 = vmatprep.mubr.f32.mxu0 %v36018_v0  ;;  %v6251_v13 = vmul.f32 %v36385_v55, %v6232_v23 }
 0x17d   : > { %6039 = vmatprep.mubr.f32.mxu1 %v36018_v0  ;;  %15912 = vrot.lane.b32.xlu0 %v36106_v7, %s36026_s16 }
 0x181   : > { %5502 = vmatmul.mubr.f32.vlgmr.msra.gmra.mrb[2].mxu0 %v36726_v31  ;;  %v6267_v31 = vsel %vm475_vm2, %v6251_v13, 0  ;;  %15910 = vrot.lane.b32.xlu0 %v36929_v44, %s36026_s16 }
 0x182   : > { %5511 = vmatpush1.msra.mxu0 %v36922_v51  ;;  %6043 = vmatmul.mubr.f32.vlgmr.msra.gmra.mrb[2].mxu1 %v36742_v29  ;;  %v37032_v28 = vand.u32 4294901760, %v6267_v31 }
 0x183   : > { %5587 = vmatprep.subr.mxu0 %v5351_v32  ;;  %6056 = vmatpush1.msra.mxu1 %v5822_v16  ;;  %v6264_v16 = vsel %vm475_vm2, %v6250_v50, 0  ;;  %v37036_v32 = vsub.f32 %v6270_v9, %v37023_v40  ;;  %v6220_v50 = vpop.permute.xlu0 %6219 }
 0x184   : > { %6128 = vmatprep.subr.mxu1 %v36883_v10  ;;  %5574 = vmatprep.mubr.f32.mxu0 %v36018_v0  ;;  %v37042_v10 = vand.u32 4294901760, %v6264_v16  ;;  %v37049_v24 = vsub.f32 %v6267_v31, %v37032_v28 }
 0x185   : > { %6119 = vmatprep.mubr.f32.mxu1 %v36018_v0 }
 0x186   : > { %v37058_v37 = vsub.f32 %v6264_v16, %v37042_v10  ;;  %v6218_v16 = vpop.permute.xlu1 %6217 }
 0x188   : > { %v6373_v27 = vand.u32 4294901760, %v37058_v37 }
 0x189   : > { %5578 = vmatmul.mubr.f32.vlgmr.msra.gmra.mrb[2].mxu0 %v36742_v29  ;;  %v6838_v29 = vand.u32 4294901760, %v37036_v32 }
 0x18a   : > { %5591 = vmatpush1.msra.mxu0 %v5357_v11  ;;  %6121 = vmatmul.mubr.f32.vlgmr.msra.gmra.mrb[2].mxu1 %v36709_v20  ;;  %v6833_v11 = vsub.f32 %v37027_v62, %v6832_v21 }
 0x18b   : > { %5663 = vmatprep.subr.mxu0 %v36906_v63  ;;  %6130 = vmatpush1.msra.mxu1 %v36896_v59  ;;  %v6367_v63 = vand.u32 4294901760, %v37049_v24  ;;  %v6839_v59 = vsub.f32 %v37036_v32, %v6838_v29 }
 0x18c   : > { %6753 = vmatprep.subr.mxu1 %v37008_v47  ;;  %5654 = vmatprep.mubr.f32.mxu0 %v36018_v0  ;;  %v6834_v23 = vand.u32 4294901760, %v6833_v11 }
 0x18d   : > { %6193 = vmatprep.mubr.f32.mxu1 %v36018_v0  ;;  %v6368_v18 = vsub.f32 %v37049_v24, %v6367_v63  ;;  %v6840_v13 = vand.u32 4294901760, %v6839_v59 }
 0x18f   : > { %v6369_v61 = vand.u32 4294901760, %v6368_v18 }
 0x191   : > { %5656 = vmatmul.mubr.f32.vlgmr.msra.gmra.mrb[2].mxu0 %v36709_v20 }
 0x192   : > { %5665 = vmatpush1.msra.mxu0 %v36922_v51  ;;  %6195 = vmatmul.mubr.f32.vlgmr.msra.gmra.mrb[2].mxu1 %v36709_v20  ;;  %v6374_v51 = vsub.f32 %v37058_v37, %v6373_v27 }
 0x193   : > { %6755 = vmatpush1.msra.mxu1 %v37023_v40  ;;  %6288 = vmatprep.subr.mxu0 %v37032_v28 }
 0x194   : > { %6835 = vmatprep.subr.mxu1 %v6834_v23  ;;  %6818 = vmatprep.mubr.f32.mxu1 %v36018_v0  ;;  %v6375_v9 = vand.u32 4294901760, %v6374_v51 }
 0x195   : > { %5728 = vmatprep.mubr.f32.mxu0 %v36018_v0 }
 0x196   : > { %6824 = vmatmul.mubr.f32.vlgmr.msra.gmra.mrb[0].mxu1 %v37068_v53 }
 0x197   : > { %6841 = vmatpush1.msra.mxu1 %v6840_v13  ;;  %6904 = vmatprep.mubr.f32.mxu1 %v36018_v0 }
 0x198   : > { %6914 = vmatprep.subr.mxu1 %v37027_v62  ;;  %v6227_v62 = vsel %vm6225_vm15, %v6220_v50, %v36971_v42 }
 0x199   : > { %5730 = vmatmul.mubr.f32.vlgmr.msra.gmra.mrb[2].mxu0 %v36709_v20  ;;  %v6226_v20 = vsel %vm6225_vm15, %v36971_v42, %v36993_v2  ;;  %v6228_v2 = vsel %vm6225_vm15, %v6218_v16, %v6220_v50  ;;  %v6229_v42 = vsel %vm6225_vm15, %v36963_v41, %v6218_v16 }
 0x19a   : > { %6290 = vmatpush1.msra.mxu0 %v37042_v10  ;;  %6353 = vmatprep.mubr.f32.mxu0 %v36018_v0  ;;  %v6257_v31 = vmul.f32 %v36517_v12, %v6226_v20  ;;  %v6254_v59 = vmul.f32 %v36556_v22, %v6229_v42 }
 0x19b   : > { %6370 = vmatprep.subr.mxu0 %v6369_v61 }
 0x19c   : > { %v6276_v13 = vsel %vm475_vm2, %v6254_v59, 0  ;;  %v8162_v59 = vsel %vm475_vm2, %v36086_v3, 0 }
 0x19d   : > { %6359 = vmatmul.mubr.f32.vlgmr.msra.gmra.mrb[0].mxu0 %v37068_v53  ;;  %v37138_v51 = vand.u32 4294901760, %v6276_v13 }
 0x19e   : > { %6376 = vmatpush1.msra.mxu0 %v6375_v9  ;;  %6906 = vmatmul.mubr.f32.vlgmr.msra.gmra.mrb[0].mxu1 %v37013_v36 }
 0x19f   : > { %6449 = vmatprep.subr.mxu0 %v37049_v24  ;;  %6917 = vmatpush1.msra.mxu1 %v37036_v32  ;;  %v6256_v32 = vmul.f32 %v36535_v58, %v6227_v62  ;;  %v6285_v24 = vsel %vm475_vm2, %v6257_v31, 0  ;;  %v37145_v20 = vsub.f32 %v6276_v13, %v37138_v51 }
 0x1a0   : > { %6990 = vmatprep.subr.mxu1 %v37008_v47  ;;  %6439 = vmatprep.mubr.f32.mxu0 %v36018_v0 }
 0x1a1   : > { %6980 = vmatprep.mubr.f32.mxu1 %v36018_v0  ;;  %v6282_v11 = vsel %vm475_vm2, %v6256_v32, 0  ;;  %v7303_v31 = vand.u32 4294901760, %v37145_v20  ;;  %v8166_v32 = vsel %vm475_vm2, %v36090_v4, 0  ;;  %v8174_v4 = vsel %vm475_vm2, %v36106_v7, 0 }
 0x1a2   : > { %v37123_v23 = vand.u32 4294901760, %v6282_v11  ;;  %v37184_v42 = vand.u32 4294901760, %v8166_v32 }
 0x1a3   : > { %v7304_v16 = vsub.f32 %v37145_v20, %v7303_v31 }
 0x1a5   : > { %6441 = vmatmul.mubr.f32.vlgmr.msra.gmra.mrb[0].mxu0 %v37013_v36 }
 0x1a6   : > { %6452 = vmatpush1.msra.mxu0 %v37058_v37  ;;  %6983 = vmatmul.mubr.f32.vlgmr.msra.gmra.mrb[0].mxu1 %v37030_v17  ;;  %v6255_v37 = vmul.f32 %v36545_v34, %v6228_v2  ;;  %v7305_v2 = vand.u32 4294901760, %v7304_v16 }
 0x1a7   : > { %6525 = vmatprep.subr.mxu0 %v37032_v28  ;;  %6992 = vmatpush1.msra.mxu1 %v37023_v40 }
 0x1a8   : > { %7068 = vmatprep.subr.mxu1 %v6832_v21  ;;  %6515 = vmatprep.mubr.f32.mxu0 %v36018_v0  ;;  %v37114_v21 = vand.u32 4294901760, %v6285_v24  ;;  %v6279_v19 = vsel %vm475_vm2, %v6255_v37, 0  ;;  %v8164_v37 = vsel %vm475_vm2, %v36873_v30, 0  ;;  %v8170_v30 = vsel %vm475_vm2, %v36112_v8, 0 }
 0x1a9   : > { %7055 = vmatprep.mubr.f32.mxu1 %v36018_v0  ;;  %v37127_v18 = vand.u32 4294901760, %v6279_v19 }
 0x1aa   : > { %v7761_v41 = vsub.f32 %v6285_v24, %v37114_v21 }
 0x1ad   : > { %6518 = vmatmul.mubr.f32.vlgmr.msra.gmra.mrb[0].mxu0 %v37030_v17 }
 0x1ae   : > { %6527 = vmatpush1.msra.mxu0 %v37042_v10  ;;  %7059 = vmatmul.mubr.f32.vlgmr.msra.gmra.mrb[0].mxu1 %v37046_v6 }
 0x1af   : > { %6603 = vmatprep.subr.mxu0 %v6367_v63  ;;  %7072 = vmatpush1.msra.mxu1 %v6838_v29  ;;  %v37131_v29 = vsub.f32 %v6282_v11, %v37123_v23  ;;  %v7296_v63 = vsub.f32 %v6279_v19, %v37127_v18  ;;  %v37190_v19 = vand.u32 4294901760, %v8164_v37 }
 0x1b0   : > { %7144 = vmatprep.subr.mxu1 %v37008_v47  ;;  %6590 = vmatprep.mubr.f32.mxu0 %v36018_v0  ;;  %v7762_v47 = vand.u32 4294901760, %v7761_v41 }
 0x1b1   : > { %7135 = vmatprep.mubr.f32.mxu1 %v36018_v0  ;;  %v7768_v61 = vand.u32 4294901760, %v37131_v29  ;;  %v7297_v9 = vand.u32 4294901760, %v7296_v63  ;;  %v37204_v13 = vsub.f32 %v8164_v37, %v37190_v19 }
 0x1b3   : > { %v7298_v50 = vsub.f32 %v7296_v63, %v7297_v9 }
 0x1b5   : > { %6594 = vmatmul.mubr.f32.vlgmr.msra.gmra.mrb[0].mxu0 %v37046_v6 }
 0x1b6   : > { %6607 = vmatpush1.msra.mxu0 %v6373_v27  ;;  %7137 = vmatmul.mubr.f32.vlgmr.msra.gmra.mrb[0].mxu1 %v37013_v36  ;;  %v7763_v27 = vsub.f32 %v7761_v41, %v7762_v47 }
 0x1b7   : > { %6679 = vmatprep.subr.mxu0 %v37032_v28  ;;  %7146 = vmatpush1.msra.mxu1 %v37023_v40  ;;  %v7769_v28 = vsub.f32 %v37131_v29, %v7768_v61 }
 0x1b8   : > { %7683 = vmatprep.subr.mxu1 %v37114_v21  ;;  %6670 = vmatprep.mubr.f32.mxu0 %v36018_v0  ;;  %v7764_v40 = vand.u32 4294901760, %v7763_v27 }
 0x1b9   : > { %7209 = vmatprep.mubr.f32.mxu1 %v36018_v0  ;;  %v7770_v62 = vand.u32 4294901760, %v7769_v28 }
 0x1bd   : > { %6672 = vmatmul.mubr.f32.vlgmr.msra.gmra.mrb[0].mxu0 %v37013_v36 }
 0x1be   : > { %6681 = vmatpush1.msra.mxu0 %v37042_v10  ;;  %7211 = vmatmul.mubr.f32.vlgmr.msra.gmra.mrb[0].mxu1 %v37013_v36  ;;  %v7299_v10 = vand.u32 4294901760, %v7298_v50 }
 0x1bf   : > { %7685 = vmatpush1.msra.mxu1 %v37123_v23  ;;  %7218 = vmatprep.subr.mxu0 %v37127_v18 }
 0x1c0   : > { %7765 = vmatprep.subr.mxu1 %v7764_v40  ;;  %7748 = vmatprep.mubr.f32.mxu1 %v36018_v0 }
 0x1c1   : > { %6744 = vmatprep.mubr.f32.mxu0 %v36018_v0 }
 0x1c2   : > { %7754 = vmatmul.mubr.f32.vlgmr.msra.gmra.mrb[2].mxu1 %v37068_v53 }
 0x1c3   : > { %7771 = vmatpush1.msra.mxu1 %v7770_v62  ;;  %7834 = vmatprep.mubr.f32.mxu1 %v36018_v0 }
 0x1c4   : > { %7844 = vmatprep.subr.mxu1 %v7761_v41 }
 0x1c5   : > { %6746 = vmatmul.mubr.f32.vlgmr.msra.gmra.mrb[0].mxu0 %v37013_v36 }
 0x1c6   : > { %7220 = vmatpush1.msra.mxu0 %v37138_v51  ;;  %7283 = vmatprep.mubr.f32.mxu0 %v36018_v0 }
 0x1c7   : > { %7300 = vmatprep.subr.mxu0 %v7299_v10 }
 0x1c9   : > { %7289 = vmatmul.mubr.f32.vlgmr.msra.gmra.mrb[2].mxu0 %v37068_v53  ;;  %v35093_v53 = vld [vmem:[%s39970_s1 + $0x20] sm:$0xff] }
 0x1ca   : > { %7306 = vmatpush1.msra.mxu0 %v7305_v2  ;;  %7836 = vmatmul.mubr.f32.vlgmr.msra.gmra.mrb[2].mxu1 %v37013_v36  ;;  %v8158_v24 = vsel %vm471_vm0, %v35093_v53, 0  ;;  %v37306_v53 = vand.u32 4294901760, %v8174_v4 }
 0x1cb   : > { %7379 = vmatprep.subr.mxu0 %v7296_v63  ;;  %7847 = vmatpush1.msra.mxu1 %v37131_v29  ;;  %v37188_v11 = vand.u32 4294901760, %v8158_v24  ;;  %v37206_v29 = vand.u32 4294901760, %v8162_v59 }
 0x1cc   : > { %7920 = vmatprep.subr.mxu1 %v37114_v21  ;;  %7369 = vmatprep.mubr.f32.mxu0 %v36018_v0 }
 0x1cd   : > { %7910 = vmatprep.mubr.f32.mxu1 %v36018_v0  ;;  %v37201_v41 = vsub.f32 %v8158_v24, %v37188_v11  ;;  %v37224_v27 = vsub.f32 %v8162_v59, %v37206_v29  ;;  %v8168_v24 = vsel %vm475_vm2, %v36860_v45, 0 }
 0x1ce   : > { %v37340_v3 = vand.u32 4294901760, %v8168_v24 }
 0x1cf   : > { %v37216_v63 = vand.u32 4294901760, %v37201_v41  ;;  %v8256_v28 = vand.u32 4294901760, %v37224_v27 }
 0x1d0   : > { %v37355_v59 = vsub.f32 %v8168_v24, %v37340_v3 }
 0x1d1   : > { %7371 = vmatmul.mubr.f32.vlgmr.msra.gmra.mrb[2].mxu0 %v37013_v36  ;;  %v8257_v10 = vsub.f32 %v37224_v27, %v8256_v28 }
 0x1d2   : > { %7382 = vmatpush1.msra.mxu0 %v37145_v20  ;;  %7913 = vmatmul.mubr.f32.vlgmr.msra.gmra.mrb[2].mxu1 %v37030_v17 }
 0x1d3   : > { %7455 = vmatprep.subr.mxu0 %v37127_v18  ;;  %7922 = vmatpush1.msra.mxu1 %v37123_v23  ;;  %v8258_v16 = vand.u32 4294901760, %v8257_v10  ;;  %v35102_v10 = vld [vmem:[%s39970_s1 + $0x28] sm:$0xff] }
 0x1d4   : > { %7998 = vmatprep.subr.mxu1 %v7762_v47  ;;  %7445 = vmatprep.mubr.f32.mxu0 %v36018_v0 }
 0x1d5   : > { %7985 = vmatprep.mubr.f32.mxu1 %v36018_v0 }
 0x1d9   : > { %7448 = vmatmul.mubr.f32.vlgmr.msra.gmra.mrb[2].mxu0 %v37030_v17  ;;  %v37198_v17 = vsub.f32 %v8166_v32, %v37184_v42  ;;  %v37329_v32 = vand.u32 4294901760, %v8170_v30 }
 0x1da   : > { %7457 = vmatpush1.msra.mxu0 %v37138_v51  ;;  %7989 = vmatmul.mubr.f32.vlgmr.msra.gmra.mrb[2].mxu1 %v37046_v6 }
 0x1db   : > { %7533 = vmatprep.subr.mxu0 %v7297_v9  ;;  %8002 = vmatpush1.msra.mxu1 %v7768_v61  ;;  %v8721_v47 = vand.u32 4294901760, %v37198_v17 }
 0x1dc   : > { %8074 = vmatprep.subr.mxu1 %v37114_v21  ;;  %7520 = vmatprep.mubr.f32.mxu0 %v36018_v0  ;;  %v8160_v21 = vsel %vm475_vm2, %v36833_v26, 0  ;;  %v37322_v26 = vsub.f32 %v8174_v4, %v37306_v53  ;;  %v10096_v4 = vsel %vm471_vm0, %v35102_v10, 0 }
 0x1dd   : > { %8065 = vmatprep.mubr.f32.mxu1 %v36018_v0  ;;  %v37218_v61 = vand.u32 4294901760, %v8160_v21  ;;  %v8722_v9 = vsub.f32 %v37198_v17, %v8721_v47  ;;  %v37431_v35 = vand.u32 4294901760, %v10096_v4 }
 0x1de   : > { %v9651_v37 = vand.u32 4294901760, %v37322_v26 }
 0x1df   : > { %v8723_v40 = vand.u32 4294901760, %v8722_v9  ;;  %v37381_v9 = vpop.permute.xlu1 %10052 }
 0x1e0   : > { %v9652_v8 = vsub.f32 %v37322_v26, %v9651_v37 }
 0x1e1   : > { %7524 = vmatmul.mubr.f32.vlgmr.msra.gmra.mrb[2].mxu0 %v37046_v6  ;;  %v8727_v6 = vand.u32 4294901760, %v37204_v13 }
 0x1e2   : > { %7537 = vmatpush1.msra.mxu0 %v7303_v31  ;;  %8067 = vmatmul.mubr.f32.vlgmr.msra.gmra.mrb[2].mxu1 %v37013_v36 }
 0x1e3   : > { %7609 = vmatprep.subr.mxu0 %v37127_v18  ;;  %8076 = vmatpush1.msra.mxu1 %v37123_v23  ;;  %v8246_v23 = vsub.f32 %v37201_v41, %v37216_v63  ;;  %v37237_v18 = vsub.f32 %v8160_v21, %v37218_v61  ;;  %v8728_v20 = vsub.f32 %v37204_v13, %v8727_v6 }
 0x1e4   : > { %7600 = vmatprep.mubr.f32.mxu0 %v36018_v0  ;;  %8139 = vmatprep.mubr.f32.mxu1 %v36018_v0 }
 0x1e5   : > { %8642 = vmatprep.subr.mxu1 %v37184_v42  ;;  %v37250_v50 = vand.u32 4294901760, %v8246_v23  ;;  %v8262_v31 = vand.u32 4294901760, %v37237_v18  ;;  %v8729_v62 = vand.u32 4294901760, %v8728_v20  ;;  %v10051_v23 = vpop.permute.xlu0 %10050 }
 0x1e6   : > { %v10064_v20 = vsel %vm10060_vm7, %v10051_v23, %v37381_v9 }
 0x1e9   : > { %7602 = vmatmul.mubr.f32.vlgmr.msra.gmra.mrb[2].mxu0 %v37013_v36 }
 0x1ea   : > { %7611 = vmatpush1.msra.mxu0 %v37138_v51  ;;  %8141 = vmatmul.mubr.f32.vlgmr.msra.gmra.mrb[2].mxu1 %v37013_v36  ;;  %v8263_v51 = vsub.f32 %v37237_v18, %v8262_v31 }
 0x1eb   : > { %8644 = vmatpush1.msra.mxu1 %v37190_v19  ;;  %8707 = vmatprep.mubr.f32.mxu1 %v36018_v0 }
 0x1ec   : > { %7674 = vmatprep.mubr.f32.mxu0 %v36018_v0  ;;  %8177 = vmatprep.subr.mxu0 %v37206_v29  ;;  %v8264_v2 = vand.u32 4294901760, %v8263_v51 }
 0x1ed   : > { %8724 = vmatprep.subr.mxu1 %v8723_v40  ;;  %v10088_v40 = vmul.f32 %v36647_v56, %v10064_v20 }
 0x1ee   : > { %8713 = vmatmul.mubr.f32.vlgmr.msra.gmra.mrb[0].mxu1 %v37250_v50 }
 0x1ef   : > { %8730 = vmatpush1.msra.mxu1 %v8729_v62  ;;  %8793 = vmatprep.mubr.f32.mxu1 %v36018_v0  ;;  %v10108_v51 = vsel %vm475_vm2, %v10088_v40, 0 }
 0x1f0   : > { %8803 = vmatprep.subr.mxu1 %v37198_v17 }
 0x1f1   : > { %7676 = vmatmul.mubr.f32.vlgmr.msra.gmra.mrb[2].mxu0 %v37013_v36  ;;  %v8172_v36 = vsel %vm475_vm2, %v36929_v44, 0 }
 0x1f2   : > { %8179 = vmatpush1.msra.mxu0 %v37218_v61  ;;  %8242 = vmatprep.mubr.f32.mxu0 %v36018_v0  ;;  %v37315_v7 = vand.u32 4294901760, %v8172_v36 }
 0x1f3   : > { %8259 = vmatprep.subr.mxu0 %v8258_v16 }
 0x1f4   : > { %v37327_v44 = vsub.f32 %v8172_v36, %v37315_v7 }
 0x1f5   : > { %8248 = vmatmul.mubr.f32.vlgmr.msra.gmra.mrb[0].mxu0 %v37250_v50 }
 0x1f6   : > { %8795 = vmatmul.mubr.f32.vlgmr.msra.gmra.mrb[0].mxu1 %v37188_v11  ;;  %8265 = vmatpush1.msra.mxu0 %v8264_v2  ;;  %v9657_v45 = vand.u32 4294901760, %v37327_v44  ;;  %v37418_v2 = vsel %vm36662_vm8, 1.0, %v36018_v0  ;;  %vm12030_vm8 = vmand %vm12022_vm6, %vm36503_vm10  ;;  %vm13968_vm10 = vcmp.lt.s32.totalorder %v36177_v14, 96 }
 0x1f7   : > { %8328 = vmatprep.mubr.f32.mxu0 %v36018_v0  ;;  %8806 = vmatpush1.msra.mxu1 %v37204_v13  ;;  %v9653_v13 = vand.u32 4294901760, %v9652_v8 }
 0x1f8   : > { %8869 = vmatprep.mubr.f32.mxu1 %v36018_v0  ;;  %8338 = vmatprep.subr.mxu0 %v37224_v27 }
 0x1f9   : > { %8879 = vmatprep.subr.mxu1 %v37184_v42 }
 0x1fd   : > { %8330 = vmatmul.mubr.f32.vlgmr.msra.gmra.mrb[0].mxu0 %v37188_v11 }
 0x1fe   : > { %8872 = vmatmul.mubr.f32.vlgmr.msra.gmra.mrb[0].mxu1 %v37201_v41  ;;  %8341 = vmatpush1.msra.mxu0 %v37237_v18  ;;  %v37391_v18 = vpop.permute.xlu1 %10044 }
 0x1ff   : > { %8404 = vmatprep.mubr.f32.mxu0 %v36018_v0  ;;  %8881 = vmatpush1.msra.mxu1 %v37190_v19 }
 0x200   : > { %8944 = vmatprep.mubr.f32.mxu1 %v36018_v0  ;;  %8414 = vmatprep.subr.mxu0 %v37206_v29 }
 0x201   : > { %8957 = vmatprep.subr.mxu1 %v8721_v47 }
 0x205   : > { %8407 = vmatmul.mubr.f32.vlgmr.msra.gmra.mrb[0].mxu0 %v37201_v41 }
 0x206   : > { %8948 = vmatmul.mubr.f32.vlgmr.msra.gmra.mrb[0].mxu1 %v37216_v63  ;;  %8416 = vmatpush1.msra.mxu0 %v37218_v61 }
 0x207   : > { %8479 = vmatprep.mubr.f32.mxu0 %v36018_v0  ;;  %8961 = vmatpush1.msra.mxu1 %v8727_v6 }
 0x208   : > { %9024 = vmatprep.mubr.f32.mxu1 %v36018_v0  ;;  %8492 = vmatprep.subr.mxu0 %v8256_v28  ;;  %v10049_v28 = vpop.permute.xlu0 %10048 }
 0x209   : > { %9033 = vmatprep.subr.mxu1 %v37184_v42  ;;  %v37346_v42 = vsub.f32 %v8170_v30, %v37329_v32  ;;  %v37424_v30 = vand.u32 4294901760, %v10108_v51 }
 0x20b   : > { %v9186_v17 = vand.u32 4294901760, %v37346_v42 }
 0x20d   : > { %8483 = vmatmul.mubr.f32.vlgmr.msra.gmra.mrb[0].mxu0 %v37216_v63  ;;  %v9187_v47 = vsub.f32 %v37346_v42, %v9186_v17 }
 0x20e   : > { %9026 = vmatmul.mubr.f32.vlgmr.msra.gmra.mrb[0].mxu1 %v37188_v11  ;;  %8496 = vmatpush1.msra.mxu0 %v8262_v31  ;;  %v10047_v31 = vpop.permute.xlu1 %10046 }
 0x20f   : > { %8559 = vmatprep.mubr.f32.mxu0 %v36018_v0  ;;  %9035 = vmatpush1.msra.mxu1 %v37190_v19  ;;  %v9658_v19 = vsub.f32 %v37327_v44, %v9657_v45  ;;  %v9188_v6 = vand.u32 4294901760, %v9187_v47  ;;  %v10066_v16 = vsel %vm10060_vm7, %v10047_v31, %v10049_v28  ;;  %v10067_v36 = vsel %vm10060_vm7, %v37391_v18, %v10047_v31  ;;  %v10059_v31 = vpop.permute.xlu0 %10058 }
 0x210   : > { %9098 = vmatprep.mubr.f32.mxu1 %v36018_v0  ;;  %9572 = vmatprep.subr.mxu1 %v37306_v53  ;;  %v10086_v24 = vmul.f32 %v36683_v46, %v10066_v16  ;;  %v10068_v10 = vsel %vm10060_vm7, %v10059_v31, %v37391_v18 }
 0x211   : > { %8568 = vmatprep.subr.mxu0 %v37206_v29  ;;  %v9192_v29 = vand.u32 4294901760, %v37355_v59  ;;  %v9659_v21 = vand.u32 4294901760, %v9658_v19  ;;  %v37440_v19 = vsub.f32 %v10108_v51, %v37424_v30  ;;  %v10092_v16 = vmul.f32 %v36823_v39, %v10068_v10 }
 0x215   : > { %8561 = vmatmul.mubr.f32.vlgmr.msra.gmra.mrb[0].mxu0 %v37188_v11 }
 0x216   : > { %9100 = vmatmul.mubr.f32.vlgmr.msra.gmra.mrb[0].mxu1 %v37188_v11  ;;  %8570 = vmatpush1.msra.mxu0 %v37218_v61  ;;  %v9193_v61 = vsub.f32 %v37355_v59, %v9192_v29 }
 0x217   : > { %9574 = vmatpush1.msra.mxu1 %v37315_v7  ;;  %9637 = vmatprep.mubr.f32.mxu1 %v36018_v0 }
 0x218   : > { %8633 = vmatprep.mubr.f32.mxu0 %v36018_v0  ;;  %9107 = vmatprep.subr.mxu0 %v37329_v32  ;;  %v9194_v27 = vand.u32 4294901760, %v9193_v61 }
 0x219   : > { %9654 = vmatprep.subr.mxu1 %v9653_v13  ;;  %v37448_v13 = vsub.f32 %v10096_v4, %v37431_v35 }
 0x21a   : > { %9643 = vmatmul.mubr.f32.vlgmr.msra.gmra.mrb[2].mxu1 %v37250_v50 }
 0x21b   : > { %9660 = vmatpush1.msra.mxu1 %v9659_v21  ;;  %9723 = vmatprep.mubr.f32.mxu1 %v36018_v0 }
 0x21c   : > { %9733 = vmatprep.subr.mxu1 %v37322_v26  ;;  %v10085_v26 = vmul.f32 %v37418_v2, %v10067_v36 }
 0x21d   : > { %8635 = vmatmul.mubr.f32.vlgmr.msra.gmra.mrb[0].mxu0 %v37188_v11 }
 0x21e   : > { %9109 = vmatpush1.msra.mxu0 %v37340_v3  ;;  %9172 = vmatprep.mubr.f32.mxu0 %v36018_v0  ;;  %v10099_v21 = vsel %vm475_vm2, %v10085_v26, 0 }
 0x21f   : > { %9189 = vmatprep.subr.mxu0 %v9188_v6  ;;  %v37458_v61 = vand.u32 4294901760, %v10099_v21 }
 0x221   : > { %9178 = vmatmul.mubr.f32.vlgmr.msra.gmra.mrb[2].mxu0 %v37250_v50  ;;  %v10065_v50 = vsel %vm10060_vm7, %v10049_v28, %v10051_v23 }
 0x222   : > { %9725 = vmatmul.mubr.f32.vlgmr.msra.gmra.mrb[2].mxu1 %v37188_v11  ;;  %9195 = vmatpush1.msra.mxu0 %v9194_v27  ;;  %v10087_v62 = vmul.f32 %v36670_v38, %v10065_v50 }
 0x223   : > { %9258 = vmatprep.mubr.f32.mxu0 %v36018_v0  ;;  %9736 = vmatpush1.msra.mxu1 %v37327_v44 }
 0x224   : > { %9799 = vmatprep.mubr.f32.mxu1 %v36018_v0  ;;  %9268 = vmatprep.subr.mxu0 %v37346_v42  ;;  %v10105_v8 = vsel %vm475_vm2, %v10087_v62, 0  ;;  %v10057_v62 = vpop.permute.xlu0 %10056 }
 0x225   : > { %9809 = vmatprep.subr.mxu1 %v37306_v53  ;;  %v10061_v51 = vsel %vm10060_vm7, %v10057_v62, %v10059_v31 }
 0x226   : > { %v10091_v18 = vmul.f32 %v36845_v52, %v10061_v51 }
 0x228   : > { %v10117_v26 = vsel %vm475_vm2, %v10091_v18, 0  ;;  %v37605_v31 = vpop.permute.xlu0 %11998  ;;  %v35111_v18 = vld [vmem:[%s39970_s1 + $0x30] sm:$0xff] }
 0x229   : > { %9260 = vmatmul.mubr.f32.vlgmr.msra.gmra.mrb[2].mxu0 %v37188_v11 }
 0x22a   : > { %9802 = vmatmul.mubr.f32.vlgmr.msra.gmra.mrb[2].mxu1 %v37201_v41  ;;  %9271 = vmatpush1.msra.mxu0 %v37355_v59  ;;  %v37477_v59 = vsub.f32 %v10099_v21, %v37458_v61  ;;  %v37543_v21 = vand.u32 4294901760, %v10117_v26 }
 0x22b   : > { %9334 = vmatprep.mubr.f32.mxu0 %v36018_v0  ;;  %9811 = vmatpush1.msra.mxu1 %v37315_v7 }
 0x22c   : > { %9874 = vmatprep.mubr.f32.mxu1 %v36018_v0  ;;  %9344 = vmatprep.subr.mxu0 %v37329_v32  ;;  %v10208_v23 = vand.u32 4294901760, %v37477_v59  ;;  %v11995_v10 = vpop.permute.xlu0 %11994 }
 0x22d   : > { %9887 = vmatprep.subr.mxu1 %v9651_v37  ;;  %v37434_v37 = vand.u32 4294901760, %v10105_v8 }
 0x22f   : > { %v37454_v44 = vsub.f32 %v10105_v8, %v37434_v37 }
 0x231   : > { %9337 = vmatmul.mubr.f32.vlgmr.msra.gmra.mrb[2].mxu0 %v37201_v41  ;;  %v10102_v41 = vsel %vm475_vm2, %v10086_v24, 0  ;;  %v10120_v24 = vsel %vm475_vm2, %v10092_v16, 0 }
 0x232   : > { %9878 = vmatmul.mubr.f32.vlgmr.msra.gmra.mrb[2].mxu1 %v37216_v63  ;;  %9346 = vmatpush1.msra.mxu0 %v37340_v3  ;;  %v37451_v47 = vand.u32 4294901760, %v10102_v41 }
 0x233   : > { %9409 = vmatprep.mubr.f32.mxu0 %v36018_v0  ;;  %9891 = vmatpush1.msra.mxu1 %v9657_v45  ;;  %v10667_v45 = vand.u32 4294901760, %v37440_v19 }
 0x234   : > { %9954 = vmatprep.mubr.f32.mxu1 %v36018_v0  ;;  %9422 = vmatprep.subr.mxu0 %v9186_v17  ;;  %v37467_v42 = vsub.f32 %v10102_v41, %v37451_v47  ;;  %v10673_v17 = vand.u32 4294901760, %v37454_v44  ;;  %v37538_v41 = vand.u32 4294901760, %v10120_v24 }
 0x235   : > { %9963 = vmatprep.subr.mxu1 %v37306_v53  ;;  %v37464_v53 = vand.u32 4294901760, %v37448_v13 }
 0x236   : > { %v10202_v6 = vand.u32 4294901760, %v37467_v42 }
 0x238   : > { %v10203_v28 = vsub.f32 %v37467_v42, %v10202_v6 }
 0x239   : > { %9413 = vmatmul.mubr.f32.vlgmr.msra.gmra.mrb[2].mxu0 %v37216_v63  ;;  %v10668_v63 = vsub.f32 %v37440_v19, %v10667_v45 }
 0x23a   : > { %9956 = vmatmul.mubr.f32.vlgmr.msra.gmra.mrb[2].mxu1 %v37188_v11  ;;  %9426 = vmatpush1.msra.mxu0 %v9192_v29  ;;  %v10192_v29 = vsub.f32 %v37448_v13, %v37464_v53  ;;  %v10204_v40 = vand.u32 4294901760, %v10203_v28 }
 0x23b   : > { %9489 = vmatprep.mubr.f32.mxu0 %v36018_v0  ;;  %9965 = vmatpush1.msra.mxu1 %v37315_v7  ;;  %v10674_v7 = vsub.f32 %v37454_v44, %v10673_v17  ;;  %v10669_v27 = vand.u32 4294901760, %v10668_v63 }
 0x23c   : > { %10028 = vmatprep.mubr.f32.mxu1 %v36018_v0  ;;  %10588 = vmatprep.subr.mxu1 %v37424_v30 }
 0x23d   : > { %9498 = vmatprep.subr.mxu0 %v37329_v32  ;;  %v37488_v32 = vand.u32 4294901760, %v10192_v29  ;;  %v10675_v20 = vand.u32 4294901760, %v10674_v7 }
 0x241   : > { %9491 = vmatmul.mubr.f32.vlgmr.msra.gmra.mrb[2].mxu0 %v37188_v11 }
 0x242   : > { %10030 = vmatmul.mubr.f32.vlgmr.msra.gmra.mrb[2].mxu1 %v37188_v11  ;;  %9500 = vmatpush1.msra.mxu0 %v37340_v3  ;;  %v10209_v3 = vsub.f32 %v37477_v59, %v10208_v23 }
 0x243   : > { %10590 = vmatpush1.msra.mxu1 %v37434_v37  ;;  %10123 = vmatprep.subr.mxu0 %v37451_v47 }
 0x244   : > { %10653 = vmatprep.mubr.f32.mxu1 %v36018_v0  ;;  %10670 = vmatprep.subr.mxu1 %v10669_v27  ;;  %v10210_v50 = vand.u32 4294901760, %v10209_v3 }
 0x245   : > { %9563 = vmatprep.mubr.f32.mxu0 %v36018_v0 }
 0x246   : > { %10659 = vmatmul.mubr.f32.vlgmr.msra.gmra.mrb[0].mxu1 %v37488_v32 }
 0x247   : > { %10676 = vmatpush1.msra.mxu1 %v10675_v20  ;;  %10739 = vmatprep.mubr.f32.mxu1 %v36018_v0 }
 0x248   : > { %10749 = vmatprep.subr.mxu1 %v37440_v19 }
 0x249   : > { %9565 = vmatmul.mubr.f32.vlgmr.msra.gmra.mrb[2].mxu0 %v37188_v11  ;;  %v37512_v11 = vpop.permute.xlu1 %11996 }
 0x24a   : > { %10125 = vmatpush1.msra.mxu0 %v37458_v61  ;;  %10188 = vmatprep.mubr.f32.mxu0 %v36018_v0  ;;  %v12011_v16 = vsel %vm12006_vm5, %v11995_v10, %v37512_v11 }
 0x24b   : > { %10205 = vmatprep.subr.mxu0 %v10204_v40 }
 0x24d   : > { %10194 = vmatmul.mubr.f32.vlgmr.msra.gmra.mrb[0].mxu0 %v37488_v32  ;;  %v10055_v4 = vpop.permute.xlu1 %10054 }
 0x24e   : > { %10211 = vmatpush1.msra.mxu0 %v10210_v50  ;;  %10741 = vmatmul.mubr.f32.vlgmr.msra.gmra.mrb[0].mxu1 %v37431_v35  ;;  %v10062_v36 = vsel %vm10060_vm7, %v10055_v4, %v10057_v62  ;;  %v10063_v19 = vsel %vm10060_vm7, %v37381_v9, %v10055_v4 }
 0x24f   : > { %10284 = vmatprep.subr.mxu0 %v37467_v42  ;;  %10752 = vmatpush1.msra.mxu1 %v37454_v44  ;;  %v10090_v8 = vmul.f32 %v36855_v54, %v10062_v36  ;;  %v10089_v9 = vmul.f32 %v36878_v15, %v10063_v19  ;;  %v37551_v42 = vsub.f32 %v10120_v24, %v37538_v41 }
 0x250   : > { %10825 = vmatprep.subr.mxu1 %v37424_v30  ;;  %10274 = vmatprep.mubr.f32.mxu0 %v36018_v0  ;;  %v37556_v44 = vsub.f32 %v10117_v26, %v37543_v21  ;;  %v12049_v24 = vmul.f32 %v36355_v48, %v12011_v16  ;;  %v12058_v26 = vsel %vm471_vm0, %v35111_v18, 0  ;;  %v37735_v18 = vsel %vm12030_vm8, 1.0, %v36018_v0 }
 0x251   : > { %10815 = vmatprep.mubr.f32.mxu1 %v36018_v0  ;;  %v37613_v62 = vpop.permute.xlu1 %11990 }
 0x252   : > { %v11603_v7 = vand.u32 4294901760, %v37556_v44 }
 0x254   : > { %v11604_v27 = vsub.f32 %v37556_v44, %v11603_v7 }
 0x255   : > { %10276 = vmatmul.mubr.f32.vlgmr.msra.gmra.mrb[0].mxu0 %v37431_v35  ;;  %v11993_v4 = vpop.permute.xlu1 %11992 }
 0x256   : > { %10287 = vmatpush1.msra.mxu0 %v37477_v59  ;;  %10818 = vmatmul.mubr.f32.vlgmr.msra.gmra.mrb[0].mxu1 %v37448_v13  ;;  %v11605_v20 = vand.u32 4294901760, %v11604_v27  ;;  %v12012_v36 = vsel %vm12006_vm5, %v11993_v4, %v11995_v10 }
 0x257   : > { %10360 = vmatprep.subr.mxu0 %v37451_v47  ;;  %10827 = vmatpush1.msra.mxu1 %v37434_v37  ;;  %v12048_v19 = vmul.f32 %v36385_v55, %v12012_v36 }
 0x258   : > { %10903 = vmatprep.subr.mxu1 %v10667_v45  ;;  %10350 = vmatprep.mubr.f32.mxu0 %v36018_v0  ;;  %v10114_v45 = vsel %vm475_vm2, %v10090_v8, 0 }
 0x259   : > { %10890 = vmatprep.mubr.f32.mxu1 %v36018_v0  ;;  %v37553_v63 = vand.u32 4294901760, %v10114_v45 }
 0x25b   : > { %v37565_v29 = vsub.f32 %v10114_v45, %v37553_v63 }
 0x25d   : > { %10353 = vmatmul.mubr.f32.vlgmr.msra.gmra.mrb[0].mxu0 %v37448_v13 }
 0x25e   : > { %10362 = vmatpush1.msra.mxu0 %v37458_v61  ;;  %10894 = vmatmul.mubr.f32.vlgmr.msra.gmra.mrb[0].mxu1 %v37464_v53 }
 0x25f   : > { %10438 = vmatprep.subr.mxu0 %v10202_v6  ;;  %10907 = vmatpush1.msra.mxu1 %v10673_v17  ;;  %v10111_v17 = vsel %vm475_vm2, %v10089_v9, 0  ;;  %v12067_v9 = vsel %vm475_vm2, %v12049_v24, 0 }
 0x260   : > { %10979 = vmatprep.subr.mxu1 %v37424_v30  ;;  %10425 = vmatprep.mubr.f32.mxu0 %v36018_v0  ;;  %v11597_v30 = vand.u32 4294901760, %v37551_v42  ;;  %v37570_v6 = vand.u32 4294901760, %v10111_v17 }
 0x261   : > { %10970 = vmatprep.mubr.f32.mxu1 %v36018_v0 }
 0x262   : > { %v11598_v59 = vsub.f32 %v37551_v42, %v11597_v30 }
 0x265   : > { %10429 = vmatmul.mubr.f32.vlgmr.msra.gmra.mrb[0].mxu0 %v37464_v53 }
 0x266   : > { %10442 = vmatpush1.msra.mxu0 %v10208_v23  ;;  %10972 = vmatmul.mubr.f32.vlgmr.msra.gmra.mrb[0].mxu1 %v37431_v35  ;;  %v11599_v23 = vand.u32 4294901760, %v11598_v59 }
 0x267   : > { %10514 = vmatprep.subr.mxu0 %v37451_v47  ;;  %10981 = vmatpush1.msra.mxu1 %v37434_v37  ;;  %v11132_v47 = vand.u32 4294901760, %v37565_v29  ;;  %v37581_v37 = vsub.f32 %v10111_v17, %v37570_v6 }
 0x268   : > { %11518 = vmatprep.subr.mxu1 %v37538_v41  ;;  %10505 = vmatprep.mubr.f32.mxu0 %v36018_v0 }
 0x269   : > { %11044 = vmatprep.mubr.f32.mxu1 %v36018_v0  ;;  %v11133_v28 = vsub.f32 %v37565_v29, %v11132_v47  ;;  %v11138_v3 = vand.u32 4294901760, %v37581_v37 }
 0x26b   : > { %v11139_v40 = vsub.f32 %v37581_v37, %v11138_v3 }
 0x26d   : > { %10507 = vmatmul.mubr.f32.vlgmr.msra.gmra.mrb[0].mxu0 %v37431_v35  ;;  %v11140_v50 = vand.u32 4294901760, %v11139_v40 }
 0x26e   : > { %10516 = vmatpush1.msra.mxu0 %v37458_v61  ;;  %11046 = vmatmul.mubr.f32.vlgmr.msra.gmra.mrb[0].mxu1 %v37431_v35  ;;  %v11134_v61 = vand.u32 4294901760, %v11133_v28 }
 0x26f   : > { %11520 = vmatpush1.msra.mxu1 %v37543_v21  ;;  %11053 = vmatprep.subr.mxu0 %v37553_v63 }
 0x270   : > { %11600 = vmatprep.subr.mxu1 %v11599_v23  ;;  %11583 = vmatprep.mubr.f32.mxu1 %v36018_v0 }
 0x271   : > { %10579 = vmatprep.mubr.f32.mxu0 %v36018_v0 }
 0x272   : > { %11589 = vmatmul.mubr.f32.vlgmr.msra.gmra.mrb[2].mxu1 %v37488_v32 }
 0x273   : > { %11606 = vmatpush1.msra.mxu1 %v11605_v20  ;;  %11669 = vmatprep.mubr.f32.mxu1 %v36018_v0 }
 0x274   : > { %11679 = vmatprep.subr.mxu1 %v37551_v42  ;;  %v37648_v42 = vand.u32 4294901760, %v12058_v26 }
 0x275   : > { %10581 = vmatmul.mubr.f32.vlgmr.msra.gmra.mrb[0].mxu0 %v37431_v35 }
 0x276   : > { %11055 = vmatpush1.msra.mxu0 %v37570_v6  ;;  %11118 = vmatprep.mubr.f32.mxu0 %v36018_v0 }
 0x277   : > { %11135 = vmatprep.subr.mxu0 %v11134_v61 }
 0x279   : > { %11124 = vmatmul.mubr.f32.vlgmr.msra.gmra.mrb[2].mxu0 %v37488_v32  ;;  %v12010_v32 = vsel %vm12006_vm5, %v37512_v11, %v37605_v31  ;;  %v12013_v11 = vsel %vm12006_vm5, %v37613_v62, %v11993_v4  ;;  %v12005_v4 = vpop.permute.xlu0 %12004 }
 0x27a   : > { %11141 = vmatpush1.msra.mxu0 %v11140_v50  ;;  %11671 = vmatmul.mubr.f32.vlgmr.msra.gmra.mrb[2].mxu1 %v37431_v35  ;;  %v12050_v51 = vmul.f32 %v36343_v43, %v12010_v32  ;;  %v12047_v17 = vmul.f32 %v37002_v5, %v12013_v11  ;;  %v12014_v36 = vsel %vm12006_vm5, %v12005_v4, %v37613_v62 }
 0x27b   : > { %11214 = vmatprep.subr.mxu0 %v37565_v29  ;;  %11682 = vmatpush1.msra.mxu1 %v37556_v44  ;;  %v37665_v44 = vsub.f32 %v12058_v26, %v37648_v42  ;;  %v12054_v57 = vmul.f32 %v37735_v18, %v12014_v36 }
 0x27c   : > { %11755 = vmatprep.subr.mxu1 %v37538_v41  ;;  %11204 = vmatprep.mubr.f32.mxu0 %v36018_v0  ;;  %v12070_v8 = vsel %vm475_vm2, %v12050_v51, 0 }
 0x27d   : > { %11745 = vmatprep.mubr.f32.mxu1 %v36018_v0  ;;  %v37643_v45 = vand.u32 4294901760, %v12070_v8  ;;  %v37681_v23 = vand.u32 4294901760, %v37665_v44  ;;  %v12082_v11 = vsel %vm475_vm2, %v12054_v57, 0 }
 0x27f   : > { %v37662_v59 = vsub.f32 %v12070_v8, %v37643_v45  ;;  %v12001_v8 = vpop.permute.xlu1 %12000 }
 0x281   : > { %11206 = vmatmul.mubr.f32.vlgmr.msra.gmra.mrb[2].mxu0 %v37431_v35 }
 0x282   : > { %11217 = vmatpush1.msra.mxu0 %v37581_v37  ;;  %11748 = vmatmul.mubr.f32.vlgmr.msra.gmra.mrb[2].mxu1 %v37448_v13 }
 0x283   : > { %11290 = vmatprep.subr.mxu0 %v37553_v63  ;;  %11757 = vmatpush1.msra.mxu1 %v37543_v21 }
 0x284   : > { %11833 = vmatprep.subr.mxu1 %v11597_v30  ;;  %11280 = vmatprep.mubr.f32.mxu0 %v36018_v0  ;;  %v37658_v30 = vand.u32 4294901760, %v12067_v9 }
 0x285   : > { %11820 = vmatprep.mubr.f32.mxu1 %v36018_v0 }
 0x286   : > { %v37671_v27 = vsub.f32 %v12067_v9, %v37658_v30 }
 0x289   : > { %11283 = vmatmul.mubr.f32.vlgmr.msra.gmra.mrb[2].mxu0 %v37448_v13  ;;  %v12064_v13 = vsel %vm475_vm2, %v12048_v19, 0 }
 0x28a   : > { %11292 = vmatpush1.msra.mxu0 %v37570_v6  ;;  %11824 = vmatmul.mubr.f32.vlgmr.msra.gmra.mrb[2].mxu1 %v37464_v53  ;;  %v37668_v29 = vand.u32 4294901760, %v12064_v13 }
 0x28b   : > { %11837 = vmatpush1.msra.mxu1 %v11603_v7  ;;  %11368 = vmatprep.subr.mxu0 %v11132_v47  ;;  %v12061_v7 = vsel %vm475_vm2, %v12047_v17, 0  ;;  %v12629_v47 = vand.u32 4294901760, %v37662_v59  ;;  %v12009_v17 = vsel %vm12006_vm5, %v37605_v31, %v12001_v8 }
 0x28c   : > { %11909 = vmatprep.subr.mxu1 %v37538_v41  ;;  %11355 = vmatprep.mubr.f32.mxu0 %v36018_v0  ;;  %v37674_v41 = vand.u32 4294901760, %v12061_v7  ;;  %v37684_v20 = vsub.f32 %v12064_v13, %v37668_v29  ;;  %v37761_v13 = vand.u32 4294901760, %v12082_v11  ;;  %v12051_v31 = vmul.f32 %v36556_v22, %v12009_v17 }
 0x28d   : > { %11900 = vmatprep.mubr.f32.mxu1 %v36018_v0  ;;  %v12630_v28 = vsub.f32 %v37662_v59, %v12629_v47 }
 0x28e   : > { %v37693_v37 = vsub.f32 %v12061_v7, %v37674_v41 }
 0x28f   : > { %v12631_v61 = vand.u32 4294901760, %v12630_v28 }
 0x290   : > { %v12170_v50 = vand.u32 4294901760, %v37693_v37 }
 0x291   : > { %11359 = vmatmul.mubr.f32.vlgmr.msra.gmra.mrb[2].mxu0 %v37464_v53  ;;  %v12635_v53 = vand.u32 4294901760, %v37671_v27 }
 0x292   : > { %11372 = vmatpush1.msra.mxu0 %v11138_v3  ;;  %11902 = vmatmul.mubr.f32.vlgmr.msra.gmra.mrb[2].mxu1 %v37431_v35  ;;  %v12154_v3 = vsub.f32 %v37665_v44, %v37681_v23 }
 0x293   : > { %11444 = vmatprep.subr.mxu0 %v37553_v63  ;;  %11911 = vmatpush1.msra.mxu1 %v37543_v21  ;;  %v12164_v63 = vand.u32 4294901760, %v37684_v20  ;;  %v12636_v21 = vsub.f32 %v37671_v27, %v12635_v53 }
 0x294   : > { %12550 = vmatprep.subr.mxu1 %v37643_v45  ;;  %11435 = vmatprep.mubr.f32.mxu0 %v36018_v0  ;;  %v37705_v40 = vand.u32 4294901760, %v12154_v3 }
 0x295   : > { %11974 = vmatprep.mubr.f32.mxu1 %v36018_v0  ;;  %v12165_v32 = vsub.f32 %v37684_v20, %v12164_v63  ;;  %v12637_v10 = vand.u32 4294901760, %v12636_v21 }
 0x297   : > { %v12166_v51 = vand.u32 4294901760, %v12165_v32 }
 0x299   : > { %11437 = vmatmul.mubr.f32.vlgmr.msra.gmra.mrb[2].mxu0 %v37431_v35 }
 0x29a   : > { %11446 = vmatpush1.msra.mxu0 %v37570_v6  ;;  %11976 = vmatmul.mubr.f32.vlgmr.msra.gmra.mrb[2].mxu1 %v37431_v35  ;;  %v12171_v6 = vsub.f32 %v37693_v37, %v12170_v50 }
 0x29b   : > { %12552 = vmatpush1.msra.mxu1 %v37658_v30  ;;  %12085 = vmatprep.subr.mxu0 %v37668_v29 }
 0x29c   : > { %12632 = vmatprep.subr.mxu1 %v12631_v61  ;;  %12615 = vmatprep.mubr.f32.mxu1 %v36018_v0  ;;  %v12172_v16 = vand.u32 4294901760, %v12171_v6 }
 0x29d   : > { %11509 = vmatprep.mubr.f32.mxu0 %v36018_v0 }
 0x29e   : > { %12621 = vmatmul.mubr.f32.vlgmr.msra.gmra.mrb[0].mxu1 %v37705_v40 }
 0x29f   : > { %12638 = vmatpush1.msra.mxu1 %v12637_v10  ;;  %12701 = vmatprep.mubr.f32.mxu1 %v36018_v0 }
 0x2a0   : > { %12711 = vmatprep.subr.mxu1 %v37662_v59 }
 0x2a1   : > { %11511 = vmatmul.mubr.f32.vlgmr.msra.gmra.mrb[2].mxu0 %v37431_v35  ;;  %v12003_v35 = vpop.permute.xlu0 %12002 }
 0x2a2   : > { %12087 = vmatpush1.msra.mxu0 %v37674_v41  ;;  %12150 = vmatprep.mubr.f32.mxu0 %v36018_v0  ;;  %v12007_v24 = vsel %vm12006_vm5, %v12003_v35, %v12005_v4  ;;  %v12008_v26 = vsel %vm12006_vm5, %v12001_v8, %v12003_v35 }
 0x2a3   : > { %12167 = vmatprep.subr.mxu0 %v12166_v51  ;;  %v12053_v62 = vmul.f32 %v36535_v58, %v12007_v24  ;;  %v12052_v19 = vmul.f32 %v36545_v34, %v12008_v26  ;;  %v35113_v24 = vld [vmem:[%s39970_s1 + $0x38] sm:$0xff] }
 0x2a4   : > { %v14004_v26 = vsel %vm471_vm0, %v35113_v24, 0 }
 0x2a5   : > { %12156 = vmatmul.mubr.f32.vlgmr.msra.gmra.mrb[0].mxu0 %v37705_v40  ;;  %v12079_v9 = vsel %vm475_vm2, %v12053_v62, 0  ;;  %v12076_v7 = vsel %vm475_vm2, %v12052_v19, 0  ;;  %v13959_v4 = vpop.permute.xlu0 %13958  ;;  %v37854_v17 = vand.u32 4294901760, %v14004_v26 }
 0x2a6   : > { %12173 = vmatpush1.msra.mxu0 %v12172_v16  ;;  %12703 = vmatmul.mubr.f32.vlgmr.msra.gmra.mrb[0].mxu1 %v37648_v42  ;;  %v37766_v59 = vand.u32 4294901760, %v12079_v9  ;;  %v37819_v16 = vpop.permute.xlu1 %13960 }
 0x2a7   : > { %12246 = vmatprep.subr.mxu0 %v37684_v20  ;;  %12714 = vmatpush1.msra.mxu1 %v37671_v27  ;;  %v37774_v20 = vand.u32 4294901760, %v12076_v7  ;;  %v12073_v27 = vsel %vm475_vm2, %v12051_v31, 0 }
 0x2a8   : > { %12787 = vmatprep.subr.mxu1 %v37643_v45  ;;  %12236 = vmatprep.mubr.f32.mxu0 %v36018_v0  ;;  %v37777_v28 = vsub.f32 %v12079_v9, %v37766_v59 }
 0x2a9   : > { %12777 = vmatprep.mubr.f32.mxu1 %v36018_v0  ;;  %v13957_v36 = vpop.permute.xlu0 %13956 }
 0x2aa   : > { %v13565_v3 = vand.u32 4294901760, %v37777_v28  ;;  %v37827_v35 = vpop.permute.xlu1 %13952  ;;  %v13973_v57 = vsel %vm13968_vm10, %v13957_v36, %v13959_v4 }
 0x2ac   : > { %v13566_v21 = vsub.f32 %v37777_v28, %v13565_v3 }
 0x2ad   : > { %12238 = vmatmul.mubr.f32.vlgmr.msra.gmra.mrb[0].mxu0 %v37648_v42 }
 0x2ae   : > { %12249 = vmatpush1.msra.mxu0 %v37693_v37  ;;  %12780 = vmatmul.mubr.f32.vlgmr.msra.gmra.mrb[0].mxu1 %v37665_v44  ;;  %v13955_v62 = vpop.permute.xlu1 %13954 }
 0x2af   : > { %12322 = vmatprep.subr.mxu0 %v37668_v29  ;;  %12789 = vmatpush1.msra.mxu1 %v37658_v30  ;;  %v13974_v9 = vsel %vm13968_vm10, %v13955_v62, %v13957_v36 }
 0x2b0   : > { %12865 = vmatprep.subr.mxu1 %v12629_v47  ;;  %12312 = vmatprep.mubr.f32.mxu0 %v36018_v0  ;;  %v13558_v47 = vsub.f32 %v12082_v11, %v37761_v13  ;;  %v14013_v11 = vsel %vm475_vm2, %v13973_v57, 0 }
 0x2b1   : > { %12852 = vmatprep.mubr.f32.mxu1 %v36018_v0 }
 0x2b5   : > { %12315 = vmatmul.mubr.f32.vlgmr.msra.gmra.mrb[0].mxu0 %v37665_v44 }
 0x2b6   : > { %12324 = vmatpush1.msra.mxu0 %v37674_v41  ;;  %12856 = vmatmul.mubr.f32.vlgmr.msra.gmra.mrb[0].mxu1 %v37681_v23 }
 0x2b7   : > { %12400 = vmatprep.subr.mxu0 %v12164_v63  ;;  %12869 = vmatpush1.msra.mxu1 %v12635_v53  ;;  %v37785_v53 = vsub.f32 %v12076_v7, %v37774_v20  ;;  %v37790_v63 = vand.u32 4294901760, %v12073_v27  ;;  %v37856_v7 = vand.u32 4294901760, %v14013_v11 }
 0x2b8   : > { %12941 = vmatprep.subr.mxu1 %v37643_v45  ;;  %12387 = vmatprep.mubr.f32.mxu0 %v36018_v0  ;;  %v13559_v45 = vand.u32 4294901760, %v13558_v47 }
 0x2b9   : > { %12932 = vmatprep.mubr.f32.mxu1 %v36018_v0  ;;  %v13094_v61 = vand.u32 4294901760, %v37785_v53 }
 0x2ba   : > { %v13560_v37 = vsub.f32 %v13558_v47, %v13559_v45 }
 0x2bb   : > { %v13095_v32 = vsub.f32 %v37785_v53, %v13094_v61 }
 0x2bd   : > { %12391 = vmatmul.mubr.f32.vlgmr.msra.gmra.mrb[0].mxu0 %v37681_v23 }
 0x2be   : > { %12404 = vmatpush1.msra.mxu0 %v12170_v50  ;;  %12934 = vmatmul.mubr.f32.vlgmr.msra.gmra.mrb[0].mxu1 %v37648_v42  ;;  %v13567_v50 = vand.u32 4294901760, %v13566_v21 }
 0x2bf   : > { %12476 = vmatprep.subr.mxu0 %v37668_v29  ;;  %12943 = vmatpush1.msra.mxu1 %v37658_v30  ;;  %v37800_v29 = vsub.f32 %v12073_v27, %v37790_v63  ;;  %v13561_v30 = vand.u32 4294901760, %v13560_v37  ;;  %v37871_v27 = vsub.f32 %v14004_v26, %v37854_v17 }
 0x2c0   : > { %13480 = vmatprep.subr.mxu1 %v37761_v13  ;;  %12467 = vmatprep.mubr.f32.mxu0 %v36018_v0 }
 0x2c1   : > { %13006 = vmatprep.mubr.f32.mxu1 %v36018_v0  ;;  %v13100_v10 = vand.u32 4294901760, %v37800_v29  ;;  %v37885_v37 = vand.u32 4294901760, %v37871_v27 }
 0x2c3   : > { %v13101_v6 = vsub.f32 %v37800_v29, %v13100_v10 }
 0x2c5   : > { %12469 = vmatmul.mubr.f32.vlgmr.msra.gmra.mrb[0].mxu0 %v37648_v42  ;;  %v13102_v51 = vand.u32 4294901760, %v13101_v6 }
 0x2c6   : > { %12478 = vmatpush1.msra.mxu0 %v37674_v41  ;;  %13008 = vmatmul.mubr.f32.vlgmr.msra.gmra.mrb[0].mxu1 %v37648_v42  ;;  %v13096_v41 = vand.u32 4294901760, %v13095_v32 }
 0x2c7   : > { %13482 = vmatpush1.msra.mxu1 %v37766_v59  ;;  %13015 = vmatprep.subr.mxu0 %v37774_v20 }
 0x2c8   : > { %13562 = vmatprep.subr.mxu1 %v13561_v30  ;;  %13545 = vmatprep.mubr.f32.mxu1 %v36018_v0  ;;  %v14100_v30 = vsub.f32 %v37871_v27, %v37885_v37 }
 0x2c9   : > { %12541 = vmatprep.mubr.f32.mxu0 %v36018_v0 }
 0x2ca   : > { %13551 = vmatmul.mubr.f32.vlgmr.msra.gmra.mrb[2].mxu1 %v37705_v40 }
 0x2cb   : > { %13568 = vmatpush1.msra.mxu1 %v13567_v50  ;;  %13631 = vmatprep.mubr.f32.mxu1 %v36018_v0 }
 0x2cc   : > { %13641 = vmatprep.subr.mxu1 %v13558_v47  ;;  %v14010_v47 = vsel %vm475_vm2, %v13974_v9, 0 }
 0x2cd   : > { %12543 = vmatmul.mubr.f32.vlgmr.msra.gmra.mrb[0].mxu0 %v37648_v42 }
 0x2ce   : > { %13017 = vmatpush1.msra.mxu0 %v37790_v63  ;;  %13080 = vmatprep.mubr.f32.mxu0 %v36018_v0 }
 0x2cf   : > { %13097 = vmatprep.subr.mxu0 %v13096_v41 }
 0x2d1   : > { %13086 = vmatmul.mubr.f32.vlgmr.msra.gmra.mrb[2].mxu0 %v37705_v40  ;;  %v13972_v40 = vsel %vm13968_vm10, %v13959_v4, %v37819_v16  ;;  %v13967_v4 = vpop.permute.xlu0 %13966 }
 0x2d2   : > { %13103 = vmatpush1.msra.mxu0 %v13102_v51  ;;  %13633 = vmatmul.mubr.f32.vlgmr.msra.gmra.mrb[2].mxu1 %v37648_v42  ;;  %v14016_v8 = vsel %vm475_vm2, %v13972_v40, 0  ;;  %v13976_v24 = vsel %vm13968_vm10, %v13967_v4, %v37827_v35 }
 0x2d3   : > { %13176 = vmatprep.subr.mxu0 %v37785_v53  ;;  %13644 = vmatpush1.msra.mxu1 %v37777_v28  ;;  %v37847_v19 = vand.u32 4294901760, %v14016_v8  ;;  %v37874_v28 = vsub.f32 %v14013_v11, %v37856_v7 }
 0x2d4   : > { %13717 = vmatprep.subr.mxu1 %v37761_v13  ;;  %13166 = vmatprep.mubr.f32.mxu0 %v36018_v0 }
 0x2d5   : > { %13707 = vmatprep.mubr.f32.mxu1 %v36018_v0  ;;  %v37862_v31 = vsub.f32 %v14016_v8, %v37847_v19  ;;  %v14581_v21 = vand.u32 4294901760, %v37874_v28  ;;  %v13965_v36 = vpop.permute.xlu0 %13964 }
 0x2d7   : > { %v14575_v53 = vand.u32 4294901760, %v37862_v31 }
 0x2d9   : > { %13168 = vmatmul.mubr.f32.vlgmr.msra.gmra.mrb[2].mxu0 %v37648_v42  ;;  %v37943_v8 = vpop.permute.xlu0 %15906 }
 0x2da   : > { %13179 = vmatpush1.msra.mxu0 %v37800_v29  ;;  %13710 = vmatmul.mubr.f32.vlgmr.msra.gmra.mrb[2].mxu1 %v37665_v44 }
 0x2db   : > { %13252 = vmatprep.subr.mxu0 %v37774_v20  ;;  %13719 = vmatpush1.msra.mxu1 %v37766_v59 }
 0x2dc   : > { %13795 = vmatprep.subr.mxu1 %v13559_v45  ;;  %13242 = vmatprep.mubr.f32.mxu0 %v36018_v0  ;;  %v37877_v45 = vand.u32 4294901760, %v14010_v47 }
 0x2dd   : > { %13782 = vmatprep.mubr.f32.mxu1 %v36018_v0  ;;  %v13963_v9 = vpop.permute.xlu0 %13962 }
 0x2e1   : > { %13245 = vmatmul.mubr.f32.vlgmr.msra.gmra.mrb[2].mxu0 %v37665_v44  ;;  %v13975_v44 = vsel %vm13968_vm10, %v37827_v35, %v13955_v62  ;;  %v13969_v35 = vsel %vm13968_vm10, %v13965_v36, %v13967_v4 }
 0x2e2   : > { %13254 = vmatpush1.msra.mxu0 %v37790_v63  ;;  %13786 = vmatmul.mubr.f32.vlgmr.msra.gmra.mrb[2].mxu1 %v37681_v23  ;;  %v14025_v26 = vsel %vm475_vm2, %v13969_v35, 0 }
 0x2e3   : > { %13330 = vmatprep.subr.mxu0 %v13094_v61  ;;  %13799 = vmatpush1.msra.mxu1 %v13565_v3  ;;  %v37891_v61 = vsub.f32 %v14010_v47, %v37877_v45 }
 0x2e4   : > { %13871 = vmatprep.subr.mxu1 %v37761_v13  ;;  %13317 = vmatprep.mubr.f32.mxu0 %v36018_v0  ;;  %v14007_v13 = vsel %vm475_vm2, %v13975_v44, 0  ;;  %v37962_v44 = vand.u32 4294901760, %v14025_v26 }
 0x2e5   : > { %13862 = vmatprep.mubr.f32.mxu1 %v36018_v0  ;;  %v37882_v3 = vand.u32 4294901760, %v14007_v13 }
 0x2e7   : > { %v37898_v29 = vsub.f32 %v14007_v13, %v37882_v3 }
 0x2e9   : > { %13321 = vmatmul.mubr.f32.vlgmr.msra.gmra.mrb[2].mxu0 %v37681_v23  ;;  %v14576_v23 = vsub.f32 %v37862_v31, %v14575_v53  ;;  %v14116_v32 = vand.u32 4294901760, %v37898_v29 }
 0x2ea   : > { %13334 = vmatpush1.msra.mxu0 %v13100_v10  ;;  %13864 = vmatmul.mubr.f32.vlgmr.msra.gmra.mrb[2].mxu1 %v37648_v42  ;;  %v37910_v10 = vand.u32 4294901760, %v14100_v30 }
 0x2eb   : > { %13406 = vmatprep.subr.mxu0 %v37774_v20  ;;  %13873 = vmatpush1.msra.mxu1 %v37766_v59  ;;  %v14582_v59 = vsub.f32 %v37874_v28, %v14581_v21  ;;  %v14110_v20 = vand.u32 4294901760, %v37891_v61  ;;  %v14577_v50 = vand.u32 4294901760, %v14576_v23 }
 0x2ec   : > { %13397 = vmatprep.mubr.f32.mxu0 %v36018_v0  ;;  %13936 = vmatprep.mubr.f32.mxu1 %v36018_v0 }
 0x2ed   : > { %14496 = vmatprep.subr.mxu1 %v37847_v19  ;;  %v14583_v41 = vand.u32 4294901760, %v14582_v59  ;;  %v14111_v6 = vsub.f32 %v37891_v61, %v14110_v20 }
 0x2ef   : > { %v14112_v51 = vand.u32 4294901760, %v14111_v6 }
 0x2f1   : > { %13399 = vmatmul.mubr.f32.vlgmr.msra.gmra.mrb[2].mxu0 %v37648_v42 }
 0x2f2   : > { %13408 = vmatpush1.msra.mxu0 %v37790_v63  ;;  %13938 = vmatmul.mubr.f32.vlgmr.msra.gmra.mrb[2].mxu1 %v37648_v42  ;;  %v14117_v63 = vsub.f32 %v37898_v29, %v14116_v32 }
 0x2f3   : > { %14498 = vmatpush1.msra.mxu1 %v37856_v7  ;;  %14031 = vmatprep.subr.mxu0 %v37877_v45 }
 0x2f4   : > { %14561 = vmatprep.mubr.f32.mxu1 %v36018_v0  ;;  %14578 = vmatprep.subr.mxu1 %v14577_v50  ;;  %v14118_v40 = vand.u32 4294901760, %v14117_v63 }
 0x2f5   : > { %13471 = vmatprep.mubr.f32.mxu0 %v36018_v0 }
 0x2f6   : > { %14567 = vmatmul.mubr.f32.vlgmr.msra.gmra.mrb[0].mxu1 %v37910_v10 }
 0x2f7   : > { %14584 = vmatpush1.msra.mxu1 %v14583_v41  ;;  %14647 = vmatprep.mubr.f32.mxu1 %v36018_v0 }
 0x2f8   : > { %14657 = vmatprep.subr.mxu1 %v37862_v31  ;;  %v13970_v31 = vsel %vm13968_vm10, %v13963_v9, %v13965_v36 }
 0x2f9   : > { %13473 = vmatmul.mubr.f32.vlgmr.msra.gmra.mrb[2].mxu0 %v37648_v42  ;;  %v37936_v42 = vsel %vm12022_vm6, 1.0, %v36018_v0  ;;  %v14022_v13 = vsel %vm475_vm2, %v13970_v31, 0 }
 0x2fa   : > { %14033 = vmatpush1.msra.mxu0 %v37882_v3  ;;  %14096 = vmatprep.mubr.f32.mxu0 %v36018_v0  ;;  %v14000_v57 = vmul.f32 %v37936_v42, %v13976_v24 }
 0x2fb   : > { %14113 = vmatprep.subr.mxu0 %v14112_v51 }
 0x2fc   : > { %v14028_v62 = vsel %vm475_vm2, %v14000_v57, 0 }
 0x2fd   : > { %14102 = vmatmul.mubr.f32.vlgmr.msra.gmra.mrb[0].mxu0 %v37910_v10  ;;  %v37955_v11 = vand.u32 4294901760, %v14028_v62 }
 0x2fe   : > { %14119 = vmatpush1.msra.mxu0 %v14118_v40  ;;  %14649 = vmatmul.mubr.f32.vlgmr.msra.gmra.mrb[0].mxu1 %v37854_v17  ;;  %v17852_v40 = vld [vmem:[%s39971_s2] sm:$0xff] }
 0x2ff   : > { %14192 = vmatprep.subr.mxu0 %v37891_v61  ;;  %14660 = vmatpush1.msra.mxu1 %v37874_v28  ;;  %v37967_v47 = vsub.f32 %v14028_v62, %v37955_v11  ;;  %v37977_v61 = vsub.f32 %v14025_v26, %v37962_v44  ;;  %v37979_v28 = vand.u32 4294901760, %v14022_v13 }
 0x300   : > { %14733 = vmatprep.subr.mxu1 %v37847_v19  ;;  %14182 = vmatprep.mubr.f32.mxu0 %v36018_v0 }
 0x301   : > { %14723 = vmatprep.mubr.f32.mxu1 %v36018_v0 }
 0x305   : > { %14184 = vmatmul.mubr.f32.vlgmr.msra.gmra.mrb[0].mxu0 %v37854_v17 }
 0x306   : > { %14195 = vmatpush1.msra.mxu0 %v37898_v29  ;;  %14726 = vmatmul.mubr.f32.vlgmr.msra.gmra.mrb[0].mxu1 %v37871_v27 }
 0x307   : > { %14268 = vmatprep.subr.mxu0 %v37877_v45  ;;  %14735 = vmatpush1.msra.mxu1 %v37856_v7 }
 0x308   : > { %14811 = vmatprep.subr.mxu1 %v14575_v53  ;;  %14258 = vmatprep.mubr.f32.mxu0 %v36018_v0  ;;  %v13971_v53 = vsel %vm13968_vm10, %v37819_v16, %v13963_v9  ;;  %v37989_v16 = vsub.f32 %v14022_v13, %v37979_v28  ;;  %v35122_v9 = vld [vmem:[%s39970_s1 + $0x40] sm:$0xff] }
 0x309   : > { %14798 = vmatprep.mubr.f32.mxu1 %v36018_v0  ;;  %v14019_v23 = vsel %vm475_vm2, %v13971_v53, 0  ;;  %v15958_v53 = vsel %vm471_vm0, %v35122_v9, 0  ;;  %vm15930_vm0 = vmand %vm12022_vm6, %vm36809_vm3 }
 0x30a   : > { %v37993_v30 = vand.u32 4294901760, %v14019_v23  ;;  %v38160_v9 = vsel %vm15930_vm0, 1.0, %v36018_v0 }
 0x30d   : > { %14261 = vmatmul.mubr.f32.vlgmr.msra.gmra.mrb[0].mxu0 %v37871_v27 }
 0x30e   : > { %14270 = vmatpush1.msra.mxu0 %v37882_v3  ;;  %14802 = vmatmul.mubr.f32.vlgmr.msra.gmra.mrb[0].mxu1 %v37885_v37 }
 0x30f   : > { %14346 = vmatprep.subr.mxu0 %v14110_v20  ;;  %14815 = vmatpush1.msra.mxu1 %v14581_v21  ;;  %v15505_v21 = vand.u32 4294901760, %v37967_v47 }
 0x310   : > { %14887 = vmatprep.subr.mxu1 %v37847_v19  ;;  %14333 = vmatprep.mubr.f32.mxu0 %v36018_v0  ;;  %v15511_v19 = vand.u32 4294901760, %v37977_v61 }
 0x311   : > { %14878 = vmatprep.mubr.f32.mxu1 %v36018_v0  ;;  %v15506_v29 = vsub.f32 %v37967_v47, %v15505_v21 }
 0x312   : > { %v15512_v59 = vsub.f32 %v37977_v61, %v15511_v19 }
 0x313   : > { %v15507_v20 = vand.u32 4294901760, %v15506_v29 }
 0x314   : > { %v15513_v50 = vand.u32 4294901760, %v15512_v59  ;;  %v38074_v59 = vand.u32 4294901760, %v15958_v53 }
 0x315   : > { %14337 = vmatmul.mubr.f32.vlgmr.msra.gmra.mrb[0].mxu0 %v37885_v37 }
 0x316   : > { %14350 = vmatpush1.msra.mxu0 %v14116_v32  ;;  %14880 = vmatmul.mubr.f32.vlgmr.msra.gmra.mrb[0].mxu1 %v37854_v17 }
 0x317   : > { %14422 = vmatprep.subr.mxu0 %v37877_v45  ;;  %14889 = vmatpush1.msra.mxu1 %v37856_v7  ;;  %v15040_v45 = vand.u32 4294901760, %v37989_v16  ;;  %v38006_v7 = vsub.f32 %v14019_v23, %v37993_v30 }
 0x318   : > { %15426 = vmatprep.subr.mxu1 %v37955_v11  ;;  %14413 = vmatprep.mubr.f32.mxu0 %v36018_v0 }
 0x319   : > { %14952 = vmatprep.mubr.f32.mxu1 %v36018_v0  ;;  %v15041_v32 = vsub.f32 %v37989_v16, %v15040_v45  ;;  %v15046_v41 = vand.u32 4294901760, %v38006_v7 }
 0x31b   : > { %v15042_v6 = vand.u32 4294901760, %v15041_v32  ;;  %v15047_v63 = vsub.f32 %v38006_v7, %v15046_v41 }
 0x31d   : > { %14415 = vmatmul.mubr.f32.vlgmr.msra.gmra.mrb[0].mxu0 %v37854_v17  ;;  %v15048_v51 = vand.u32 4294901760, %v15047_v63 }
 0x31e   : > { %14424 = vmatpush1.msra.mxu0 %v37882_v3  ;;  %14954 = vmatmul.mubr.f32.vlgmr.msra.gmra.mrb[0].mxu1 %v37854_v17  ;;  %v15905_v3 = vpop.permute.xlu1 %15904 }
 0x31f   : > { %15428 = vmatpush1.msra.mxu1 %v37962_v44  ;;  %14961 = vmatprep.subr.mxu0 %v37979_v28  ;;  %v15918_v36 = vsel %vm15914_vm9, %v15905_v3, %v37943_v8 }
 0x320   : > { %15508 = vmatprep.subr.mxu1 %v15507_v20  ;;  %15491 = vmatprep.mubr.f32.mxu1 %v36018_v0  ;;  %v15950_v57 = vmul.f32 %v36647_v56, %v15918_v36 }
 0x321   : > { %14487 = vmatprep.mubr.f32.mxu0 %v36018_v0 }
 0x322   : > { %15497 = vmatmul.mubr.f32.vlgmr.msra.gmra.mrb[2].mxu1 %v37910_v10  ;;  %v15903_v4 = vpop.permute.xlu1 %15902  ;;  %v15970_v31 = vsel %vm475_vm2, %v15950_v57, 0 }
 0x323   : > { %15514 = vmatpush1.msra.mxu1 %v15513_v50  ;;  %15577 = vmatprep.mubr.f32.mxu1 %v36018_v0  ;;  %v15919_v35 = vsel %vm15914_vm9, %v15903_v4, %v15905_v3  ;;  %v38064_v23 = vand.u32 4294901760, %v15970_v31  ;;  %v38091_v3 = vsub.f32 %v15958_v53, %v38074_v59 }
 0x324   : > { %15587 = vmatprep.subr.mxu1 %v37967_v47  ;;  %v15949_v62 = vmul.f32 %v36670_v38, %v15919_v35 }
 0x325   : > { %14489 = vmatmul.mubr.f32.vlgmr.msra.gmra.mrb[0].mxu0 %v37854_v17  ;;  %v38084_v32 = vsub.f32 %v15970_v31, %v38064_v23 }
 0x326   : > { %14963 = vmatpush1.msra.mxu0 %v37993_v30  ;;  %15026 = vmatprep.mubr.f32.mxu0 %v36018_v0  ;;  %v38042_v24 = vpop.permute.xlu1 %15898  ;;  %v15967_v47 = vsel %vm475_vm2, %v15949_v62, 0 }
 0x327   : > { %15043 = vmatprep.subr.mxu0 %v15042_v6  ;;  %v38076_v20 = vand.u32 4294901760, %v15967_v47 }
 0x329   : > { %15032 = vmatmul.mubr.f32.vlgmr.msra.gmra.mrb[2].mxu0 %v37910_v10  ;;  %v36027_v10 = vmov 0  }
 0x32a   : > { %15049 = vmatpush1.msra.mxu0 %v15048_v51  ;;  %15579 = vmatmul.mubr.f32.vlgmr.msra.gmra.mrb[2].mxu1 %v37854_v17  ;;  %v15901_v26 = vpop.permute.xlu1 %15900 }
 0x32b   : > { %15122 = vmatprep.subr.mxu0 %v37989_v16  ;;  %15590 = vmatpush1.msra.mxu1 %v37977_v61  ;;  %v15920_v13 = vsel %vm15914_vm9, %v15901_v26, %v15903_v4  ;;  %v38094_v16 = vsub.f32 %v15967_v47, %v38076_v20 }
 0x32c   : > { %15663 = vmatprep.subr.mxu1 %v37955_v11  ;;  %15112 = vmatprep.mubr.f32.mxu0 %v36018_v0  ;;  %v15948_v29 = vmul.f32 %v36683_v46, %v15920_v13 }
 0x32d   : > { %15653 = vmatprep.mubr.f32.mxu1 %v36018_v0  ;;  %36001 = vset.pattern.permute.xlu0 %v36027_v10  ;;  %v16535_v51 = vand.u32 4294901760, %v38094_v16 }
 0x32e   : > { %17855 = vperm.xlu0 %36001, %v17852_v40   ;;  %v15909_v1 = vpop.permute.xlu1 %15908 }
 0x331   : > { %15114 = vmatmul.mubr.f32.vlgmr.msra.gmra.mrb[2].mxu0 %v37854_v17 }
 0x332   : > { %15125 = vmatpush1.msra.mxu0 %v38006_v7  ;;  %15656 = vmatmul.mubr.f32.vlgmr.msra.gmra.mrb[2].mxu1 %v37871_v27 }
 0x333   : > { %15198 = vmatprep.subr.mxu0 %v37979_v28  ;;  %15665 = vmatpush1.msra.mxu1 %v37962_v44 }
 0x334   : > { %15741 = vmatprep.subr.mxu1 %v15505_v21  ;;  %15188 = vmatprep.mubr.f32.mxu0 %v36018_v0  ;;  %v15921_v21 = vsel %vm15914_vm9, %v38042_v24, %v15901_v26  ;;  %v15913_v26 = vpop.permute.xlu0 %15912 }
 0x335   : > { %15728 = vmatprep.mubr.f32.mxu1 %v36018_v0  ;;  %v15947_v50 = vmul.f32 %v37418_v2, %v15921_v21  ;;  %v15922_v31 = vsel %vm15914_vm9, %v15913_v26, %v38042_v24 }
 0x336   : > { %v15954_v49 = vmul.f32 %v38160_v9, %v15922_v31 }
 0x337   : > { %v15961_v61 = vsel %vm475_vm2, %v15947_v50, 0  ;;  %v15917_v50 = vsel %vm15914_vm9, %v37943_v8, %v15909_v1 }
 0x338   : > { %v38101_v6 = vand.u32 4294901760, %v15961_v61  ;;  %v15982_v47 = vsel %vm475_vm2, %v15954_v49, 0  ;;  %v15951_v8 = vmul.f32 %v36878_v15, %v15917_v50 }
 0x339   : > { %15191 = vmatmul.mubr.f32.vlgmr.msra.gmra.mrb[2].mxu0 %v37871_v27  ;;  %v15964_v27 = vsel %vm475_vm2, %v15948_v29, 0 }
 0x33a   : > { %15200 = vmatpush1.msra.mxu0 %v37993_v30  ;;  %15732 = vmatmul.mubr.f32.vlgmr.msra.gmra.mrb[2].mxu1 %v37885_v37  ;;  %v38120_v7 = vsub.f32 %v15961_v61, %v38101_v6 }
 0x33b   : > { %15276 = vmatprep.subr.mxu0 %v15040_v45  ;;  %15745 = vmatpush1.msra.mxu1 %v15511_v19  ;;  %v38097_v19 = vand.u32 4294901760, %v15964_v27  ;;  %v16529_v45 = vand.u32 4294901760, %v38084_v32 }
 0x33c   : > { %15817 = vmatprep.subr.mxu1 %v37955_v11  ;;  %15263 = vmatprep.mubr.f32.mxu0 %v36018_v0  ;;  %v38107_v11 = vand.u32 4294901760, %v38091_v3  ;;  %v16070_v10 = vand.u32 4294901760, %v38120_v7 }
 0x33d   : > { %15808 = vmatprep.mubr.f32.mxu1 %v36018_v0  ;;  %v38110_v63 = vsub.f32 %v15964_v27, %v38097_v19 }
 0x341   : > { %15267 = vmatmul.mubr.f32.vlgmr.msra.gmra.mrb[2].mxu0 %v37885_v37  ;;  %v16530_v37 = vsub.f32 %v38084_v32, %v16529_v45 }
 0x342   : > { %15280 = vmatpush1.msra.mxu0 %v15046_v41  ;;  %15810 = vmatmul.mubr.f32.vlgmr.msra.gmra.mrb[2].mxu1 %v37854_v17  ;;  %v16054_v41 = vsub.f32 %v38091_v3, %v38107_v11 }
 0x343   : > { %15352 = vmatprep.subr.mxu0 %v37979_v28  ;;  %15819 = vmatpush1.msra.mxu1 %v37962_v44  ;;  %v16536_v44 = vsub.f32 %v38094_v16, %v16535_v51  ;;  %v16064_v28 = vand.u32 4294901760, %v38110_v63  ;;  %v16531_v4 = vand.u32 4294901760, %v16530_v37 }
 0x344   : > { %16450 = vmatprep.subr.mxu1 %v38064_v23  ;;  %15343 = vmatprep.mubr.f32.mxu0 %v36018_v0  ;;  %v38131_v40 = vand.u32 4294901760, %v16054_v41 }
 0x345   : > { %15882 = vmatprep.mubr.f32.mxu1 %v36018_v0  ;;  %v16537_v36 = vand.u32 4294901760, %v16536_v44  ;;  %v16065_v57 = vsub.f32 %v38110_v63, %v16064_v28 }
 0x347   : > { %v16066_v35 = vand.u32 4294901760, %v16065_v57 }
 0x349   : > { %15345 = vmatmul.mubr.f32.vlgmr.msra.gmra.mrb[2].mxu0 %v37854_v17 }
 0x34a   : > { %15354 = vmatpush1.msra.mxu0 %v37993_v30  ;;  %15884 = vmatmul.mubr.f32.vlgmr.msra.gmra.mrb[2].mxu1 %v37854_v17  ;;  %v16071_v30 = vsub.f32 %v38120_v7, %v16070_v10 }
 0x34b   : > { %16452 = vmatpush1.msra.mxu1 %v38076_v20  ;;  %15985 = vmatprep.subr.mxu0 %v38097_v19 }
 0x34c   : > { %16532 = vmatprep.subr.mxu1 %v16531_v4  ;;  %16515 = vmatprep.mubr.f32.mxu1 %v36018_v0  ;;  %v16072_v62 = vand.u32 4294901760, %v16071_v30 }
 0x34d   : > { %15417 = vmatprep.mubr.f32.mxu0 %v36018_v0 }
 0x34e   : > { %16521 = vmatmul.mubr.f32.vlgmr.msra.gmra.mrb[0].mxu1 %v38131_v40 }
 0x34f   : > { %16538 = vmatpush1.msra.mxu1 %v16537_v36  ;;  %16601 = vmatprep.mubr.f32.mxu1 %v36018_v0 }
 0x350   : > { %16611 = vmatprep.subr.mxu1 %v38084_v32  ;;  %v38186_v32 = vand.u32 4294901760, %v15982_v47 }
 0x351   : > { %15419 = vmatmul.mubr.f32.vlgmr.msra.gmra.mrb[2].mxu0 %v37854_v17  ;;  %v15911_v17 = vpop.permute.xlu0 %15910 }
 0x352   : > { %15987 = vmatpush1.msra.mxu0 %v38101_v6  ;;  %16050 = vmatprep.mubr.f32.mxu0 %v36018_v0  ;;  %v15915_v13 = vsel %vm15914_vm9, %v15911_v17, %v15913_v26  ;;  %v15916_v53 = vsel %vm15914_vm9, %v15909_v1, %v15911_v17 }
 0x353   : > { %16067 = vmatprep.subr.mxu0 %v16066_v35  ;;  %v15953_v24 = vmul.f32 %v36845_v52, %v15915_v13  ;;  %v15952_v21 = vmul.f32 %v36855_v54, %v15916_v53 }
 0x355   : > { %16056 = vmatmul.mubr.f32.vlgmr.msra.gmra.mrb[0].mxu0 %v38131_v40  ;;  %v15979_v29 = vsel %vm475_vm2, %v15953_v24, 0  ;;  %v15976_v61 = vsel %vm475_vm2, %v15952_v21, 0 }
 0x356   : > { %16073 = vmatpush1.msra.mxu0 %v16072_v62  ;;  %16603 = vmatmul.mubr.f32.vlgmr.msra.gmra.mrb[0].mxu1 %v38074_v59  ;;  %v38191_v27 = vand.u32 4294901760, %v15979_v29 }
 0x357   : > { %16146 = vmatprep.subr.mxu0 %v38110_v63  ;;  %16614 = vmatpush1.msra.mxu1 %v38094_v16  ;;  %v38199_v63 = vand.u32 4294901760, %v15976_v61  ;;  %v15973_v16 = vsel %vm475_vm2, %v15951_v8, 0  ;;  %vm17941_vm2 = vcmask 64512  }
 0x358   : > { %16687 = vmatprep.subr.mxu1 %v38064_v23  ;;  %16136 = vmatprep.mubr.f32.mxu0 %v36018_v0  ;;  %v17464_v37 = vsub.f32 %v15979_v29, %v38191_v27  ;;  %v16916_v44 = vand.u32 4294901760, %v15973_v16 }
 0x359   : > { %16677 = vmatprep.mubr.f32.mxu1 %v36018_v0 }
 0x35a   : > { %v17465_v41 = vand.u32 4294901760, %v17464_v37 }
 0x35d   : > { %16138 = vmatmul.mubr.f32.vlgmr.msra.gmra.mrb[0].mxu0 %v38074_v59 }
 0x35e   : > { %16149 = vmatpush1.msra.mxu0 %v38120_v7  ;;  %16680 = vmatmul.mubr.f32.vlgmr.msra.gmra.mrb[0].mxu1 %v38091_v3  ;;  %v17466_v7 = vsub.f32 %v17464_v37, %v17465_v41 }
 0x35f   : > { %16222 = vmatprep.subr.mxu0 %v38097_v19  ;;  %16689 = vmatpush1.msra.mxu1 %v38076_v20 }
 0x360   : > { %16765 = vmatprep.subr.mxu1 %v16529_v45  ;;  %16212 = vmatprep.mubr.f32.mxu0 %v36018_v0  ;;  %v17458_v45 = vsub.f32 %v15982_v47, %v38186_v32 }
 0x361   : > { %16752 = vmatprep.mubr.f32.mxu1 %v36018_v0 }
 0x365   : > { %16215 = vmatmul.mubr.f32.vlgmr.msra.gmra.mrb[0].mxu0 %v38091_v3 }
 0x366   : > { %16224 = vmatpush1.msra.mxu0 %v38101_v6  ;;  %16756 = vmatmul.mubr.f32.vlgmr.msra.gmra.mrb[0].mxu1 %v38107_v11 }
 0x367   : > { %16300 = vmatprep.subr.mxu0 %v16064_v28  ;;  %16769 = vmatpush1.msra.mxu1 %v16535_v51  ;;  %v16993_v51 = vsub.f32 %v15976_v61, %v38199_v63 }
 0x368   : > { %16841 = vmatprep.subr.mxu1 %v38064_v23  ;;  %16287 = vmatprep.mubr.f32.mxu0 %v36018_v0  ;;  %v17459_v23 = vand.u32 4294901760, %v17458_v45 }
 0x369   : > { %16832 = vmatprep.mubr.f32.mxu1 %v36018_v0  ;;  %v16994_v4 = vand.u32 4294901760, %v16993_v51 }
 0x36a   : > { %v17460_v28 = vsub.f32 %v17458_v45, %v17459_v23 }
 0x36b   : > { %v16995_v36 = vsub.f32 %v16993_v51, %v16994_v4 }
 0x36d   : > { %16291 = vmatmul.mubr.f32.vlgmr.msra.gmra.mrb[0].mxu0 %v38107_v11  ;;  %v16996_v30 = vand.u32 4294901760, %v16995_v36 }
 0x36e   : > { %16304 = vmatpush1.msra.mxu0 %v16070_v10  ;;  %16834 = vmatmul.mubr.f32.vlgmr.msra.gmra.mrb[0].mxu1 %v38074_v59  ;;  %v16999_v10 = vsub.f32 %v15973_v16, %v16916_v44 }
 0x36f   : > { %16376 = vmatprep.subr.mxu0 %v38097_v19  ;;  %16843 = vmatpush1.msra.mxu1 %v38076_v20  ;;  %v17461_v19 = vand.u32 4294901760, %v17460_v28  ;;  %v17467_v20 = vand.u32 4294901760, %v17466_v7  ;;  %v35123_v28 = vld [vmem:[%s39972_s3 + $0x8] sm:$0xff] }
 0x370   : > { %17380 = vmatprep.subr.mxu1 %v38186_v32  ;;  %16367 = vmatprep.mubr.f32.mxu0 %v36018_v0  ;;  %v17000_v57 = vand.u32 4294901760, %v16999_v10  ;;  %v17943_v7 = vsel %vm17941_vm2, %v35123_v28, 0 }
 0x371   : > { %16906 = vmatprep.mubr.f32.mxu1 %v36018_v0 }
 0x375   : > { %16369 = vmatmul.mubr.f32.vlgmr.msra.gmra.mrb[0].mxu0 %v38074_v59 }
 0x376   : > { %16378 = vmatpush1.msra.mxu0 %v38101_v6  ;;  %16908 = vmatmul.mubr.f32.vlgmr.msra.gmra.mrb[0].mxu1 %v38074_v59  ;;  %v17001_v6 = vsub.f32 %v16999_v10, %v17000_v57 }
 0x377   : > { %17382 = vmatpush1.msra.mxu1 %v38191_v27  ;;  %16915 = vmatprep.subr.mxu0 %v38199_v63 }
 0x378   : > { %17462 = vmatprep.subr.mxu1 %v17461_v19  ;;  %17445 = vmatprep.mubr.f32.mxu1 %v36018_v0  ;;  %v17002_v35 = vand.u32 4294901760, %v17001_v6 }
 0x379   : > { %16441 = vmatprep.mubr.f32.mxu0 %v36018_v0 }
 0x37a   : > { %17451 = vmatmul.mubr.f32.vlgmr.msra.gmra.mrb[2].mxu1 %v38131_v40 }
 0x37b   : > { %17468 = vmatpush1.msra.mxu1 %v17467_v20  ;;  %17531 = vmatprep.mubr.f32.mxu1 %v36018_v0 }
 0x37c   : > { %17541 = vmatprep.subr.mxu1 %v17458_v45 }
 0x37d   : > { %16443 = vmatmul.mubr.f32.vlgmr.msra.gmra.mrb[0].mxu0 %v38074_v59 }
 0x37e   : > { %16917 = vmatpush1.msra.mxu0 %v16916_v44  ;;  %16980 = vmatprep.mubr.f32.mxu0 %v36018_v0 }
 0x37f   : > { %16997 = vmatprep.subr.mxu0 %v16996_v30 }
 0x381   : > { %16986 = vmatmul.mubr.f32.vlgmr.msra.gmra.mrb[2].mxu0 %v38131_v40 }
 0x382   : > { %17003 = vmatpush1.msra.mxu0 %v17002_v35  ;;  %17533 = vmatmul.mubr.f32.vlgmr.msra.gmra.mrb[2].mxu1 %v38074_v59 }
 0x383   : > { %17076 = vmatprep.subr.mxu0 %v16993_v51  ;;  %17544 = vmatpush1.msra.mxu1 %v17464_v37 }
 0x384   : > { %17617 = vmatprep.subr.mxu1 %v38186_v32  ;;  %17066 = vmatprep.mubr.f32.mxu0 %v36018_v0 }
 0x385   : > { %17607 = vmatprep.mubr.f32.mxu1 %v36018_v0 }
 0x389   : > { %17068 = vmatmul.mubr.f32.vlgmr.msra.gmra.mrb[2].mxu0 %v38074_v59 }
 0x38a   : > { %17079 = vmatpush1.msra.mxu0 %v16999_v10  ;;  %17610 = vmatmul.mubr.f32.vlgmr.msra.gmra.mrb[2].mxu1 %v38091_v3 }
 0x38b   : > { %17152 = vmatprep.subr.mxu0 %v38199_v63  ;;  %17619 = vmatpush1.msra.mxu1 %v38191_v27 }
 0x38c   : > { %17695 = vmatprep.subr.mxu1 %v17459_v23  ;;  %17142 = vmatprep.mubr.f32.mxu0 %v36018_v0 }
 0x38d   : > { %17682 = vmatprep.mubr.f32.mxu1 %v36018_v0 }
 0x391   : > { %17145 = vmatmul.mubr.f32.vlgmr.msra.gmra.mrb[2].mxu0 %v38091_v3 }
 0x392   : > { %17154 = vmatpush1.msra.mxu0 %v16916_v44  ;;  %17686 = vmatmul.mubr.f32.vlgmr.msra.gmra.mrb[2].mxu1 %v38107_v11 }
 0x393   : > { %17230 = vmatprep.subr.mxu0 %v16994_v4  ;;  %17699 = vmatpush1.msra.mxu1 %v17465_v41  ;;  %v38383_v4 = vand.u32 4294901760, %v17943_v7 }
 0x394   : > { %17771 = vmatprep.subr.mxu1 %v38186_v32  ;;  %17217 = vmatprep.mubr.f32.mxu0 %v36018_v0 }
 0x395   : > { %17762 = vmatprep.mubr.f32.mxu1 %v36018_v0  ;;  %v38390_v10 = vsub.f32 %v17943_v7, %v38383_v4 }
 0x397   : > { %v38400_v20 = vand.u32 4294901760, %v38390_v10 }
 0x399   : > { %17221 = vmatmul.mubr.f32.vlgmr.msra.gmra.mrb[2].mxu0 %v38107_v11 }
 0x39a   : > { %17234 = vmatpush1.msra.mxu0 %v17000_v57  ;;  %17764 = vmatmul.mubr.f32.vlgmr.msra.gmra.mrb[2].mxu1 %v38074_v59  ;;  %v18015_v57 = vsub.f32 %v38390_v10, %v38400_v20 }
 0x39b   : > { %17306 = vmatprep.subr.mxu0 %v38199_v63  ;;  %17773 = vmatpush1.msra.mxu1 %v38191_v27 }
 0x39c   : > { %17297 = vmatprep.mubr.f32.mxu0 %v36018_v0  ;;  %17836 = vmatprep.mubr.f32.mxu1 %v36018_v0 }
 0x3a1   : > { %17299 = vmatmul.mubr.f32.vlgmr.msra.gmra.mrb[2].mxu0 %v38074_v59 }
 0x3a2   : > { %17308 = vmatpush1.msra.mxu0 %v16916_v44  ;;  %17838 = vmatmul.mubr.f32.vlgmr.msra.gmra.mrb[2].mxu1 %v38074_v59 }
 0x3a3   : > { %17371 = vmatprep.mubr.f32.mxu0 %v36018_v0  ;;  %18476 = vmatprep.mubr.f32.mxu1 %v36018_v0 }
 0x3a9   : > { %17373 = vmatmul.mubr.f32.vlgmr.msra.gmra.mrb[2].mxu0 %v38074_v59 }
 0x3aa   : > { %18011 = vmatprep.mubr.f32.mxu0 %v36018_v0 }
 0x3ad   : > { %v17856_v40 = vpop.permute.xlu0 %17855 }
 0x449   : > { %v16909_v3 = vpop.f32.mrb[0].mxu1 }
 0x44a   : > { %v16911_v11 = vpop.f32.mrb[1].mxu1  ;;  %v17860_v21 = vadd.f32 %v17856_v40, %v16909_v3 }
 0x44b   : > { %v17861_v49 = vadd.f32 %v17856_v40, %v16911_v11  ;;  %v38420_v11 = vand.u32 4294901760, %v18015_v57 }
 0x44c   : > { %v38268_v32 = vmax.f32 %v17860_v21, 0.0 }
 0x44d   : > { %v38260_v59 = vmax.f32 %v17861_v49, 0.0 }
 0x450   : > { %v16444_v62 = vpop.f32.mrb[0].mxu0 }
 0x451   : > { %v17858_v26 = vadd.f32 %v17856_v40, %v16444_v62  ;;  %v16446_v17 = vpop.f32.mrb[1].mxu0 }
 0x452   : > { %v17859_v31 = vadd.f32 %v17856_v40, %v16446_v17 }
 0x453   : > { %v38252_v13 = vmax.f32 %v17858_v26, 0.0 }
 0x454   : > { %v38254_v1 = vmax.f32 %v17859_v31, 0.0 }
 0x455   : > { %17907 = vrot.lane.b32.xlu1 %v38252_v13, %s36019_s24 }
 0x456   : > { %17909 = vrot.lane.b32.xlu0 %v38254_v1, %s36019_s24 }
 0x45a   : > { %17913 = vrot.lane.b32.xlu0 %v38260_v59, %s36019_s24 }
 0x475   : > { %v17839_v24 = vpop.f32.mrb[2].mxu1 }
 0x476   : > { %v17841_v53 = vpop.f32.mrb[3].mxu1  ;;  %v17864_v63 = vadd.f32 %v17856_v40, %v17839_v24 }
 0x477   : > { %v17865_v47 = vadd.f32 %v17856_v40, %v17841_v53 }
 0x478   : > { %v38280_v16 = vmax.f32 %v17864_v63, 0.0 }
 0x479   : > { %v38264_v29 = vmax.f32 %v17865_v47, 0.0  ;;  %v34971_v47 = vld [vmem:[%s39973_s4] sm:$0xff] }
 0x47b   : > { %17921 = vrot.lane.b32.xlu1 %v38264_v29, %s36019_s24 }
 0x47c   : > { %v17374_v50 = vpop.f32.mrb[2].mxu0 }
 0x47d   : > { %v17862_v27 = vadd.f32 %v17856_v40, %v17374_v50  ;;  %v17376_v61 = vpop.f32.mrb[3].mxu0 }
 0x47e   : > { %v17863_v8 = vadd.f32 %v17856_v40, %v17376_v61 }
 0x47f   : > { %17911 = vrot.lane.b32.xlu1 %v38268_v32, %s36019_s24  ;;  %v38274_v37 = vmax.f32 %v17862_v27, 0.0 }
 0x480   : > { %v38272_v45 = vmax.f32 %v17863_v8, 0.0 }
 0x482   : > { %17917 = vrot.lane.b32.xlu0 %v38272_v45, %s36019_s24 }
 0x483   : > { %17915 = vrot.lane.b32.xlu1 %v38274_v37, %s36019_s24 }
 0x486   : > { %17874 = vrot.lane.b32.xlu0 %v38252_v13, %s36020_s25 }
 0x487   : > { %17919 = vrot.lane.b32.xlu1 %v38280_v16, %s36019_s24  ;;  %s224_s24 = scalar_lea.vmem %s39974_s5, %s35134_s30 }
 0x48a   : > { %17878 = vrot.lane.b32.xlu0 %v38268_v32, %s36020_s25 }
 0x48b   : > { %17876 = vrot.lane.b32.xlu1 %v38254_v1, %s36020_s25 }
 0x48e   : > { %17888 = vrot.lane.b32.xlu0 %v38264_v29, %s36020_s25 }
 0x48f   : > { %17880 = vrot.lane.b32.xlu1 %v38260_v59, %s36020_s25 }
 0x492   : > { %17884 = vrot.lane.b32.xlu0 %v38272_v45, %s36020_s25 }
 0x493   : > { %17882 = vrot.lane.b32.xlu1 %v38274_v37, %s36020_s25 }
 0x496   : > { %21668 = vrot.lane.b32.xlu0 %v38252_v13, %s36021_s26 }
 0x497   : > { %17886 = vrot.lane.b32.xlu1 %v38280_v16, %s36020_s25 }
 0x49a   : > { %21672 = vrot.lane.b32.xlu0 %v38268_v32, %s36021_s26 }
 0x49b   : > { %21670 = vrot.lane.b32.xlu1 %v38254_v1, %s36021_s26 }
 0x49e   : > { %21682 = vrot.lane.b32.xlu0 %v38264_v29, %s36021_s26 }
 0x49f   : > { %21674 = vrot.lane.b32.xlu1 %v38260_v59, %s36021_s26 }
 0x4a2   : > { %21678 = vrot.lane.b32.xlu0 %v38272_v45, %s36021_s26 }
 0x4a3   : > { %21676 = vrot.lane.b32.xlu1 %v38274_v37, %s36021_s26 }
 0x4a6   : > { %23573 = vrot.lane.b32.xlu0 %v38252_v13, %s36022_s27 }
 0x4a7   : > { %21680 = vrot.lane.b32.xlu1 %v38280_v16, %s36021_s26 }
 0x4aa   : > { %23577 = vrot.lane.b32.xlu0 %v38268_v32, %s36022_s27 }
 0x4ab   : > { %23575 = vrot.lane.b32.xlu1 %v38254_v1, %s36022_s27 }
 0x4ae   : > { %23587 = vrot.lane.b32.xlu0 %v38264_v29, %s36022_s27 }
 0x4af   : > { %23579 = vrot.lane.b32.xlu1 %v38260_v59, %s36022_s27 }
 0x4b2   : > { %23583 = vrot.lane.b32.xlu0 %v38272_v45, %s36022_s27 }
 0x4b3   : > { %23581 = vrot.lane.b32.xlu1 %v38274_v37, %s36022_s27 }
 0x4b6   : > { %27353 = vrot.lane.b32.xlu0 %v38254_v1, %s36023_s9 }
 0x4b7   : > { %23585 = vrot.lane.b32.xlu1 %v38280_v16, %s36022_s27 }
 0x4ba   : > { %27357 = vrot.lane.b32.xlu0 %v38260_v59, %s36023_s9 }
 0x4bb   : > { %27355 = vrot.lane.b32.xlu1 %v38268_v32, %s36023_s9 }
 0x4be   : > { %27351 = vrot.lane.b32.xlu0 %v38252_v13, %s36023_s9 }
 0x4bf   : > { %27359 = vrot.lane.b32.xlu1 %v38274_v37, %s36023_s9 }
 0x4c2   : > { %27363 = vrot.lane.b32.xlu0 %v38280_v16, %s36023_s9 }
 0x4c3   : > { %27361 = vrot.lane.b32.xlu1 %v38272_v45, %s36023_s9 }
 0x4c6   : > { %29258 = vrot.lane.b32.xlu0 %v38254_v1, %s36024_s10 }
 0x4c7   : > { %v17908_v23 = vpop.permute.xlu1 %17907  ;;  %27365 = vrot.lane.b32.xlu1 %v38264_v29, %s36023_s9 }
 0x4c8   : > { %v17910_v51 = vpop.permute.xlu0 %17909 }
 0x4c9   : > { %v17929_v41 = vsel %vm436_vm1, %v17908_v23, %v17910_v51 }
 0x4ca   : > { %v38352_v44 = vand.u32 4294901760, %v17929_v41  ;;  %29262 = vrot.lane.b32.xlu0 %v38260_v59, %s36024_s10 }
 0x4cb   : > { %29260 = vrot.lane.b32.xlu1 %v38268_v32, %s36024_s10 }
 0x4cc   : > { %17946 = vmatprep.subr.mxu0 %v38352_v44  ;;  %v38393_v19 = vsub.f32 %v17929_v41, %v38352_v44  ;;  %v17914_v40 = vpop.permute.xlu0 %17913 }
 0x4ce   : > { %29256 = vrot.lane.b32.xlu0 %v38252_v13, %s36024_s10  ;;  %v18025_v36 = vand.u32 4294901760, %v38393_v19 }
 0x4cf   : > { %29264 = vrot.lane.b32.xlu1 %v38274_v37, %s36024_s10 }
 0x4d0   : > { %v18026_v35 = vsub.f32 %v38393_v19, %v18025_v36 }
 0x4d2   : > { %29268 = vrot.lane.b32.xlu0 %v38280_v16, %s36024_s10  ;;  %v18027_v49 = vand.u32 4294901760, %v18026_v35 }
 0x4d3   : > { %29266 = vrot.lane.b32.xlu1 %v38272_v45, %s36024_s10 }
 0x4d6   : > { %31163 = vrot.lane.b32.xlu0 %v38254_v1, %s36025_s15 }
 0x4d7   : > { %29270 = vrot.lane.b32.xlu1 %v38264_v29, %s36024_s10 }
 0x4da   : > { %31167 = vrot.lane.b32.xlu0 %v38260_v59, %s36025_s15 }
 0x4db   : > { %31165 = vrot.lane.b32.xlu1 %v38268_v32, %s36025_s15 }
 0x4de   : > { %31161 = vrot.lane.b32.xlu0 %v38252_v13, %s36025_s15 }
 0x4df   : > { %31169 = vrot.lane.b32.xlu1 %v38274_v37, %s36025_s15 }
 0x4e2   : > { %31171 = vrot.lane.b32.xlu0 %v38272_v45, %s36025_s15 }
 0x4e3   : > { %31175 = vrot.lane.b32.xlu1 %v38264_v29, %s36025_s15 }
 0x4e6   : > { %33068 = vrot.lane.b32.xlu0 %v38254_v1, %s36026_s16 }
 0x4e7   : > { %31173 = vrot.lane.b32.xlu1 %v38280_v16, %s36025_s15 }
 0x4ea   : > { %33072 = vrot.lane.b32.xlu0 %v38260_v59, %s36026_s16 }
 0x4eb   : > { %33070 = vrot.lane.b32.xlu1 %v38268_v32, %s36026_s16 }
 0x4ed   : > { %v38409_v30 = vpop.permute.xlu1 %17921 }
 0x4ee   : > { %v17930_v6 = vsel %vm436_vm1, %v38409_v30, %v17908_v23  ;;  %33066 = vrot.lane.b32.xlu0 %v38252_v13, %s36026_s16 }
 0x4ef   : > { %v17931_v3 = vmul.f32 %v36214_v33, %v17930_v6  ;;  %33074 = vrot.lane.b32.xlu1 %v38274_v37, %s36026_s16 }
 0x4f1   : > { %v38422_v62 = vand.u32 4294901760, %v17931_v3  ;;  %v17912_v26 = vpop.permute.xlu1 %17911 }
 0x4f2   : > { %v17927_v17 = vsel %vm436_vm1, %v17912_v26, %v17914_v40  ;;  %v17928_v31 = vsel %vm436_vm1, %v17910_v51, %v17912_v26  ;;  %33078 = vrot.lane.b32.xlu0 %v38280_v16, %s36026_s16 }
 0x4f3   : > { %v18030_v33 = vsub.f32 %v17931_v3, %v38422_v62  ;;  %v38431_v24 = vand.u32 4294901760, %v17927_v17  ;;  %v38433_v53 = vand.u32 4294901760, %v17928_v31  ;;  %17948 = vmatpush1.msra.mxu0 %v38422_v62  ;;  %33076 = vrot.lane.b32.xlu1 %v38272_v45, %s36026_s16 }
 0x4f4   : > { %18017 = vmatmul.mubr.f32.vlgmr.msra.gmra.mrb[4].mxu0 %v38420_v11  ;;  %18028 = vmatprep.subr.mxu0 %v18027_v49 }
 0x4f5   : > { %v18031_v21 = vand.u32 4294901760, %v18030_v33  ;;  %v18489_v50 = vsub.f32 %v17927_v17, %v38431_v24  ;;  %v18495_v27 = vsub.f32 %v17928_v31, %v38433_v53  ;;  %18411 = vmatprep.subr.mxu1 %v38431_v24  ;;  %18097 = vmatprep.mubr.f32.mxu0 %v36018_v0  ;;  %v17916_v57 = vpop.permute.xlu1 %17915 }
 0x4f6   : > { %18413 = vmatpush1.msra.mxu1 %v38433_v53  ;;  %34974 = vperm.xlu0 %36001, %v34971_v47   ;;  %v17926_v3 = vsel %vm436_vm1, %v17914_v40, %v17916_v57 }
 0x4f7   : > { %v18496_v61 = vand.u32 4294901760, %v18495_v27  ;;  %18482 = vmatmul.mubr.f32.vlgmr.msra.gmra.mrb[4].mxu1 %v38420_v11  ;;  %33080 = vrot.lane.b32.xlu1 %v38264_v29, %s36026_s16  ;;  %v18032_v8 = vsub.f32 %v18030_v33, %v18031_v21  ;;  %v18490_v63 = vand.u32 4294901760, %v18489_v50  ;;  %v38476_v17 = vand.u32 4294901760, %v17926_v3 }
 0x4f8   : > { %18562 = vmatprep.mubr.f32.mxu1 %v36018_v0 }
 0x4f9   : > { %v18497_v23 = vsub.f32 %v18495_v27, %v18496_v61  ;;  %v18033_v51 = vand.u32 4294901760, %v18032_v8  ;;  %v18491_v41 = vsub.f32 %v18489_v50, %v18490_v63  ;;  %v17920_v35 = vpop.permute.xlu1 %17919 }
 0x4fb   : > { %18034 = vmatpush1.msra.mxu0 %v18033_v51  ;;  %v18498_v28 = vand.u32 4294901760, %v18497_v23  ;;  %v18492_v7 = vand.u32 4294901760, %v18491_v41 }
 0x4fc   : > { %18099 = vmatmul.mubr.f32.vlgmr.msra.gmra.mrb[4].mxu0 %v38383_v4  ;;  %18107 = vmatprep.subr.mxu0 %v38393_v19  ;;  %v17918_v19 = vpop.permute.xlu0 %17917 }
 0x4fd   : > { %18110 = vmatpush1.msra.mxu0 %v18030_v33  ;;  %18173 = vmatprep.mubr.f32.mxu0 %v36018_v0  ;;  %v17925_v6 = vsel %vm436_vm1, %v17916_v57, %v17918_v19  ;;  %v17924_v40 = vsel %vm436_vm1, %v17918_v19, %v17920_v35  ;;  %v17877_v57 = vpop.permute.xlu1 %17876 }
 0x4fe   : > { %18493 = vmatprep.subr.mxu1 %v18492_v7  ;;  %18183 = vmatprep.subr.mxu0 %v38352_v44  ;;  %v38468_v26 = vand.u32 4294901760, %v17925_v6 }
 0x4ff   : > { %18499 = vmatpush1.msra.mxu1 %v18498_v28 }
 0x500   : > { %18564 = vmatmul.mubr.f32.vlgmr.msra.gmra.mrb[4].mxu1 %v38383_v4  ;;  %18572 = vmatprep.subr.mxu1 %v18489_v50  ;;  %v38479_v31 = vsub.f32 %v17925_v6, %v38468_v26  ;;  %v17875_v28 = vpop.permute.xlu0 %17874 }
 0x501   : > { %18575 = vmatpush1.msra.mxu1 %v18495_v27  ;;  %18638 = vmatprep.mubr.f32.mxu1 %v36018_v0  ;;  %v38546_v6 = vpop.permute.xlu1 %17880 }
 0x502   : > { %18648 = vmatprep.subr.mxu1 %v38431_v24  ;;  %v18955_v47 = vand.u32 4294901760, %v38479_v31 }
 0x504   : > { %18176 = vmatmul.mubr.f32.vlgmr.msra.gmra.mrb[4].mxu0 %v38390_v10  ;;  %v18956_v50 = vsub.f32 %v38479_v31, %v18955_v47  ;;  %v17879_v7 = vpop.permute.xlu0 %17878 }
 0x505   : > { %18185 = vmatpush1.msra.mxu0 %v38422_v62  ;;  %18248 = vmatprep.mubr.f32.mxu0 %v36018_v0 }
 0x506   : > { %18261 = vmatprep.subr.mxu0 %v18025_v36  ;;  %v17923_v36 = vsel %vm436_vm1, %v17920_v35, %v38409_v30  ;;  %v38489_v30 = vsub.f32 %v17926_v3, %v38476_v17  ;;  %v18957_v8 = vand.u32 4294901760, %v18956_v50  ;;  %v17906_v35 = vld [vmem:[%s39972_s3] sm:$0xff] }
 0x507   : > { %v38483_v49 = vand.u32 4294901760, %v17923_v36 }
 0x508   : > { %18641 = vmatmul.mubr.f32.vlgmr.msra.gmra.mrb[4].mxu1 %v38390_v10  ;;  %v38542_v19 = vpop.permute.xlu0 %17888 }
 0x509   : > { %18650 = vmatpush1.msra.mxu1 %v38433_v53  ;;  %18713 = vmatprep.mubr.f32.mxu1 %v36018_v0  ;;  %v38494_v33 = vsub.f32 %v17923_v36, %v38483_v49  ;;  %v17897_v36 = vsel %vm266_vm4, %v38542_v19, %v17875_v28 }
 0x50a   : > { %18726 = vmatprep.subr.mxu1 %v18490_v63 }
 0x50b   : > { %v19420_v27 = vand.u32 4294901760, %v38494_v33 }
 0x50c   : > { %18252 = vmatmul.mubr.f32.vlgmr.msra.gmra.mrb[4].mxu0 %v38400_v20 }
 0x50d   : > { %18265 = vmatpush1.msra.mxu0 %v18031_v21  ;;  %18328 = vmatprep.mubr.f32.mxu0 %v36018_v0  ;;  %v19421_v63 = vsub.f32 %v38494_v33, %v19420_v27 }
 0x50e   : > { %18337 = vmatprep.subr.mxu0 %v38352_v44  ;;  %v38491_v44 = vand.u32 4294901760, %v17924_v40 }
 0x50f   : > { %v19422_v51 = vand.u32 4294901760, %v19421_v63 }
 0x510   : > { %18717 = vmatmul.mubr.f32.vlgmr.msra.gmra.mrb[4].mxu1 %v38400_v20  ;;  %v38503_v21 = vsub.f32 %v17924_v40, %v38491_v44  ;;  %v19806_v40 = vsel %vm17941_vm2, %v17906_v35, 0 }
 0x511   : > { %18730 = vmatpush1.msra.mxu1 %v18496_v61  ;;  %18793 = vmatprep.mubr.f32.mxu1 %v36018_v0 }
 0x512   : > { %18802 = vmatprep.subr.mxu1 %v38431_v24  ;;  %v18961_v24 = vand.u32 4294901760, %v38489_v30  ;;  %v19426_v61 = vand.u32 4294901760, %v38503_v21 }
 0x514   : > { %18330 = vmatmul.mubr.f32.vlgmr.msra.gmra.mrb[4].mxu0 %v38383_v4 }
 0x515   : > { %18339 = vmatpush1.msra.mxu0 %v38422_v62  ;;  %18402 = vmatprep.mubr.f32.mxu0 %v36018_v0  ;;  %v18962_v62 = vsub.f32 %v38489_v30, %v18961_v24 }
 0x516   : > { %18876 = vmatprep.subr.mxu0 %v38468_v26 }
 0x517   : > { %v18963_v23 = vand.u32 4294901760, %v18962_v62  ;;  %v38569_v62 = vand.u32 4294901760, %v19806_v40 }
 0x518   : > { %18795 = vmatmul.mubr.f32.vlgmr.msra.gmra.mrb[4].mxu1 %v38383_v4 }
 0x519   : > { %18804 = vmatpush1.msra.mxu1 %v38433_v53  ;;  %18867 = vmatprep.mubr.f32.mxu1 %v36018_v0  ;;  %v19427_v53 = vsub.f32 %v38503_v21, %v19426_v61 }
 0x51a   : > { %19341 = vmatprep.subr.mxu1 %v38483_v49 }
 0x51b   : > { %v19428_v41 = vand.u32 4294901760, %v19427_v53  ;;  %v38585_v53 = vsub.f32 %v19806_v40, %v38569_v62 }
 0x51c   : > { %18404 = vmatmul.mubr.f32.vlgmr.msra.gmra.mrb[4].mxu0 %v38383_v4 }
 0x51d   : > { %18878 = vmatpush1.msra.mxu0 %v38476_v17  ;;  %18941 = vmatprep.mubr.f32.mxu0 %v36018_v0 }
 0x51e   : > { %18958 = vmatprep.subr.mxu0 %v18957_v8 }
 0x520   : > { %18869 = vmatmul.mubr.f32.vlgmr.msra.gmra.mrb[4].mxu1 %v38383_v4  ;;  %18947 = vmatmul.mubr.f32.vlgmr.msra.gmra.mrb[6].mxu0 %v38420_v11 }
 0x521   : > { %19343 = vmatpush1.msra.mxu1 %v38491_v44  ;;  %18964 = vmatpush1.msra.mxu0 %v18963_v23  ;;  %v38602_v23 = vand.u32 4294901760, %v38585_v53 }
 0x522   : > { %19423 = vmatprep.subr.mxu1 %v19422_v51  ;;  %19037 = vmatprep.subr.mxu0 %v38479_v31  ;;  %v17894_v31 = vsel %vm266_vm4, %v17879_v7, %v38546_v6 }
 0x523   : > { %19406 = vmatprep.mubr.f32.mxu1 %v36018_v0  ;;  %19027 = vmatprep.mubr.f32.mxu0 %v36018_v0  ;;  %v19878_v51 = vsub.f32 %v38585_v53, %v38602_v23 }
 0x524   : > { %19412 = vmatmul.mubr.f32.vlgmr.msra.gmra.mrb[6].mxu1 %v38420_v11  ;;  %v17896_v11 = vsel %vm266_vm4, %v17875_v28, %v17877_v57 }
 0x525   : > { %19429 = vmatpush1.msra.mxu1 %v19428_v41  ;;  %19492 = vmatprep.mubr.f32.mxu1 %v36018_v0  ;;  %v17899_v3 = vmul.f32 %v36385_v55, %v17896_v11 }
 0x526   : > { %19502 = vmatprep.subr.mxu1 %v38494_v33  ;;  %v17898_v33 = vmul.f32 %v36393_v60, %v17897_v36 }
 0x527   : > { %v38565_v50 = vand.u32 4294901760, %v17899_v3 }
 0x528   : > { %19029 = vmatmul.mubr.f32.vlgmr.msra.gmra.mrb[6].mxu0 %v38383_v4 }
 0x529   : > { %19040 = vmatpush1.msra.mxu0 %v38489_v30  ;;  %19103 = vmatprep.mubr.f32.mxu0 %v36018_v0  ;;  %v38579_v8 = vsub.f32 %v17899_v3, %v38565_v50 }
 0x52a   : > { %19113 = vmatprep.subr.mxu0 %v38468_v26 }
 0x52c   : > { %19494 = vmatmul.mubr.f32.vlgmr.msra.gmra.mrb[6].mxu1 %v38383_v4 }
 0x52d   : > { %19505 = vmatpush1.msra.mxu1 %v38503_v21  ;;  %19568 = vmatprep.mubr.f32.mxu1 %v36018_v0 }
 0x52e   : > { %19578 = vmatprep.subr.mxu1 %v38483_v49 }
 0x530   : > { %19106 = vmatmul.mubr.f32.vlgmr.msra.gmra.mrb[6].mxu0 %v38390_v10 }
 0x531   : > { %19115 = vmatpush1.msra.mxu0 %v38476_v17  ;;  %19178 = vmatprep.mubr.f32.mxu0 %v36018_v0 }
 0x532   : > { %19191 = vmatprep.subr.mxu0 %v18955_v47  ;;  %v17895_v47 = vsel %vm266_vm4, %v17877_v57, %v17879_v7  ;;  %v38622_v57 = vand.u32 4294901760, %v19878_v51 }
 0x533   : > { %v17900_v60 = vmul.f32 %v36355_v48, %v17895_v47 }
 0x534   : > { %19571 = vmatmul.mubr.f32.vlgmr.msra.gmra.mrb[6].mxu1 %v38390_v10  ;;  %v17901_v10 = vmul.f32 %v36343_v43, %v17894_v31  ;;  %v17885_v31 = vpop.permute.xlu0 %17884 }
 0x535   : > { %19580 = vmatpush1.msra.mxu1 %v38491_v44  ;;  %19643 = vmatprep.mubr.f32.mxu1 %v36018_v0 }
 0x536   : > { %19656 = vmatprep.subr.mxu1 %v19420_v27  ;;  %v38576_v27 = vand.u32 4294901760, %v17898_v33  ;;  %v38581_v63 = vand.u32 4294901760, %v17901_v10 }
 0x538   : > { %19182 = vmatmul.mubr.f32.vlgmr.msra.gmra.mrb[6].mxu0 %v38400_v20  ;;  %v38594_v30 = vsub.f32 %v17898_v33, %v38576_v27 }
 0x539   : > { %19195 = vmatpush1.msra.mxu0 %v18961_v24  ;;  %19258 = vmatprep.mubr.f32.mxu0 %v36018_v0  ;;  %v38597_v24 = vsub.f32 %v17901_v10, %v38581_v63 }
 0x53a   : > { %19267 = vmatprep.subr.mxu0 %v38468_v26  ;;  %v38591_v26 = vand.u32 4294901760, %v17900_v60  ;;  %v19894_v21 = vand.u32 4294901760, %v38594_v30 }
 0x53b   : > { %v20353_v41 = vand.u32 4294901760, %v38597_v24 }
 0x53c   : > { %19647 = vmatmul.mubr.f32.vlgmr.msra.gmra.mrb[6].mxu1 %v38400_v20  ;;  %v19888_v20 = vand.u32 4294901760, %v38579_v8  ;;  %v19895_v28 = vsub.f32 %v38594_v30, %v19894_v21 }
 0x53d   : > { %19660 = vmatpush1.msra.mxu1 %v19426_v61  ;;  %19723 = vmatprep.mubr.f32.mxu1 %v36018_v0  ;;  %v20354_v11 = vsub.f32 %v38597_v24, %v20353_v41 }
 0x53e   : > { %19732 = vmatprep.subr.mxu1 %v38483_v49  ;;  %v38608_v49 = vsub.f32 %v17900_v60, %v38591_v26  ;;  %v19889_v61 = vsub.f32 %v38579_v8, %v19888_v20 }
 0x53f   : > { %v20355_v3 = vand.u32 4294901760, %v20354_v11 }
 0x540   : > { %19260 = vmatmul.mubr.f32.vlgmr.msra.gmra.mrb[6].mxu0 %v38383_v4  ;;  %v19890_v7 = vand.u32 4294901760, %v19889_v61 }
 0x541   : > { %19269 = vmatpush1.msra.mxu0 %v38476_v17  ;;  %19332 = vmatprep.mubr.f32.mxu0 %v36018_v0  ;;  %v20359_v17 = vand.u32 4294901760, %v38608_v49 }
 0x542   : > { %19809 = vmatprep.subr.mxu0 %v38565_v50 }
 0x543   : > { %v20360_v35 = vsub.f32 %v38608_v49, %v20359_v17 }
 0x544   : > { %19725 = vmatmul.mubr.f32.vlgmr.msra.gmra.mrb[6].mxu1 %v38383_v4 }
 0x545   : > { %19734 = vmatpush1.msra.mxu1 %v38491_v44  ;;  %19797 = vmatprep.mubr.f32.mxu1 %v36018_v0  ;;  %v19896_v44 = vand.u32 4294901760, %v19895_v28  ;;  %v20361_v36 = vand.u32 4294901760, %v20360_v35 }
 0x546   : > { %20274 = vmatprep.subr.mxu1 %v38581_v63 }
 0x548   : > { %19334 = vmatmul.mubr.f32.vlgmr.msra.gmra.mrb[6].mxu0 %v38383_v4 }
 0x549   : > { %19811 = vmatpush1.msra.mxu0 %v38576_v27  ;;  %19874 = vmatprep.mubr.f32.mxu0 %v36018_v0 }
 0x54a   : > { %19891 = vmatprep.subr.mxu0 %v19890_v7 }
 0x54c   : > { %19799 = vmatmul.mubr.f32.vlgmr.msra.gmra.mrb[6].mxu1 %v38383_v4  ;;  %19880 = vmatmul.mubr.f32.vlgmr.msra.gmra.mrb[4].mxu0 %v38622_v57  ;;  %v17883_v4 = vpop.permute.xlu1 %17882 }
 0x54d   : > { %20276 = vmatpush1.msra.mxu1 %v38591_v26  ;;  %19897 = vmatpush1.msra.mxu0 %v19896_v44  ;;  %v17892_v40 = vsel %vm266_vm4, %v17883_v4, %v17885_v31  ;;  %v17893_v47 = vsel %vm266_vm4, %v38546_v6, %v17883_v4 }
 0x54e   : > { %20356 = vmatprep.subr.mxu1 %v20355_v3  ;;  %19970 = vmatprep.subr.mxu0 %v38579_v8  ;;  %v17903_v10 = vmul.f32 %v36545_v34, %v17892_v40  ;;  %v17902_v8 = vmul.f32 %v36556_v22, %v17893_v47 }
 0x54f   : > { %20339 = vmatprep.mubr.f32.mxu1 %v36018_v0  ;;  %19960 = vmatprep.mubr.f32.mxu0 %v36018_v0 }
 0x550   : > { %20345 = vmatmul.mubr.f32.vlgmr.msra.gmra.mrb[4].mxu1 %v38622_v57  ;;  %v17887_v33 = vpop.permute.xlu1 %17886 }
 0x551   : > { %20362 = vmatpush1.msra.mxu1 %v20361_v36  ;;  %20425 = vmatprep.mubr.f32.mxu1 %v36018_v0  ;;  %v17890_v60 = vsel %vm266_vm4, %v17887_v33, %v38542_v19  ;;  %v17891_v6 = vsel %vm266_vm4, %v17885_v31, %v17887_v33  ;;  %v38669_v19 = vand.u32 4294901760, %v17902_v8  ;;  %v21669_v31 = vpop.permute.xlu0 %21668 }
 0x552   : > { %20435 = vmatprep.subr.mxu1 %v38597_v24  ;;  %v17905_v24 = vmul.f32 %v36517_v12, %v17890_v60  ;;  %v35124_v60 = vld [vmem:[%s39972_s3 + $0x10] sm:$0xff] }
 0x554   : > { %19962 = vmatmul.mubr.f32.vlgmr.msra.gmra.mrb[4].mxu0 %v38569_v62  ;;  %v38675_v61 = vand.u32 4294901760, %v17905_v24  ;;  %v21671_v33 = vpop.permute.xlu1 %21670 }
 0x555   : > { %19973 = vmatpush1.msra.mxu0 %v38594_v30  ;;  %20036 = vmatprep.mubr.f32.mxu0 %v36018_v0  ;;  %v38661_v30 = vand.u32 4294901760, %v17903_v10  ;;  %v21673_v40 = vpop.permute.xlu0 %21672 }
 0x556   : > { %20046 = vmatprep.subr.mxu0 %v38565_v50  ;;  %v38686_v51 = vsub.f32 %v17905_v24, %v38675_v61 }
 0x558   : > { %20427 = vmatmul.mubr.f32.vlgmr.msra.gmra.mrb[4].mxu1 %v38569_v62  ;;  %v21283_v7 = vand.u32 4294901760, %v38686_v51 }
 0x559   : > { %20438 = vmatpush1.msra.mxu1 %v38608_v49  ;;  %20501 = vmatprep.mubr.f32.mxu1 %v36018_v0  ;;  %v38673_v49 = vsub.f32 %v17903_v10, %v38661_v30  ;;  %v38734_v47 = vpop.permute.xlu0 %21682  ;;  %v38738_v10 = vpop.permute.xlu1 %21674 }
 0x55a   : > { %20511 = vmatprep.subr.mxu1 %v38581_v63  ;;  %v21284_v35 = vsub.f32 %v38686_v51, %v21283_v7  ;;  %v21688_v24 = vsel %vm4263_vm14, %v21673_v40, %v38738_v10 }
 0x55c   : > { %20039 = vmatmul.mubr.f32.vlgmr.msra.gmra.mrb[4].mxu0 %v38585_v53  ;;  %v21285_v36 = vand.u32 4294901760, %v21284_v35 }
 0x55d   : > { %20048 = vmatpush1.msra.mxu0 %v38576_v27  ;;  %20111 = vmatprep.mubr.f32.mxu0 %v36018_v0 }
 0x55e   : > { %20124 = vmatprep.subr.mxu0 %v19888_v20  ;;  %v17904_v20 = vmul.f32 %v36535_v58, %v17891_v6  ;;  %v21691_v6 = vsel %vm4263_vm14, %v38734_v47, %v21669_v31 }
 0x560   : > { %20504 = vmatmul.mubr.f32.vlgmr.msra.gmra.mrb[4].mxu1 %v38585_v53 }
 0x561   : > { %20513 = vmatpush1.msra.mxu1 %v38591_v26  ;;  %20576 = vmatprep.mubr.f32.mxu1 %v36018_v0 }
 0x562   : > { %20589 = vmatprep.subr.mxu1 %v20353_v41  ;;  %v20818_v41 = vand.u32 4294901760, %v38673_v49 }
 0x564   : > { %20115 = vmatmul.mubr.f32.vlgmr.msra.gmra.mrb[4].mxu0 %v38602_v23  ;;  %v20819_v28 = vsub.f32 %v38673_v49, %v20818_v41 }
 0x565   : > { %20128 = vmatpush1.msra.mxu0 %v19894_v21  ;;  %20191 = vmatprep.mubr.f32.mxu0 %v36018_v0  ;;  %v38681_v21 = vsub.f32 %v17902_v8, %v38669_v19 }
 0x566   : > { %20200 = vmatprep.subr.mxu0 %v38565_v50  ;;  %v38683_v50 = vand.u32 4294901760, %v17904_v20  ;;  %v20820_v44 = vand.u32 4294901760, %v20819_v28 }
 0x568   : > { %20580 = vmatmul.mubr.f32.vlgmr.msra.gmra.mrb[4].mxu1 %v38602_v23 }
 0x569   : > { %20593 = vmatpush1.msra.mxu1 %v20359_v17  ;;  %20656 = vmatprep.mubr.f32.mxu1 %v36018_v0  ;;  %v38695_v17 = vsub.f32 %v17904_v20, %v38683_v50  ;;  %v21703_v20 = vsel %vm17941_vm2, %v35124_v60, 0 }
 0x56a   : > { %20665 = vmatprep.subr.mxu1 %v38581_v63  ;;  %v20824_v63 = vand.u32 4294901760, %v38681_v21  ;;  %v38761_v28 = vand.u32 4294901760, %v21703_v20 }
 0x56c   : > { %20193 = vmatmul.mubr.f32.vlgmr.msra.gmra.mrb[4].mxu0 %v38569_v62  ;;  %v20825_v11 = vsub.f32 %v38681_v21, %v20824_v63  ;;  %v38777_v35 = vsub.f32 %v21703_v20, %v38761_v28 }
 0x56d   : > { %20202 = vmatpush1.msra.mxu0 %v38576_v27  ;;  %20265 = vmatprep.mubr.f32.mxu0 %v36018_v0  ;;  %v21289_v27 = vand.u32 4294901760, %v38695_v17 }
 0x56e   : > { %20739 = vmatprep.subr.mxu0 %v38661_v30 }
 0x56f   : > { %v21290_v3 = vsub.f32 %v38695_v17, %v21289_v27 }
 0x570   : > { %20658 = vmatmul.mubr.f32.vlgmr.msra.gmra.mrb[4].mxu1 %v38569_v62 }
 0x571   : > { %20667 = vmatpush1.msra.mxu1 %v38591_v26  ;;  %20730 = vmatprep.mubr.f32.mxu1 %v36018_v0  ;;  %v20826_v26 = vand.u32 4294901760, %v20825_v11  ;;  %v21291_v4 = vand.u32 4294901760, %v21290_v3 }
 0x572   : > { %21204 = vmatprep.subr.mxu1 %v38675_v61 }
 0x574   : > { %20267 = vmatmul.mubr.f32.vlgmr.msra.gmra.mrb[4].mxu0 %v38569_v62 }
 0x575   : > { %20741 = vmatpush1.msra.mxu0 %v38669_v19  ;;  %20804 = vmatprep.mubr.f32.mxu0 %v36018_v0 }
 0x576   : > { %20821 = vmatprep.subr.mxu0 %v20820_v44 }
 0x578   : > { %20732 = vmatmul.mubr.f32.vlgmr.msra.gmra.mrb[4].mxu1 %v38569_v62  ;;  %20810 = vmatmul.mubr.f32.vlgmr.msra.gmra.mrb[6].mxu0 %v38622_v57 }
 0x579   : > { %21206 = vmatpush1.msra.mxu1 %v38683_v50  ;;  %20827 = vmatpush1.msra.mxu0 %v20826_v26  ;;  %v38794_v26 = vand.u32 4294901760, %v38777_v35 }
 0x57a   : > { %21286 = vmatprep.subr.mxu1 %v21285_v36  ;;  %20900 = vmatprep.subr.mxu0 %v38673_v49  ;;  %v21692_v49 = vmul.f32 %v36698_v25, %v21691_v6  ;;  %v21679_v6 = vpop.permute.xlu0 %21678 }
 0x57b   : > { %21269 = vmatprep.mubr.f32.mxu1 %v36018_v0  ;;  %20890 = vmatprep.mubr.f32.mxu0 %v36018_v0  ;;  %v21775_v3 = vsub.f32 %v38777_v35, %v38794_v26 }
 0x57c   : > { %21275 = vmatmul.mubr.f32.vlgmr.msra.gmra.mrb[6].mxu1 %v38622_v57  ;;  %v21690_v57 = vsel %vm4263_vm14, %v21669_v31, %v21671_v33 }
 0x57d   : > { %21292 = vmatpush1.msra.mxu1 %v21291_v4  ;;  %21355 = vmatprep.mubr.f32.mxu1 %v36018_v0  ;;  %v21693_v8 = vmul.f32 %v36683_v46, %v21690_v57 }
 0x57e   : > { %21365 = vmatprep.subr.mxu1 %v38686_v51  ;;  %v21689_v51 = vsel %vm4263_vm14, %v21671_v33, %v21673_v40  ;;  %v38814_v40 = vand.u32 4294901760, %v21775_v3 }
 0x57f   : > { %v21694_v25 = vmul.f32 %v36670_v38, %v21689_v51 }
 0x580   : > { %20892 = vmatmul.mubr.f32.vlgmr.msra.gmra.mrb[6].mxu0 %v38569_v62 }
 0x581   : > { %20903 = vmatpush1.msra.mxu0 %v38681_v21  ;;  %20966 = vmatprep.mubr.f32.mxu0 %v36018_v0 }
 0x582   : > { %20976 = vmatprep.subr.mxu0 %v38661_v30 }
 0x584   : > { %21357 = vmatmul.mubr.f32.vlgmr.msra.gmra.mrb[6].mxu1 %v38569_v62 }
 0x585   : > { %21368 = vmatpush1.msra.mxu1 %v38695_v17  ;;  %21431 = vmatprep.mubr.f32.mxu1 %v36018_v0 }
 0x586   : > { %21441 = vmatprep.subr.mxu1 %v38675_v61 }
 0x588   : > { %20969 = vmatmul.mubr.f32.vlgmr.msra.gmra.mrb[6].mxu0 %v38585_v53 }
 0x589   : > { %20978 = vmatpush1.msra.mxu0 %v38669_v19  ;;  %21041 = vmatprep.mubr.f32.mxu0 %v36018_v0 }
 0x58a   : > { %21054 = vmatprep.subr.mxu0 %v20818_v41  ;;  %v38757_v41 = vand.u32 4294901760, %v21693_v8 }
 0x58c   : > { %21434 = vmatmul.mubr.f32.vlgmr.msra.gmra.mrb[6].mxu1 %v38585_v53  ;;  %v21695_v53 = vmul.f32 %v36647_v56, %v21688_v24  ;;  %v38771_v11 = vsub.f32 %v21693_v8, %v38757_v41 }
 0x58d   : > { %21443 = vmatpush1.msra.mxu1 %v38683_v50  ;;  %21506 = vmatprep.mubr.f32.mxu1 %v36018_v0 }
 0x58e   : > { %21519 = vmatprep.subr.mxu1 %v21283_v7  ;;  %v38768_v7 = vand.u32 4294901760, %v21692_v49  ;;  %v38773_v44 = vand.u32 4294901760, %v21695_v53 }
 0x590   : > { %21045 = vmatmul.mubr.f32.vlgmr.msra.gmra.mrb[6].mxu0 %v38602_v23  ;;  %v38786_v21 = vsub.f32 %v21692_v49, %v38768_v7 }
 0x591   : > { %21058 = vmatpush1.msra.mxu0 %v20824_v63  ;;  %21121 = vmatprep.mubr.f32.mxu0 %v36018_v0  ;;  %v38789_v63 = vsub.f32 %v21695_v53, %v38773_v44 }
 0x592   : > { %21130 = vmatprep.subr.mxu0 %v38661_v30  ;;  %v38783_v30 = vand.u32 4294901760, %v21694_v25  ;;  %v21791_v17 = vand.u32 4294901760, %v38786_v21 }
 0x593   : > { %v22250_v36 = vand.u32 4294901760, %v38789_v63 }
 0x594   : > { %21510 = vmatmul.mubr.f32.vlgmr.msra.gmra.mrb[6].mxu1 %v38602_v23  ;;  %v21785_v23 = vand.u32 4294901760, %v38771_v11  ;;  %v21792_v4 = vsub.f32 %v38786_v21, %v21791_v17 }
 0x595   : > { %21523 = vmatpush1.msra.mxu1 %v21289_v27  ;;  %21586 = vmatprep.mubr.f32.mxu1 %v36018_v0  ;;  %v22251_v33 = vsub.f32 %v38789_v63, %v22250_v36 }
 0x596   : > { %21595 = vmatprep.subr.mxu1 %v38675_v61  ;;  %v38800_v61 = vsub.f32 %v21694_v25, %v38783_v30  ;;  %v21786_v27 = vsub.f32 %v38771_v11, %v21785_v23 }
 0x597   : > { %v22252_v60 = vand.u32 4294901760, %v22251_v33 }
 0x598   : > { %21123 = vmatmul.mubr.f32.vlgmr.msra.gmra.mrb[6].mxu0 %v38569_v62  ;;  %v21787_v31 = vand.u32 4294901760, %v21786_v27 }
 0x599   : > { %21132 = vmatpush1.msra.mxu0 %v38669_v19  ;;  %21195 = vmatprep.mubr.f32.mxu0 %v36018_v0  ;;  %v22256_v19 = vand.u32 4294901760, %v38800_v61 }
 0x59a   : > { %21706 = vmatprep.subr.mxu0 %v38757_v41 }
 0x59b   : > { %v22257_v57 = vsub.f32 %v38800_v61, %v22256_v19 }
 0x59c   : > { %21588 = vmatmul.mubr.f32.vlgmr.msra.gmra.mrb[6].mxu1 %v38569_v62 }
 0x59d   : > { %21597 = vmatpush1.msra.mxu1 %v38683_v50  ;;  %21660 = vmatprep.mubr.f32.mxu1 %v36018_v0  ;;  %v21793_v50 = vand.u32 4294901760, %v21792_v4  ;;  %v22258_v8 = vand.u32 4294901760, %v22257_v57 }
 0x59e   : > { %22171 = vmatprep.subr.mxu1 %v38773_v44 }
 0x5a0   : > { %21197 = vmatmul.mubr.f32.vlgmr.msra.gmra.mrb[6].mxu0 %v38569_v62 }
 0x5a1   : > { %21708 = vmatpush1.msra.mxu0 %v38768_v7  ;;  %21771 = vmatprep.mubr.f32.mxu0 %v36018_v0 }
 0x5a2   : > { %21788 = vmatprep.subr.mxu0 %v21787_v31 }
 0x5a4   : > { %21662 = vmatmul.mubr.f32.vlgmr.msra.gmra.mrb[6].mxu1 %v38569_v62  ;;  %21777 = vmatmul.mubr.f32.vlgmr.msra.gmra.mrb[4].mxu0 %v38814_v40  ;;  %v21677_v62 = vpop.permute.xlu1 %21676 }
 0x5a5   : > { %22173 = vmatpush1.msra.mxu1 %v38783_v30  ;;  %21794 = vmatpush1.msra.mxu0 %v21793_v50  ;;  %v21686_v24 = vsel %vm4263_vm14, %v21677_v62, %v21679_v6  ;;  %v21687_v49 = vsel %vm4263_vm14, %v38738_v10, %v21677_v62  ;;  %v23574_v62 = vpop.permute.xlu0 %23573 }
 0x5a6   : > { %22253 = vmatprep.subr.mxu1 %v22252_v60  ;;  %21867 = vmatprep.subr.mxu0 %v38771_v11  ;;  %v21697_v51 = vmul.f32 %v36855_v54, %v21686_v24  ;;  %v21696_v25 = vmul.f32 %v36878_v15, %v21687_v49 }
 0x5a7   : > { %22236 = vmatprep.mubr.f32.mxu1 %v36018_v0  ;;  %21857 = vmatprep.mubr.f32.mxu0 %v36018_v0 }
 0x5a8   : > { %22242 = vmatmul.mubr.f32.vlgmr.msra.gmra.mrb[4].mxu1 %v38814_v40  ;;  %v21681_v20 = vpop.permute.xlu1 %21680  ;;  %v38853_v11 = vand.u32 4294901760, %v21697_v51 }
 0x5a9   : > { %22259 = vmatpush1.msra.mxu1 %v22258_v8  ;;  %22322 = vmatprep.mubr.f32.mxu1 %v36018_v0  ;;  %v21684_v53 = vsel %vm4263_vm14, %v21681_v20, %v38734_v47  ;;  %v21685_v10 = vsel %vm4263_vm14, %v21679_v6, %v21681_v20  ;;  %v38861_v47 = vand.u32 4294901760, %v21696_v25  ;;  %v23578_v6 = vpop.permute.xlu0 %23577 }
 0x5aa   : > { %22332 = vmatprep.subr.mxu1 %v38789_v63  ;;  %v21698_v63 = vmul.f32 %v36845_v52, %v21685_v10 }
 0x5ac   : > { %21859 = vmatmul.mubr.f32.vlgmr.msra.gmra.mrb[4].mxu0 %v38761_v28  ;;  %v23576_v24 = vpop.permute.xlu1 %23575 }
 0x5ad   : > { %21870 = vmatpush1.msra.mxu0 %v38786_v21  ;;  %21933 = vmatprep.mubr.f32.mxu0 %v36018_v0  ;;  %v21699_v21 = vmul.f32 %v36823_v39, %v21684_v53  ;;  %v38926_v20 = vpop.permute.xlu0 %23587 }
 0x5ae   : > { %21943 = vmatprep.subr.mxu0 %v38757_v41 }
 0x5b0   : > { %22324 = vmatmul.mubr.f32.vlgmr.msra.gmra.mrb[4].mxu1 %v38761_v28  ;;  %v38930_v49 = vpop.permute.xlu1 %23579 }
 0x5b1   : > { %22335 = vmatpush1.msra.mxu1 %v38800_v61  ;;  %22398 = vmatprep.mubr.f32.mxu1 %v36018_v0  ;;  %v38867_v61 = vand.u32 4294901760, %v21699_v21  ;;  %v23593_v10 = vsel %vm6225_vm15, %v23578_v6, %v38930_v49 }
 0x5b2   : > { %22408 = vmatprep.subr.mxu1 %v38773_v44 }
 0x5b3   : > { %v38878_v27 = vsub.f32 %v21699_v21, %v38867_v61 }
 0x5b4   : > { %21936 = vmatmul.mubr.f32.vlgmr.msra.gmra.mrb[4].mxu0 %v38777_v35 }
 0x5b5   : > { %21945 = vmatpush1.msra.mxu0 %v38768_v7  ;;  %22008 = vmatprep.mubr.f32.mxu0 %v36018_v0  ;;  %v23180_v4 = vand.u32 4294901760, %v38878_v27 }
 0x5b6   : > { %22021 = vmatprep.subr.mxu0 %v21785_v23  ;;  %v38865_v23 = vsub.f32 %v21697_v51, %v38853_v11  ;;  %v35125_v51 = vld [vmem:[%s39972_s3 + $0x18] sm:$0xff] }
 0x5b7   : > { %v23181_v50 = vsub.f32 %v38878_v27, %v23180_v4  ;;  %v23608_v21 = vsel %vm17941_vm2, %v35125_v51, 0 }
 0x5b8   : > { %22401 = vmatmul.mubr.f32.vlgmr.msra.gmra.mrb[4].mxu1 %v38777_v35  ;;  %v22715_v3 = vand.u32 4294901760, %v38865_v23 }
 0x5b9   : > { %22410 = vmatpush1.msra.mxu1 %v38783_v30  ;;  %22473 = vmatprep.mubr.f32.mxu1 %v36018_v0  ;;  %v23182_v60 = vand.u32 4294901760, %v23181_v50 }
 0x5ba   : > { %22486 = vmatprep.subr.mxu1 %v22250_v36 }
 0x5bc   : > { %22012 = vmatmul.mubr.f32.vlgmr.msra.gmra.mrb[4].mxu0 %v38794_v26 }
 0x5bd   : > { %22025 = vmatpush1.msra.mxu0 %v21791_v17  ;;  %22088 = vmatprep.mubr.f32.mxu0 %v36018_v0  ;;  %v38873_v17 = vsub.f32 %v21696_v25, %v38861_v47  ;;  %v23596_v25 = vsel %vm6225_vm15, %v38926_v20, %v23574_v62 }
 0x5be   : > { %22097 = vmatprep.subr.mxu0 %v38757_v41  ;;  %v38875_v41 = vand.u32 4294901760, %v21698_v63 }
 0x5c0   : > { %22477 = vmatmul.mubr.f32.vlgmr.msra.gmra.mrb[4].mxu1 %v38794_v26  ;;  %v38887_v36 = vsub.f32 %v21698_v63, %v38875_v41  ;;  %v23597_v63 = vmul.f32 %v37002_v5, %v23596_v25  ;;  %v23584_v25 = vpop.permute.xlu0 %23583 }
 0x5c1   : > { %22490 = vmatpush1.msra.mxu1 %v22256_v19  ;;  %22553 = vmatprep.mubr.f32.mxu1 %v36018_v0  ;;  %v22716_v19 = vsub.f32 %v38865_v23, %v22715_v3 }
 0x5c2   : > { %22562 = vmatprep.subr.mxu1 %v38773_v44  ;;  %v22721_v44 = vand.u32 4294901760, %v38873_v17 }
 0x5c3   : > { %v22717_v33 = vand.u32 4294901760, %v22716_v19 }
 0x5c4   : > { %22090 = vmatmul.mubr.f32.vlgmr.msra.gmra.mrb[4].mxu0 %v38761_v28  ;;  %v22722_v31 = vsub.f32 %v38873_v17, %v22721_v44 }
 0x5c5   : > { %22099 = vmatpush1.msra.mxu0 %v38768_v7  ;;  %22162 = vmatprep.mubr.f32.mxu0 %v36018_v0  ;;  %v23186_v7 = vand.u32 4294901760, %v38887_v36 }
 0x5c6   : > { %22636 = vmatprep.subr.mxu0 %v38853_v11 }
 0x5c7   : > { %v23187_v57 = vsub.f32 %v38887_v36, %v23186_v7 }
 0x5c8   : > { %22555 = vmatmul.mubr.f32.vlgmr.msra.gmra.mrb[4].mxu1 %v38761_v28 }
 0x5c9   : > { %22564 = vmatpush1.msra.mxu1 %v38783_v30  ;;  %22627 = vmatprep.mubr.f32.mxu1 %v36018_v0  ;;  %v22723_v30 = vand.u32 4294901760, %v22722_v31  ;;  %v23188_v8 = vand.u32 4294901760, %v23187_v57 }
 0x5ca   : > { %23101 = vmatprep.subr.mxu1 %v38867_v61 }
 0x5cc   : > { %22164 = vmatmul.mubr.f32.vlgmr.msra.gmra.mrb[4].mxu0 %v38761_v28 }
 0x5cd   : > { %22638 = vmatpush1.msra.mxu0 %v38861_v47  ;;  %22701 = vmatprep.mubr.f32.mxu0 %v36018_v0 }
 0x5ce   : > { %22718 = vmatprep.subr.mxu0 %v22717_v33 }
 0x5d0   : > { %22629 = vmatmul.mubr.f32.vlgmr.msra.gmra.mrb[4].mxu1 %v38761_v28  ;;  %22707 = vmatmul.mubr.f32.vlgmr.msra.gmra.mrb[6].mxu0 %v38814_v40 }
 0x5d1   : > { %23103 = vmatpush1.msra.mxu1 %v38875_v41  ;;  %22724 = vmatpush1.msra.mxu0 %v22723_v30 }
 0x5d2   : > { %23183 = vmatprep.subr.mxu1 %v23182_v60  ;;  %22797 = vmatprep.subr.mxu0 %v38865_v23  ;;  %v23594_v23 = vsel %vm6225_vm15, %v23576_v24, %v23578_v6 }
 0x5d3   : > { %23166 = vmatprep.mubr.f32.mxu1 %v36018_v0  ;;  %22787 = vmatprep.mubr.f32.mxu0 %v36018_v0  ;;  %v23599_v19 = vmul.f32 %v36355_v48, %v23594_v23 }
 0x5d4   : > { %23172 = vmatmul.mubr.f32.vlgmr.msra.gmra.mrb[6].mxu1 %v38814_v40  ;;  %v23595_v40 = vsel %vm6225_vm15, %v23574_v62, %v23576_v24 }
 0x5d5   : > { %23189 = vmatpush1.msra.mxu1 %v23188_v8  ;;  %23252 = vmatprep.mubr.f32.mxu1 %v36018_v0  ;;  %v23598_v53 = vmul.f32 %v36385_v55, %v23595_v40 }
 0x5d6   : > { %23262 = vmatprep.subr.mxu1 %v38878_v27 }
 0x5d7   : > { %v38949_v27 = vand.u32 4294901760, %v23598_v53 }
 0x5d8   : > { %22789 = vmatmul.mubr.f32.vlgmr.msra.gmra.mrb[6].mxu0 %v38761_v28 }
 0x5d9   : > { %22800 = vmatpush1.msra.mxu0 %v38873_v17  ;;  %22863 = vmatprep.mubr.f32.mxu0 %v36018_v0  ;;  %v38963_v31 = vsub.f32 %v23598_v53, %v38949_v27 }
 0x5da   : > { %22873 = vmatprep.subr.mxu0 %v38853_v11 }
 0x5dc   : > { %23254 = vmatmul.mubr.f32.vlgmr.msra.gmra.mrb[6].mxu1 %v38761_v28 }
 0x5dd   : > { %23265 = vmatpush1.msra.mxu1 %v38887_v36  ;;  %23328 = vmatprep.mubr.f32.mxu1 %v36018_v0 }
 0x5de   : > { %23338 = vmatprep.subr.mxu1 %v38867_v61 }
 0x5e0   : > { %22866 = vmatmul.mubr.f32.vlgmr.msra.gmra.mrb[6].mxu0 %v38777_v35 }
 0x5e1   : > { %22875 = vmatpush1.msra.mxu0 %v38861_v47  ;;  %22938 = vmatprep.mubr.f32.mxu0 %v36018_v0 }
 0x5e2   : > { %22951 = vmatprep.subr.mxu0 %v22715_v3  ;;  %v38953_v3 = vand.u32 4294901760, %v23608_v21 }
 0x5e4   : > { %23331 = vmatmul.mubr.f32.vlgmr.msra.gmra.mrb[6].mxu1 %v38777_v35  ;;  %v23600_v35 = vmul.f32 %v36343_v43, %v23593_v10  ;;  %v38969_v50 = vsub.f32 %v23608_v21, %v38953_v3 }
 0x5e5   : > { %23340 = vmatpush1.msra.mxu1 %v38875_v41  ;;  %23403 = vmatprep.mubr.f32.mxu1 %v36018_v0 }
 0x5e6   : > { %23416 = vmatprep.subr.mxu1 %v23180_v4  ;;  %v38960_v4 = vand.u32 4294901760, %v23597_v63  ;;  %v38965_v33 = vand.u32 4294901760, %v23600_v35  ;;  %v38986_v30 = vand.u32 4294901760, %v38969_v50 }
 0x5e8   : > { %22942 = vmatmul.mubr.f32.vlgmr.msra.gmra.mrb[6].mxu0 %v38794_v26  ;;  %v38978_v17 = vsub.f32 %v23597_v63, %v38960_v4  ;;  %v23680_v57 = vsub.f32 %v38969_v50, %v38986_v30 }
 0x5e9   : > { %22955 = vmatpush1.msra.mxu0 %v22721_v44  ;;  %23018 = vmatprep.mubr.f32.mxu0 %v36018_v0  ;;  %v38981_v44 = vsub.f32 %v23600_v35, %v38965_v33 }
 0x5ea   : > { %23027 = vmatprep.subr.mxu0 %v38853_v11  ;;  %v38975_v11 = vand.u32 4294901760, %v23599_v19  ;;  %v23696_v36 = vand.u32 4294901760, %v38978_v17  ;;  %v39006_v6 = vand.u32 4294901760, %v23680_v57 }
 0x5eb   : > { %v24155_v60 = vand.u32 4294901760, %v38981_v44 }
 0x5ec   : > { %23407 = vmatmul.mubr.f32.vlgmr.msra.gmra.mrb[6].mxu1 %v38794_v26  ;;  %v23690_v26 = vand.u32 4294901760, %v38963_v31  ;;  %v23697_v8 = vsub.f32 %v38978_v17, %v23696_v36 }
 0x5ed   : > { %23420 = vmatpush1.msra.mxu1 %v23186_v7  ;;  %23483 = vmatprep.mubr.f32.mxu1 %v36018_v0  ;;  %v24156_v24 = vsub.f32 %v38981_v44, %v24155_v60 }
 0x5ee   : > { %23492 = vmatprep.subr.mxu1 %v38867_v61  ;;  %v38992_v61 = vsub.f32 %v23599_v19, %v38975_v11  ;;  %v23691_v7 = vsub.f32 %v38963_v31, %v23690_v26 }
 0x5ef   : > { %v24157_v51 = vand.u32 4294901760, %v24156_v24 }
 0x5f0   : > { %23020 = vmatmul.mubr.f32.vlgmr.msra.gmra.mrb[6].mxu0 %v38761_v28  ;;  %v23692_v62 = vand.u32 4294901760, %v23691_v7 }
 0x5f1   : > { %23029 = vmatpush1.msra.mxu0 %v38861_v47  ;;  %23092 = vmatprep.mubr.f32.mxu0 %v36018_v0  ;;  %v24161_v47 = vand.u32 4294901760, %v38992_v61 }
 0x5f2   : > { %23611 = vmatprep.subr.mxu0 %v38949_v27 }
 0x5f3   : > { %v24162_v40 = vsub.f32 %v38992_v61, %v24161_v47 }
 0x5f4   : > { %23485 = vmatmul.mubr.f32.vlgmr.msra.gmra.mrb[6].mxu1 %v38761_v28 }
 0x5f5   : > { %23494 = vmatpush1.msra.mxu1 %v38875_v41  ;;  %23557 = vmatprep.mubr.f32.mxu1 %v36018_v0  ;;  %v23698_v41 = vand.u32 4294901760, %v23697_v8  ;;  %v24163_v53 = vand.u32 4294901760, %v24162_v40 }
 0x5f6   : > { %24076 = vmatprep.subr.mxu1 %v38965_v33 }
 0x5f8   : > { %23094 = vmatmul.mubr.f32.vlgmr.msra.gmra.mrb[6].mxu0 %v38761_v28 }
 0x5f9   : > { %23613 = vmatpush1.msra.mxu0 %v38960_v4  ;;  %23676 = vmatprep.mubr.f32.mxu0 %v36018_v0 }
 0x5fa   : > { %23693 = vmatprep.subr.mxu0 %v23692_v62 }
 0x5fc   : > { %23559 = vmatmul.mubr.f32.vlgmr.msra.gmra.mrb[6].mxu1 %v38761_v28  ;;  %23682 = vmatmul.mubr.f32.vlgmr.msra.gmra.mrb[4].mxu0 %v39006_v6  ;;  %v23582_v28 = vpop.permute.xlu1 %23581 }
 0x5fd   : > { %24078 = vmatpush1.msra.mxu1 %v38975_v11  ;;  %23699 = vmatpush1.msra.mxu0 %v23698_v41  ;;  %v23591_v10 = vsel %vm6225_vm15, %v23582_v28, %v23584_v25  ;;  %v23592_v63 = vsel %vm6225_vm15, %v38930_v49, %v23582_v28  ;;  %v39103_v28 = vand.u32 4294901760, %v38254_v1 }
 0x5fe   : > { %24158 = vmatprep.subr.mxu1 %v24157_v51  ;;  %23772 = vmatprep.subr.mxu0 %v38963_v31  ;;  %v23602_v23 = vmul.f32 %v36545_v34, %v23591_v10  ;;  %v23601_v19 = vmul.f32 %v36556_v22, %v23592_v63  ;;  %v39114_v10 = vand.u32 4294901760, %v38260_v59 }
 0x5ff   : > { %24141 = vmatprep.mubr.f32.mxu1 %v36018_v0  ;;  %23762 = vmatprep.mubr.f32.mxu0 %v36018_v0 }
 0x600   : > { %24147 = vmatmul.mubr.f32.vlgmr.msra.gmra.mrb[4].mxu1 %v39006_v6  ;;  %v23586_v21 = vpop.permute.xlu1 %23585  ;;  %v39045_v31 = vand.u32 4294901760, %v23602_v23 }
 0x601   : > { %24164 = vmatpush1.msra.mxu1 %v24163_v53  ;;  %24227 = vmatprep.mubr.f32.mxu1 %v36018_v0  ;;  %v23589_v35 = vsel %vm6225_vm15, %v23586_v21, %v38926_v20  ;;  %v23590_v49 = vsel %vm6225_vm15, %v23584_v25, %v23586_v21  ;;  %v39053_v20 = vand.u32 4294901760, %v23601_v19  ;;  %v25562_v21 = vsub.f32 %v38254_v1, %v39103_v28 }
 0x602   : > { %24237 = vmatprep.subr.mxu1 %v38981_v44  ;;  %v23603_v44 = vmul.f32 %v36535_v58, %v23590_v49  ;;  %v26027_v1 = vsub.f32 %v38260_v59, %v39114_v10 }
 0x604   : > { %23764 = vmatmul.mubr.f32.vlgmr.msra.gmra.mrb[4].mxu0 %v38953_v3 }
 0x605   : > { %23775 = vmatpush1.msra.mxu0 %v38978_v17  ;;  %23838 = vmatprep.mubr.f32.mxu0 %v36018_v0  ;;  %v23604_v17 = vmul.f32 %v36517_v12, %v23589_v35  ;;  %v24625_v12 = vsub.f32 %v23601_v19, %v39053_v20  ;;  %v25563_v35 = vand.u32 4294901760, %v25562_v21 }
 0x606   : > { %23848 = vmatprep.subr.mxu0 %v38949_v27 }
 0x607   : > { %v24626_v57 = vand.u32 4294901760, %v24625_v12 }
 0x608   : > { %24229 = vmatmul.mubr.f32.vlgmr.msra.gmra.mrb[4].mxu1 %v38953_v3 }
 0x609   : > { %24240 = vmatpush1.msra.mxu1 %v38992_v61  ;;  %24303 = vmatprep.mubr.f32.mxu1 %v36018_v0  ;;  %v39057_v61 = vand.u32 4294901760, %v23604_v17  ;;  %v24627_v62 = vsub.f32 %v24625_v12, %v24626_v57 }
 0x60a   : > { %24313 = vmatprep.subr.mxu1 %v38965_v33 }
 0x60b   : > { %v24628_v41 = vand.u32 4294901760, %v24627_v62 }
 0x60c   : > { %23841 = vmatmul.mubr.f32.vlgmr.msra.gmra.mrb[4].mxu0 %v38969_v50 }
 0x60d   : > { %23850 = vmatpush1.msra.mxu0 %v38960_v4  ;;  %23913 = vmatprep.mubr.f32.mxu0 %v36018_v0 }
 0x60e   : > { %23926 = vmatprep.subr.mxu0 %v23690_v26  ;;  %v24619_v26 = vsub.f32 %v23602_v23, %v39045_v31  ;;  %v39124_v23 = vand.u32 4294901760, %v38268_v32 }
 0x610   : > { %24306 = vmatmul.mubr.f32.vlgmr.msra.gmra.mrb[4].mxu1 %v38969_v50  ;;  %v24620_v7 = vand.u32 4294901760, %v24619_v26  ;;  %v26033_v49 = vsub.f32 %v38268_v32, %v39124_v23 }
 0x611   : > { %24315 = vmatpush1.msra.mxu1 %v38975_v11  ;;  %24378 = vmatprep.mubr.f32.mxu1 %v36018_v0 }
 0x612   : > { %24391 = vmatprep.subr.mxu1 %v24155_v60 }
 0x614   : > { %23917 = vmatmul.mubr.f32.vlgmr.msra.gmra.mrb[4].mxu0 %v38986_v30 }
 0x615   : > { %23930 = vmatpush1.msra.mxu0 %v23696_v36  ;;  %23993 = vmatprep.mubr.f32.mxu0 %v36018_v0  ;;  %v39063_v36 = vand.u32 4294901760, %v23603_v44 }
 0x616   : > { %24002 = vmatprep.subr.mxu0 %v38949_v27  ;;  %v25084_v27 = vsub.f32 %v23604_v17, %v39057_v61 }
 0x617   : > { %v25090_v60 = vsub.f32 %v23603_v44, %v39063_v36  ;;  %v26028_v44 = vand.u32 4294901760, %v26027_v1 }
 0x618   : > { %24382 = vmatmul.mubr.f32.vlgmr.msra.gmra.mrb[4].mxu1 %v38986_v30 }
 0x619   : > { %24395 = vmatpush1.msra.mxu1 %v24161_v47  ;;  %24458 = vmatprep.mubr.f32.mxu1 %v36018_v0  ;;  %v25085_v47 = vand.u32 4294901760, %v25084_v27  ;;  %v25091_v8 = vand.u32 4294901760, %v25090_v60  ;;  %v26029_v32 = vsub.f32 %v26027_v1, %v26028_v44 }
 0x61a   : > { %24467 = vmatprep.subr.mxu1 %v38965_v33  ;;  %v24621_v33 = vsub.f32 %v24619_v26, %v24620_v7 }
 0x61b   : > { %v25086_v24 = vsub.f32 %v25084_v27, %v25085_v47  ;;  %v25092_v40 = vsub.f32 %v25090_v60, %v25091_v8 }
 0x61c   : > { %23995 = vmatmul.mubr.f32.vlgmr.msra.gmra.mrb[4].mxu0 %v38953_v3 }
 0x61d   : > { %24004 = vmatpush1.msra.mxu0 %v38960_v4  ;;  %24067 = vmatprep.mubr.f32.mxu0 %v36018_v0  ;;  %v24622_v4 = vand.u32 4294901760, %v24621_v33  ;;  %v25093_v51 = vand.u32 4294901760, %v25092_v40 }
 0x61e   : > { %24541 = vmatprep.subr.mxu0 %v39045_v31 }
 0x620   : > { %24460 = vmatmul.mubr.f32.vlgmr.msra.gmra.mrb[4].mxu1 %v38953_v3 }
 0x621   : > { %24469 = vmatpush1.msra.mxu1 %v38975_v11  ;;  %24532 = vmatprep.mubr.f32.mxu1 %v36018_v0  ;;  %v25087_v11 = vand.u32 4294901760, %v25086_v24 }
 0x622   : > { %25006 = vmatprep.subr.mxu1 %v39057_v61 }
 0x624   : > { %24069 = vmatmul.mubr.f32.vlgmr.msra.gmra.mrb[4].mxu0 %v38953_v3 }
 0x625   : > { %24543 = vmatpush1.msra.mxu0 %v39053_v20  ;;  %24606 = vmatprep.mubr.f32.mxu0 %v36018_v0 }
 0x626   : > { %24623 = vmatprep.subr.mxu0 %v24622_v4 }
 0x628   : > { %24534 = vmatmul.mubr.f32.vlgmr.msra.gmra.mrb[4].mxu1 %v38953_v3  ;;  %24612 = vmatmul.mubr.f32.vlgmr.msra.gmra.mrb[6].mxu0 %v39006_v6 }
 0x629   : > { %25008 = vmatpush1.msra.mxu1 %v39063_v36  ;;  %24629 = vmatpush1.msra.mxu0 %v24628_v41 }
 0x62a   : > { %25088 = vmatprep.subr.mxu1 %v25087_v11  ;;  %24702 = vmatprep.subr.mxu0 %v24619_v26 }
 0x62b   : > { %25071 = vmatprep.mubr.f32.mxu1 %v36018_v0  ;;  %24692 = vmatprep.mubr.f32.mxu0 %v36018_v0 }
 0x62c   : > { %25077 = vmatmul.mubr.f32.vlgmr.msra.gmra.mrb[6].mxu1 %v39006_v6  ;;  %v35126_v6 = vld [vmem:[%s39972_s3 + $0x20] sm:$0xff] }
 0x62d   : > { %25094 = vmatpush1.msra.mxu1 %v25093_v51  ;;  %25157 = vmatprep.mubr.f32.mxu1 %v36018_v0  ;;  %v25481_v53 = vsel %vm17941_vm2, %v35126_v6, 0 }
 0x62e   : > { %25167 = vmatprep.subr.mxu1 %v25084_v27  ;;  %v39105_v25 = vand.u32 4294901760, %v25481_v53 }
 0x630   : > { %24694 = vmatmul.mubr.f32.vlgmr.msra.gmra.mrb[6].mxu0 %v38953_v3  ;;  %v39119_v63 = vsub.f32 %v25481_v53, %v39105_v25 }
 0x631   : > { %24705 = vmatpush1.msra.mxu0 %v24625_v12  ;;  %24768 = vmatprep.mubr.f32.mxu0 %v36018_v0 }
 0x632   : > { %24778 = vmatprep.subr.mxu0 %v39045_v31  ;;  %v39130_v19 = vand.u32 4294901760, %v39119_v63 }
 0x634   : > { %25159 = vmatmul.mubr.f32.vlgmr.msra.gmra.mrb[6].mxu1 %v38953_v3  ;;  %v25553_v17 = vsub.f32 %v39119_v63, %v39130_v19 }
 0x635   : > { %25170 = vmatpush1.msra.mxu1 %v25090_v60  ;;  %25233 = vmatprep.mubr.f32.mxu1 %v36018_v0  ;;  %v39180_v60 = vand.u32 4294901760, %v38264_v29 }
 0x636   : > { %25243 = vmatprep.subr.mxu1 %v39057_v61 }
 0x637   : > { %v26957_v4 = vsub.f32 %v38264_v29, %v39180_v60 }
 0x638   : > { %24771 = vmatmul.mubr.f32.vlgmr.msra.gmra.mrb[6].mxu0 %v38969_v50 }
 0x639   : > { %24780 = vmatpush1.msra.mxu0 %v39053_v20  ;;  %24843 = vmatprep.mubr.f32.mxu0 %v36018_v0  ;;  %v26958_v41 = vand.u32 4294901760, %v26957_v4 }
 0x63a   : > { %24856 = vmatprep.subr.mxu0 %v24620_v7 }
 0x63b   : > { %v26959_v11 = vsub.f32 %v26957_v4, %v26958_v41 }
 0x63c   : > { %25236 = vmatmul.mubr.f32.vlgmr.msra.gmra.mrb[6].mxu1 %v38969_v50  ;;  %v39110_v50 = vand.u32 4294901760, %v38252_v13 }
 0x63d   : > { %25245 = vmatpush1.msra.mxu1 %v39063_v36  ;;  %25308 = vmatprep.mubr.f32.mxu1 %v36018_v0  ;;  %v26960_v53 = vand.u32 4294901760, %v26959_v11 }
 0x63e   : > { %25321 = vmatprep.subr.mxu1 %v25085_v47  ;;  %v39187_v47 = vand.u32 4294901760, %v38280_v16 }
 0x640   : > { %24847 = vmatmul.mubr.f32.vlgmr.msra.gmra.mrb[6].mxu0 %v38986_v30  ;;  %v39202_v24 = vsub.f32 %v38280_v16, %v39187_v47 }
 0x641   : > { %24860 = vmatpush1.msra.mxu0 %v24626_v57  ;;  %24923 = vmatprep.mubr.f32.mxu0 %v36018_v0  ;;  %v39176_v57 = vand.u32 4294901760, %v38274_v37 }
 0x642   : > { %24932 = vmatprep.subr.mxu0 %v39045_v31  ;;  %v26964_v40 = vand.u32 4294901760, %v39202_v24 }
 0x644   : > { %25312 = vmatmul.mubr.f32.vlgmr.msra.gmra.mrb[6].mxu1 %v38986_v30  ;;  %v25568_v30 = vsub.f32 %v38252_v13, %v39110_v50  ;;  %v25564_v13 = vsub.f32 %v25562_v21, %v25563_v35  ;;  %v26965_v6 = vsub.f32 %v39202_v24, %v26964_v40 }
 0x645   : > { %25325 = vmatpush1.msra.mxu1 %v25091_v8  ;;  %25388 = vmatprep.mubr.f32.mxu1 %v36018_v0  ;;  %v39191_v8 = vsub.f32 %v38274_v37, %v39176_v57 }
 0x646   : > { %25397 = vmatprep.subr.mxu1 %v39057_v61  ;;  %v25569_v31 = vand.u32 4294901760, %v25568_v30  ;;  %v25565_v26 = vand.u32 4294901760, %v25564_v13  ;;  %v39146_v61 = vand.u32 4294901760, %v25553_v17 }
 0x648   : > { %24925 = vmatmul.mubr.f32.vlgmr.msra.gmra.mrb[6].mxu0 %v38953_v3  ;;  %v25570_v59 = vsub.f32 %v25568_v30, %v25569_v31 }
 0x649   : > { %24934 = vmatpush1.msra.mxu0 %v39053_v20  ;;  %24997 = vmatprep.mubr.f32.mxu0 %v36018_v0  ;;  %v26034_v20 = vand.u32 4294901760, %v26033_v49 }
 0x64a   : > { %25484 = vmatprep.subr.mxu0 %v39103_v28  ;;  %v25571_v12 = vand.u32 4294901760, %v25570_v59 }
 0x64b   : > { %v26035_v27 = vsub.f32 %v26033_v49, %v26034_v20 }
 0x64c   : > { %25390 = vmatmul.mubr.f32.vlgmr.msra.gmra.mrb[6].mxu1 %v38953_v3 }
 0x64d   : > { %25399 = vmatpush1.msra.mxu1 %v39063_v36  ;;  %25462 = vmatprep.mubr.f32.mxu1 %v36018_v0  ;;  %v26030_v36 = vand.u32 4294901760, %v26029_v32  ;;  %v26036_v7 = vand.u32 4294901760, %v26035_v27 }
 0x64e   : > { %25949 = vmatprep.subr.mxu1 %v39114_v10 }
 0x650   : > { %24999 = vmatmul.mubr.f32.vlgmr.msra.gmra.mrb[6].mxu0 %v38953_v3 }
 0x651   : > { %25486 = vmatpush1.msra.mxu0 %v39110_v50  ;;  %25549 = vmatprep.mubr.f32.mxu0 %v36018_v0 }
 0x652   : > { %25566 = vmatprep.subr.mxu0 %v25565_v26 }
 0x654   : > { %25464 = vmatmul.mubr.f32.vlgmr.msra.gmra.mrb[6].mxu1 %v38953_v3  ;;  %25555 = vmatmul.mubr.f32.vlgmr.msra.gmra.mrb[4].mxu0 %v39146_v61  ;;  %v39171_v3 = vand.u32 4294901760, %v38272_v45 }
 0x655   : > { %25951 = vmatpush1.msra.mxu1 %v39124_v23  ;;  %25572 = vmatpush1.msra.mxu0 %v25571_v12 }
 0x656   : > { %26031 = vmatprep.subr.mxu1 %v26030_v36  ;;  %25645 = vmatprep.subr.mxu0 %v25562_v21  ;;  %v26492_v33 = vsub.f32 %v38272_v45, %v39171_v3  ;;  %v26499_v45 = vand.u32 4294901760, %v39191_v8  ;;  %v27356_v21 = vpop.permute.xlu1 %27355 }
 0x657   : > { %26014 = vmatprep.mubr.f32.mxu1 %v36018_v0  ;;  %25635 = vmatprep.mubr.f32.mxu0 %v36018_v0 }
 0x658   : > { %26020 = vmatmul.mubr.f32.vlgmr.msra.gmra.mrb[4].mxu1 %v39146_v61  ;;  %v26493_v62 = vand.u32 4294901760, %v26492_v33  ;;  %v26500_v29 = vsub.f32 %v39191_v8, %v26499_v45 }
 0x659   : > { %26037 = vmatpush1.msra.mxu1 %v26036_v7  ;;  %26100 = vmatprep.mubr.f32.mxu1 %v36018_v0 }
 0x65a   : > { %26110 = vmatprep.subr.mxu1 %v26027_v1  ;;  %v26494_v37 = vsub.f32 %v26492_v33, %v26493_v62  ;;  %v26501_v51 = vand.u32 4294901760, %v26500_v29  ;;  %v35127_v1 = vld [vmem:[%s39972_s3 + $0x28] sm:$0xff] }
 0x65b   : > { %v27386_v17 = vsel %vm17941_vm2, %v35127_v1, 0 }
 0x65c   : > { %25637 = vmatmul.mubr.f32.vlgmr.msra.gmra.mrb[4].mxu0 %v39105_v25  ;;  %v26495_v16 = vand.u32 4294901760, %v26494_v37  ;;  %v39263_v26 = vand.u32 4294901760, %v27386_v17 }
 0x65d   : > { %25648 = vmatpush1.msra.mxu0 %v25568_v30  ;;  %25711 = vmatprep.mubr.f32.mxu0 %v36018_v0 }
 0x65e   : > { %25721 = vmatprep.subr.mxu0 %v39103_v28  ;;  %v39279_v36 = vsub.f32 %v27386_v17, %v39263_v26 }
 0x660   : > { %26102 = vmatmul.mubr.f32.vlgmr.msra.gmra.mrb[4].mxu1 %v39105_v25 }
 0x661   : > { %26113 = vmatpush1.msra.mxu1 %v26033_v49  ;;  %26176 = vmatprep.mubr.f32.mxu1 %v36018_v0 }
 0x662   : > { %26186 = vmatprep.subr.mxu1 %v39114_v10 }
 0x664   : > { %25714 = vmatmul.mubr.f32.vlgmr.msra.gmra.mrb[4].mxu0 %v39119_v63 }
 0x665   : > { %25723 = vmatpush1.msra.mxu0 %v39110_v50  ;;  %25786 = vmatprep.mubr.f32.mxu0 %v36018_v0 }
 0x666   : > { %25799 = vmatprep.subr.mxu0 %v25563_v35  ;;  %v39240_v35 = vpop.permute.xlu1 %27359 }
 0x668   : > { %26179 = vmatmul.mubr.f32.vlgmr.msra.gmra.mrb[4].mxu1 %v39119_v63 }
 0x669   : > { %26188 = vmatpush1.msra.mxu1 %v39124_v23  ;;  %26251 = vmatprep.mubr.f32.mxu1 %v36018_v0 }
 0x66a   : > { %26264 = vmatprep.subr.mxu1 %v26028_v44 }
 0x66c   : > { %25790 = vmatmul.mubr.f32.vlgmr.msra.gmra.mrb[4].mxu0 %v39130_v19 }
 0x66d   : > { %25803 = vmatpush1.msra.mxu0 %v25569_v31  ;;  %25866 = vmatprep.mubr.f32.mxu0 %v36018_v0 }
 0x66e   : > { %25875 = vmatprep.subr.mxu0 %v39103_v28  ;;  %v26966_v28 = vand.u32 4294901760, %v26965_v6 }
 0x670   : > { %26255 = vmatmul.mubr.f32.vlgmr.msra.gmra.mrb[4].mxu1 %v39130_v19 }
 0x671   : > { %26268 = vmatpush1.msra.mxu1 %v26034_v20  ;;  %26331 = vmatprep.mubr.f32.mxu1 %v36018_v0 }
 0x672   : > { %26340 = vmatprep.subr.mxu1 %v39114_v10 }
 0x674   : > { %25868 = vmatmul.mubr.f32.vlgmr.msra.gmra.mrb[4].mxu0 %v39105_v25 }
 0x675   : > { %25877 = vmatpush1.msra.mxu0 %v39110_v50  ;;  %25940 = vmatprep.mubr.f32.mxu0 %v36018_v0  ;;  %v27354_v50 = vpop.permute.xlu0 %27353 }
 0x676   : > { %26414 = vmatprep.subr.mxu0 %v39171_v3 }
 0x678   : > { %26333 = vmatmul.mubr.f32.vlgmr.msra.gmra.mrb[4].mxu1 %v39105_v25 }
 0x679   : > { %26342 = vmatpush1.msra.mxu1 %v39124_v23  ;;  %26405 = vmatprep.mubr.f32.mxu1 %v36018_v0  ;;  %v27358_v10 = vpop.permute.xlu0 %27357  ;;  %v27372_v23 = vsel %vm10060_vm7, %v27354_v50, %v27356_v21 }
 0x67a   : > { %26879 = vmatprep.subr.mxu1 %v39180_v60  ;;  %v27376_v31 = vmul.f32 %v36683_v46, %v27372_v23  ;;  %v27370_v13 = vsel %vm10060_vm7, %v27358_v10, %v39240_v35  ;;  %v27371_v59 = vsel %vm10060_vm7, %v27356_v21, %v27358_v10 }
 0x67c   : > { %25942 = vmatmul.mubr.f32.vlgmr.msra.gmra.mrb[4].mxu0 %v39105_v25  ;;  %v39259_v20 = vand.u32 4294901760, %v27376_v31 }
 0x67d   : > { %26416 = vmatpush1.msra.mxu0 %v39176_v57  ;;  %26479 = vmatprep.mubr.f32.mxu0 %v36018_v0  ;;  %v39236_v30 = vpop.permute.xlu0 %27351 }
 0x67e   : > { %26496 = vmatprep.subr.mxu0 %v26495_v16  ;;  %v27373_v49 = vsel %vm10060_vm7, %v39236_v30, %v27354_v50  ;;  %v39273_v12 = vsub.f32 %v27376_v31, %v39259_v20 }
 0x67f   : > { %v27375_v44 = vmul.f32 %v37418_v2, %v27373_v49 }
 0x680   : > { %26407 = vmatmul.mubr.f32.vlgmr.msra.gmra.mrb[4].mxu1 %v39105_v25  ;;  %26485 = vmatmul.mubr.f32.vlgmr.msra.gmra.mrb[6].mxu0 %v39146_v61 }
 0x681   : > { %26881 = vmatpush1.msra.mxu1 %v39187_v47  ;;  %26502 = vmatpush1.msra.mxu0 %v26501_v51  ;;  %v39270_v32 = vand.u32 4294901760, %v27375_v44  ;;  %v27364_v6 = vpop.permute.xlu0 %27363 }
 0x682   : > { %26961 = vmatprep.subr.mxu1 %v26960_v53  ;;  %26575 = vmatprep.subr.mxu0 %v26492_v33 }
 0x683   : > { %26944 = vmatprep.mubr.f32.mxu1 %v36018_v0  ;;  %26565 = vmatprep.mubr.f32.mxu0 %v36018_v0 }
 0x684   : > { %26950 = vmatmul.mubr.f32.vlgmr.msra.gmra.mrb[6].mxu1 %v39146_v61  ;;  %v27377_v61 = vmul.f32 %v36670_v38, %v27371_v59 }
 0x685   : > { %26967 = vmatpush1.msra.mxu1 %v26966_v28  ;;  %27030 = vmatprep.mubr.f32.mxu1 %v36018_v0 }
 0x686   : > { %27040 = vmatprep.subr.mxu1 %v26957_v4  ;;  %v39285_v7 = vand.u32 4294901760, %v27377_v61 }
 0x688   : > { %26567 = vmatmul.mubr.f32.vlgmr.msra.gmra.mrb[6].mxu0 %v39105_v25 }
 0x689   : > { %26578 = vmatpush1.msra.mxu0 %v39191_v8  ;;  %26641 = vmatprep.mubr.f32.mxu0 %v36018_v0  ;;  %v39296_v8 = vand.u32 4294901760, %v39279_v36 }
 0x68a   : > { %26651 = vmatprep.subr.mxu0 %v39171_v3 }
 0x68c   : > { %27032 = vmatmul.mubr.f32.vlgmr.msra.gmra.mrb[6].mxu1 %v39105_v25 }
 0x68d   : > { %27043 = vmatpush1.msra.mxu1 %v39202_v24  ;;  %27106 = vmatprep.mubr.f32.mxu1 %v36018_v0 }
 0x68e   : > { %27116 = vmatprep.subr.mxu1 %v39180_v60 }
 0x690   : > { %26644 = vmatmul.mubr.f32.vlgmr.msra.gmra.mrb[6].mxu0 %v39119_v63 }
 0x691   : > { %26653 = vmatpush1.msra.mxu0 %v39176_v57  ;;  %26716 = vmatprep.mubr.f32.mxu0 %v36018_v0 }
 0x692   : > { %26729 = vmatprep.subr.mxu0 %v26493_v62 }
 0x694   : > { %27109 = vmatmul.mubr.f32.vlgmr.msra.gmra.mrb[6].mxu1 %v39119_v63  ;;  %v27378_v63 = vmul.f32 %v36647_v56, %v27370_v13 }
 0x695   : > { %27118 = vmatpush1.msra.mxu1 %v39187_v47  ;;  %27181 = vmatprep.mubr.f32.mxu1 %v36018_v0 }
 0x696   : > { %27194 = vmatprep.subr.mxu1 %v26958_v41  ;;  %v39275_v27 = vand.u32 4294901760, %v27378_v63 }
 0x698   : > { %26720 = vmatmul.mubr.f32.vlgmr.msra.gmra.mrb[6].mxu0 %v39130_v19  ;;  %v39291_v33 = vsub.f32 %v27378_v63, %v39275_v27 }
 0x699   : > { %26733 = vmatpush1.msra.mxu0 %v26499_v45  ;;  %26796 = vmatprep.mubr.f32.mxu0 %v36018_v0  ;;  %v27458_v45 = vsub.f32 %v39279_v36, %v39296_v8 }
 0x69a   : > { %26805 = vmatprep.subr.mxu0 %v39171_v3  ;;  %v39288_v3 = vsub.f32 %v27375_v44, %v39270_v32  ;;  %v27933_v24 = vand.u32 4294901760, %v39291_v33 }
 0x69b   : > { %v39316_v29 = vand.u32 4294901760, %v27458_v45  ;;  %v29259_v45 = vpop.permute.xlu0 %29258 }
 0x69c   : > { %27185 = vmatmul.mubr.f32.vlgmr.msra.gmra.mrb[6].mxu1 %v39130_v19  ;;  %v27468_v19 = vand.u32 4294901760, %v39273_v12  ;;  %v27474_v62 = vand.u32 4294901760, %v39288_v3 }
 0x69d   : > { %27198 = vmatpush1.msra.mxu1 %v26964_v40  ;;  %27261 = vmatprep.mubr.f32.mxu1 %v36018_v0  ;;  %v27934_v40 = vsub.f32 %v39291_v33, %v27933_v24 }
 0x69e   : > { %27270 = vmatprep.subr.mxu1 %v39180_v60  ;;  %v39302_v60 = vsub.f32 %v27377_v61, %v39285_v7  ;;  %v27469_v4 = vsub.f32 %v39273_v12, %v27468_v19  ;;  %v27475_v37 = vsub.f32 %v39288_v3, %v27474_v62 }
 0x69f   : > { %v27935_v11 = vand.u32 4294901760, %v27934_v40  ;;  %v35128_v40 = vld [vmem:[%s39972_s3 + $0x30] sm:$0xff] }
 0x6a0   : > { %26798 = vmatmul.mubr.f32.vlgmr.msra.gmra.mrb[6].mxu0 %v39105_v25  ;;  %v27470_v41 = vand.u32 4294901760, %v27469_v4 }
 0x6a1   : > { %26807 = vmatpush1.msra.mxu0 %v39176_v57  ;;  %26870 = vmatprep.mubr.f32.mxu0 %v36018_v0  ;;  %v27939_v57 = vand.u32 4294901760, %v39302_v60 }
 0x6a2   : > { %27389 = vmatprep.subr.mxu0 %v39259_v20 }
 0x6a3   : > { %v27940_v16 = vsub.f32 %v39302_v60, %v27939_v57 }
 0x6a4   : > { %27263 = vmatmul.mubr.f32.vlgmr.msra.gmra.mrb[6].mxu1 %v39105_v25 }
 0x6a5   : > { %27272 = vmatpush1.msra.mxu1 %v39187_v47  ;;  %27335 = vmatprep.mubr.f32.mxu1 %v36018_v0  ;;  %v27476_v47 = vand.u32 4294901760, %v27475_v37  ;;  %v27941_v51 = vand.u32 4294901760, %v27940_v16 }
 0x6a6   : > { %27854 = vmatprep.subr.mxu1 %v39275_v27 }
 0x6a8   : > { %26872 = vmatmul.mubr.f32.vlgmr.msra.gmra.mrb[6].mxu0 %v39105_v25 }
 0x6a9   : > { %27391 = vmatpush1.msra.mxu0 %v39270_v32  ;;  %27454 = vmatprep.mubr.f32.mxu0 %v36018_v0 }
 0x6aa   : > { %27471 = vmatprep.subr.mxu0 %v27470_v41 }
 0x6ac   : > { %27337 = vmatmul.mubr.f32.vlgmr.msra.gmra.mrb[6].mxu1 %v39105_v25  ;;  %27460 = vmatmul.mubr.f32.vlgmr.msra.gmra.mrb[4].mxu0 %v39316_v29  ;;  %v27362_v25 = vpop.permute.xlu1 %27361 }
 0x6ad   : > { %27856 = vmatpush1.msra.mxu1 %v39285_v7  ;;  %27477 = vmatpush1.msra.mxu0 %v27476_v47  ;;  %v27368_v53 = vsel %vm10060_vm7, %v27362_v25, %v27364_v6  ;;  %v27369_v50 = vsel %vm10060_vm7, %v39240_v35, %v27362_v25 }
 0x6ae   : > { %27936 = vmatprep.subr.mxu1 %v27935_v11  ;;  %27550 = vmatprep.subr.mxu0 %v39273_v12  ;;  %v27380_v10 = vmul.f32 %v36855_v54, %v27368_v53  ;;  %v27379_v23 = vmul.f32 %v36878_v15, %v27369_v50 }
 0x6af   : > { %27919 = vmatprep.mubr.f32.mxu1 %v36018_v0  ;;  %27540 = vmatprep.mubr.f32.mxu0 %v36018_v0 }
 0x6b0   : > { %27925 = vmatmul.mubr.f32.vlgmr.msra.gmra.mrb[4].mxu1 %v39316_v29  ;;  %v27366_v28 = vpop.permute.xlu1 %27365  ;;  %v39355_v1 = vand.u32 4294901760, %v27380_v10 }
 0x6b1   : > { %27942 = vmatpush1.msra.mxu1 %v27941_v51  ;;  %28005 = vmatprep.mubr.f32.mxu1 %v36018_v0  ;;  %v27374_v21 = vsel %vm10060_vm7, %v27366_v28, %v39236_v30  ;;  %v27367_v35 = vsel %vm10060_vm7, %v27364_v6, %v27366_v28  ;;  %v39363_v30 = vand.u32 4294901760, %v27379_v23  ;;  %v29291_v51 = vsel %vm17941_vm2, %v35128_v40, 0 }
 0x6b2   : > { %28015 = vmatprep.subr.mxu1 %v39291_v33  ;;  %v27382_v31 = vmul.f32 %v36823_v39, %v27374_v21  ;;  %v27381_v49 = vmul.f32 %v36845_v52, %v27367_v35  ;;  %v39367_v13 = vsub.f32 %v27380_v10, %v39355_v1  ;;  %v39455_v53 = vand.u32 4294901760, %v29291_v51 }
 0x6b3   : > { %v39375_v39 = vsub.f32 %v27379_v23, %v39363_v30 }
 0x6b4   : > { %27542 = vmatmul.mubr.f32.vlgmr.msra.gmra.mrb[4].mxu0 %v39263_v26  ;;  %v39369_v17 = vand.u32 4294901760, %v27382_v31  ;;  %v39377_v44 = vand.u32 4294901760, %v27381_v49 }
 0x6b5   : > { %27553 = vmatpush1.msra.mxu0 %v39288_v3  ;;  %27616 = vmatprep.mubr.f32.mxu0 %v36018_v0  ;;  %v28404_v63 = vand.u32 4294901760, %v39375_v39 }
 0x6b6   : > { %27626 = vmatprep.subr.mxu0 %v39259_v20  ;;  %v39380_v59 = vsub.f32 %v27382_v31, %v39369_v17  ;;  %v39389_v61 = vsub.f32 %v27381_v49, %v39377_v44 }
 0x6b7   : > { %v28405_v3 = vsub.f32 %v39375_v39, %v28404_v63 }
 0x6b8   : > { %28007 = vmatmul.mubr.f32.vlgmr.msra.gmra.mrb[4].mxu1 %v39263_v26 }
 0x6b9   : > { %28018 = vmatpush1.msra.mxu1 %v39302_v60  ;;  %28081 = vmatprep.mubr.f32.mxu1 %v36018_v0 }
 0x6ba   : > { %28091 = vmatprep.subr.mxu1 %v39275_v27 }
 0x6bc   : > { %27619 = vmatmul.mubr.f32.vlgmr.msra.gmra.mrb[4].mxu0 %v39279_v36 }
 0x6bd   : > { %27628 = vmatpush1.msra.mxu0 %v39270_v32  ;;  %27691 = vmatprep.mubr.f32.mxu0 %v36018_v0 }
 0x6be   : > { %27704 = vmatprep.subr.mxu0 %v27468_v19 }
 0x6c0   : > { %28084 = vmatmul.mubr.f32.vlgmr.msra.gmra.mrb[4].mxu1 %v39279_v36 }
 0x6c1   : > { %28093 = vmatpush1.msra.mxu1 %v39285_v7  ;;  %28156 = vmatprep.mubr.f32.mxu1 %v36018_v0 }
 0x6c2   : > { %28169 = vmatprep.subr.mxu1 %v27933_v24  ;;  %v29263_v24 = vpop.permute.xlu0 %29262 }
 0x6c4   : > { %27695 = vmatmul.mubr.f32.vlgmr.msra.gmra.mrb[4].mxu0 %v39296_v8 }
 0x6c5   : > { %27708 = vmatpush1.msra.mxu0 %v27474_v62  ;;  %27771 = vmatprep.mubr.f32.mxu0 %v36018_v0 }
 0x6c6   : > { %27780 = vmatprep.subr.mxu0 %v39259_v20  ;;  %v28398_v20 = vand.u32 4294901760, %v39367_v13  ;;  %v39428_v41 = vpop.permute.xlu0 %29256 }
 0x6c7   : > { %v29278_v16 = vsel %vm12006_vm5, %v39428_v41, %v29259_v45 }
 0x6c8   : > { %28160 = vmatmul.mubr.f32.vlgmr.msra.gmra.mrb[4].mxu1 %v39296_v8  ;;  %v28399_v12 = vsub.f32 %v39367_v13, %v28398_v20  ;;  %v29280_v25 = vmul.f32 %v37002_v5, %v29278_v16 }
 0x6c9   : > { %28173 = vmatpush1.msra.mxu1 %v27939_v57  ;;  %28236 = vmatprep.mubr.f32.mxu1 %v36018_v0  ;;  %v29261_v57 = vpop.permute.xlu1 %29260 }
 0x6ca   : > { %28245 = vmatprep.subr.mxu1 %v39275_v27  ;;  %v28863_v27 = vand.u32 4294901760, %v39380_v59  ;;  %v28400_v33 = vand.u32 4294901760, %v28399_v12  ;;  %v29277_v37 = vsel %vm12006_vm5, %v29259_v45, %v29261_v57  ;;  %v39462_v28 = vand.u32 4294901760, %v29280_v25 }
 0x6cb   : > { %v29281_v47 = vmul.f32 %v36385_v55, %v29277_v37  ;;  %v29276_v55 = vsel %vm12006_vm5, %v29261_v57, %v29263_v24 }
 0x6cc   : > { %27773 = vmatmul.mubr.f32.vlgmr.msra.gmra.mrb[4].mxu0 %v39263_v26  ;;  %v28864_v19 = vsub.f32 %v39380_v59, %v28863_v27  ;;  %v29282_v5 = vmul.f32 %v36355_v48, %v29276_v55  ;;  %v39480_v21 = vsub.f32 %v29280_v25, %v39462_v28 }
 0x6cd   : > { %27782 = vmatpush1.msra.mxu0 %v39270_v32  ;;  %27845 = vmatprep.mubr.f32.mxu0 %v36018_v0  ;;  %v28869_v32 = vand.u32 4294901760, %v39389_v61  ;;  %v39451_v6 = vand.u32 4294901760, %v29281_v47 }
 0x6ce   : > { %28319 = vmatprep.subr.mxu0 %v39355_v1  ;;  %v28865_v62 = vand.u32 4294901760, %v28864_v19  ;;  %v39477_v48 = vand.u32 4294901760, %v29282_v5  ;;  %v29379_v31 = vand.u32 4294901760, %v39480_v21 }
 0x6cf   : > { %v28870_v60 = vsub.f32 %v39389_v61, %v28869_v32  ;;  %v39465_v50 = vsub.f32 %v29281_v47, %v39451_v6 }
 0x6d0   : > { %28238 = vmatmul.mubr.f32.vlgmr.msra.gmra.mrb[4].mxu1 %v39263_v26  ;;  %v39494_v35 = vsub.f32 %v29282_v5, %v39477_v48 }
 0x6d1   : > { %28247 = vmatpush1.msra.mxu1 %v39285_v7  ;;  %28310 = vmatprep.mubr.f32.mxu1 %v36018_v0  ;;  %v28406_v7 = vand.u32 4294901760, %v28405_v3  ;;  %v28871_v4 = vand.u32 4294901760, %v28870_v60 }
 0x6d2   : > { %28784 = vmatprep.subr.mxu1 %v39369_v17 }
 0x6d4   : > { %27847 = vmatmul.mubr.f32.vlgmr.msra.gmra.mrb[4].mxu0 %v39263_v26 }
 0x6d5   : > { %28321 = vmatpush1.msra.mxu0 %v39363_v30  ;;  %28384 = vmatprep.mubr.f32.mxu0 %v36018_v0 }
 0x6d6   : > { %28401 = vmatprep.subr.mxu0 %v28400_v33 }
 0x6d8   : > { %28312 = vmatmul.mubr.f32.vlgmr.msra.gmra.mrb[4].mxu1 %v39263_v26  ;;  %28390 = vmatmul.mubr.f32.vlgmr.msra.gmra.mrb[6].mxu0 %v39316_v29 }
 0x6d9   : > { %28786 = vmatpush1.msra.mxu1 %v39377_v44  ;;  %28407 = vmatpush1.msra.mxu0 %v28406_v7 }
 0x6da   : > { %28866 = vmatprep.subr.mxu1 %v28865_v62  ;;  %28480 = vmatprep.subr.mxu0 %v39367_v13 }
 0x6db   : > { %28849 = vmatprep.mubr.f32.mxu1 %v36018_v0  ;;  %28470 = vmatprep.mubr.f32.mxu0 %v36018_v0 }
 0x6dc   : > { %28855 = vmatmul.mubr.f32.vlgmr.msra.gmra.mrb[6].mxu1 %v39316_v29  ;;  %v39432_v29 = vpop.permute.xlu1 %29264 }
 0x6dd   : > { %28872 = vmatpush1.msra.mxu1 %v28871_v4  ;;  %28935 = vmatprep.mubr.f32.mxu1 %v36018_v0  ;;  %v29275_v11 = vsel %vm12006_vm5, %v29263_v24, %v39432_v29 }
 0x6de   : > { %28945 = vmatprep.subr.mxu1 %v39380_v59 }
 0x6e0   : > { %28472 = vmatmul.mubr.f32.vlgmr.msra.gmra.mrb[6].mxu0 %v39263_v26 }
 0x6e1   : > { %28483 = vmatpush1.msra.mxu0 %v39375_v39  ;;  %28546 = vmatprep.mubr.f32.mxu0 %v36018_v0  ;;  %v29380_v39 = vsub.f32 %v39480_v21, %v29379_v31 }
 0x6e2   : > { %28556 = vmatprep.subr.mxu0 %v39355_v1 }
 0x6e4   : > { %28937 = vmatmul.mubr.f32.vlgmr.msra.gmra.mrb[6].mxu1 %v39263_v26 }
 0x6e5   : > { %28948 = vmatpush1.msra.mxu1 %v39389_v61  ;;  %29011 = vmatprep.mubr.f32.mxu1 %v36018_v0 }
 0x6e6   : > { %29021 = vmatprep.subr.mxu1 %v39369_v17 }
 0x6e8   : > { %28549 = vmatmul.mubr.f32.vlgmr.msra.gmra.mrb[6].mxu0 %v39279_v36 }
 0x6e9   : > { %28558 = vmatpush1.msra.mxu0 %v39363_v30  ;;  %28621 = vmatprep.mubr.f32.mxu0 %v36018_v0 }
 0x6ea   : > { %28634 = vmatprep.subr.mxu0 %v28398_v20 }
 0x6ec   : > { %29014 = vmatmul.mubr.f32.vlgmr.msra.gmra.mrb[6].mxu1 %v39279_v36  ;;  %v29283_v36 = vmul.f32 %v36343_v43, %v29275_v11  ;;  %v39471_v43 = vsub.f32 %v29291_v51, %v39455_v53 }
 0x6ed   : > { %29023 = vmatpush1.msra.mxu1 %v39377_v44  ;;  %29086 = vmatprep.mubr.f32.mxu1 %v36018_v0 }
 0x6ee   : > { %29099 = vmatprep.subr.mxu1 %v28863_v27  ;;  %v39467_v10 = vand.u32 4294901760, %v29283_v36 }
 0x6f0   : > { %28625 = vmatmul.mubr.f32.vlgmr.msra.gmra.mrb[6].mxu0 %v39296_v8  ;;  %v39483_v23 = vsub.f32 %v29283_v36, %v39467_v10 }
 0x6f1   : > { %28638 = vmatpush1.msra.mxu0 %v28404_v63  ;;  %28701 = vmatprep.mubr.f32.mxu0 %v36018_v0 }
 0x6f2   : > { %28710 = vmatprep.subr.mxu0 %v39355_v1  ;;  %v39488_v1 = vand.u32 4294901760, %v39471_v43 }
 0x6f4   : > { %29090 = vmatmul.mubr.f32.vlgmr.msra.gmra.mrb[6].mxu1 %v39296_v8  ;;  %v29373_v8 = vand.u32 4294901760, %v39465_v50  ;;  %v29363_v13 = vsub.f32 %v39471_v43, %v39488_v1 }
 0x6f5   : > { %29103 = vmatpush1.msra.mxu1 %v28869_v32  ;;  %29166 = vmatprep.mubr.f32.mxu1 %v36018_v0  ;;  %v29269_v32 = vpop.permute.xlu0 %29268 }
 0x6f6   : > { %29175 = vmatprep.subr.mxu1 %v39369_v17  ;;  %v29374_v49 = vsub.f32 %v39465_v50, %v29373_v8  ;;  %v29838_v17 = vand.u32 4294901760, %v39483_v23  ;;  %v39508_v20 = vand.u32 4294901760, %v29363_v13 }
 0x6f8   : > { %28703 = vmatmul.mubr.f32.vlgmr.msra.gmra.mrb[6].mxu0 %v39263_v26  ;;  %v29375_v59 = vand.u32 4294901760, %v29374_v49  ;;  %v29839_v63 = vsub.f32 %v39483_v23, %v29838_v17 }
 0x6f9   : > { %28712 = vmatpush1.msra.mxu0 %v39363_v30  ;;  %28775 = vmatprep.mubr.f32.mxu0 %v36018_v0  ;;  %v29844_v30 = vand.u32 4294901760, %v39494_v35 }
 0x6fa   : > { %29294 = vmatprep.subr.mxu0 %v39451_v6  ;;  %v29840_v12 = vand.u32 4294901760, %v29839_v63 }
 0x6fb   : > { %v29845_v61 = vsub.f32 %v39494_v35, %v29844_v30 }
 0x6fc   : > { %29168 = vmatmul.mubr.f32.vlgmr.msra.gmra.mrb[6].mxu1 %v39263_v26 }
 0x6fd   : > { %29177 = vmatpush1.msra.mxu1 %v39377_v44  ;;  %29240 = vmatprep.mubr.f32.mxu1 %v36018_v0  ;;  %v29381_v44 = vand.u32 4294901760, %v29380_v39  ;;  %v29846_v27 = vand.u32 4294901760, %v29845_v61 }
 0x6fe   : > { %29759 = vmatprep.subr.mxu1 %v39467_v10 }
 0x700   : > { %28777 = vmatmul.mubr.f32.vlgmr.msra.gmra.mrb[6].mxu0 %v39263_v26 }
 0x701   : > { %29296 = vmatpush1.msra.mxu0 %v39462_v28  ;;  %29359 = vmatprep.mubr.f32.mxu0 %v36018_v0 }
 0x702   : > { %29376 = vmatprep.subr.mxu0 %v29375_v59 }
 0x704   : > { %29242 = vmatmul.mubr.f32.vlgmr.msra.gmra.mrb[6].mxu1 %v39263_v26  ;;  %29365 = vmatmul.mubr.f32.vlgmr.msra.gmra.mrb[4].mxu0 %v39508_v20  ;;  %v29267_v26 = vpop.permute.xlu1 %29266 }
 0x705   : > { %29761 = vmatpush1.msra.mxu1 %v39477_v48  ;;  %29382 = vmatpush1.msra.mxu0 %v29381_v44  ;;  %v29273_v3 = vsel %vm12006_vm5, %v29267_v26, %v29269_v32  ;;  %v29274_v19 = vsel %vm12006_vm5, %v39432_v29, %v29267_v26 }
 0x706   : > { %29841 = vmatprep.subr.mxu1 %v29840_v12  ;;  %29455 = vmatprep.subr.mxu0 %v39465_v50  ;;  %v29285_v7 = vmul.f32 %v36545_v34, %v29273_v3  ;;  %v29284_v62 = vmul.f32 %v36556_v22, %v29274_v19 }
 0x707   : > { %29824 = vmatprep.mubr.f32.mxu1 %v36018_v0  ;;  %29445 = vmatprep.mubr.f32.mxu0 %v36018_v0 }
 0x708   : > { %29830 = vmatmul.mubr.f32.vlgmr.msra.gmra.mrb[4].mxu1 %v39508_v20  ;;  %v29271_v33 = vpop.permute.xlu1 %29270  ;;  %v39547_v4 = vand.u32 4294901760, %v29285_v7  ;;  %v39555_v24 = vand.u32 4294901760, %v29284_v62 }
 0x709   : > { %29847 = vmatpush1.msra.mxu1 %v29846_v27  ;;  %29910 = vmatprep.mubr.f32.mxu1 %v36018_v0  ;;  %v29279_v60 = vsel %vm12006_vm5, %v29271_v33, %v39428_v41  ;;  %v29272_v45 = vsel %vm12006_vm5, %v29269_v32, %v29271_v33 }
 0x70a   : > { %29920 = vmatprep.subr.mxu1 %v39483_v23  ;;  %v29287_v34 = vmul.f32 %v37735_v18, %v29279_v60  ;;  %v29286_v57 = vmul.f32 %v36535_v58, %v29272_v45  ;;  %v30302_v22 = vsub.f32 %v29285_v7, %v39547_v4  ;;  %v39565_v18 = vsub.f32 %v29284_v62, %v39555_v24  ;;  %v35129_v23 = vld [vmem:[%s39972_s3 + $0x38] sm:$0xff] }
 0x70c   : > { %29447 = vmatmul.mubr.f32.vlgmr.msra.gmra.mrb[4].mxu0 %v39455_v53  ;;  %v39559_v37 = vand.u32 4294901760, %v29287_v34  ;;  %v39567_v41 = vand.u32 4294901760, %v29286_v57  ;;  %v30303_v58 = vand.u32 4294901760, %v30302_v22  ;;  %v30309_v40 = vand.u32 4294901760, %v39565_v18 }
 0x70d   : > { %29458 = vmatpush1.msra.mxu0 %v39480_v21  ;;  %29521 = vmatprep.mubr.f32.mxu0 %v36018_v0  ;;  %v31166_v21 = vpop.permute.xlu1 %31165 }
 0x70e   : > { %29531 = vmatprep.subr.mxu0 %v39451_v6  ;;  %v30767_v29 = vsub.f32 %v29287_v34, %v39559_v37  ;;  %v39576_v47 = vsub.f32 %v29286_v57, %v39567_v41  ;;  %v30304_v16 = vsub.f32 %v30302_v22, %v30303_v58  ;;  %v30310_v25 = vsub.f32 %v39565_v18, %v30309_v40 }
 0x710   : > { %29912 = vmatmul.mubr.f32.vlgmr.msra.gmra.mrb[4].mxu1 %v39455_v53  ;;  %v30768_v11 = vand.u32 4294901760, %v30767_v29  ;;  %v30774_v51 = vand.u32 4294901760, %v39576_v47  ;;  %v30305_v55 = vand.u32 4294901760, %v30304_v16  ;;  %v30311_v36 = vand.u32 4294901760, %v30310_v25 }
 0x711   : > { %29923 = vmatpush1.msra.mxu1 %v39494_v35  ;;  %29986 = vmatprep.mubr.f32.mxu1 %v36018_v0  ;;  %v39617_v49 = vpop.permute.xlu1 %31169 }
 0x712   : > { %29996 = vmatprep.subr.mxu1 %v39467_v10  ;;  %v30775_v5 = vsub.f32 %v39576_v47, %v30774_v51 }
 0x714   : > { %29524 = vmatmul.mubr.f32.vlgmr.msra.gmra.mrb[4].mxu0 %v39471_v43  ;;  %v30776_v50 = vand.u32 4294901760, %v30775_v5 }
 0x715   : > { %29533 = vmatpush1.msra.mxu0 %v39462_v28  ;;  %29596 = vmatprep.mubr.f32.mxu0 %v36018_v0 }
 0x716   : > { %29609 = vmatprep.subr.mxu0 %v29373_v8 }
 0x718   : > { %29989 = vmatmul.mubr.f32.vlgmr.msra.gmra.mrb[4].mxu1 %v39471_v43 }
 0x719   : > { %29998 = vmatpush1.msra.mxu1 %v39477_v48  ;;  %30061 = vmatprep.mubr.f32.mxu1 %v36018_v0 }
 0x71a   : > { %30074 = vmatprep.subr.mxu1 %v29838_v17 }
 0x71c   : > { %29600 = vmatmul.mubr.f32.vlgmr.msra.gmra.mrb[4].mxu0 %v39488_v1 }
 0x71d   : > { %29613 = vmatpush1.msra.mxu0 %v29379_v31  ;;  %29676 = vmatprep.mubr.f32.mxu0 %v36018_v0  ;;  %v31196_v31 = vsel %vm17941_vm2, %v35129_v23, 0 }
 0x71e   : > { %29685 = vmatprep.subr.mxu0 %v39451_v6  ;;  %v30769_v6 = vsub.f32 %v30767_v29, %v30768_v11  ;;  %v39625_v17 = vand.u32 4294901760, %v31196_v31 }
 0x720   : > { %30065 = vmatmul.mubr.f32.vlgmr.msra.gmra.mrb[4].mxu1 %v39488_v1  ;;  %v39643_v44 = vsub.f32 %v31196_v31, %v39625_v17 }
 0x721   : > { %30078 = vmatpush1.msra.mxu1 %v29844_v30  ;;  %30141 = vmatprep.mubr.f32.mxu1 %v36018_v0 }
 0x722   : > { %30150 = vmatprep.subr.mxu1 %v39467_v10  ;;  %v31164_v10 = vpop.permute.xlu0 %31163 }
 0x723   : > { %v31182_v8 = vsel %vm13968_vm10, %v31164_v10, %v31166_v21 }
 0x724   : > { %29678 = vmatmul.mubr.f32.vlgmr.msra.gmra.mrb[4].mxu0 %v39455_v53  ;;  %v39619_v13 = vand.u32 4294901760, %v31182_v8 }
 0x725   : > { %29687 = vmatpush1.msra.mxu0 %v39462_v28  ;;  %29750 = vmatprep.mubr.f32.mxu0 %v36018_v0  ;;  %v30770_v28 = vand.u32 4294901760, %v30769_v6 }
 0x726   : > { %30224 = vmatprep.subr.mxu0 %v39547_v4 }
 0x728   : > { %30143 = vmatmul.mubr.f32.vlgmr.msra.gmra.mrb[4].mxu1 %v39455_v53 }
 0x729   : > { %30152 = vmatpush1.msra.mxu1 %v39477_v48  ;;  %30215 = vmatprep.mubr.f32.mxu1 %v36018_v0  ;;  %v31168_v48 = vpop.permute.xlu0 %31167 }
 0x72a   : > { %30689 = vmatprep.subr.mxu1 %v39559_v37  ;;  %v31180_v30 = vsel %vm13968_vm10, %v31168_v48, %v39617_v49  ;;  %v31181_v59 = vsel %vm13968_vm10, %v31166_v21, %v31168_v48 }
 0x72b   : > { %v39639_v63 = vand.u32 4294901760, %v31180_v30  ;;  %v39647_v61 = vand.u32 4294901760, %v31181_v59 }
 0x72c   : > { %29752 = vmatmul.mubr.f32.vlgmr.msra.gmra.mrb[4].mxu0 %v39455_v53 }
 0x72d   : > { %30226 = vmatpush1.msra.mxu0 %v39555_v24  ;;  %30289 = vmatprep.mubr.f32.mxu0 %v36018_v0  ;;  %v39612_v35 = vpop.permute.xlu0 %31161  ;;  %v31742_v27 = vsub.f32 %v31180_v30, %v39639_v63  ;;  %v39662_v32 = vsub.f32 %v31181_v59, %v39647_v61 }
 0x72e   : > { %30306 = vmatprep.subr.mxu0 %v30305_v55 }
 0x72f   : > { %v31743_v7 = vand.u32 4294901760, %v31742_v27  ;;  %v31749_v60 = vand.u32 4294901760, %v39662_v32 }
 0x730   : > { %30217 = vmatmul.mubr.f32.vlgmr.msra.gmra.mrb[4].mxu1 %v39455_v53  ;;  %30295 = vmatmul.mubr.f32.vlgmr.msra.gmra.mrb[6].mxu0 %v39508_v20 }
 0x731   : > { %30691 = vmatpush1.msra.mxu1 %v39567_v41  ;;  %30312 = vmatpush1.msra.mxu0 %v30311_v36  ;;  %v31744_v34 = vsub.f32 %v31742_v27, %v31743_v7 }
 0x732   : > { %30771 = vmatprep.subr.mxu1 %v30770_v28  ;;  %30385 = vmatprep.subr.mxu0 %v30302_v22 }
 0x733   : > { %30754 = vmatprep.mubr.f32.mxu1 %v36018_v0  ;;  %30375 = vmatprep.mubr.f32.mxu0 %v36018_v0  ;;  %v31745_v22 = vand.u32 4294901760, %v31744_v34 }
 0x734   : > { %30760 = vmatmul.mubr.f32.vlgmr.msra.gmra.mrb[6].mxu1 %v39508_v20  ;;  %v39637_v20 = vsub.f32 %v31182_v8, %v39619_v13 }
 0x735   : > { %30777 = vmatpush1.msra.mxu1 %v30776_v50  ;;  %30840 = vmatprep.mubr.f32.mxu1 %v36018_v0 }
 0x736   : > { %30850 = vmatprep.subr.mxu1 %v30767_v29  ;;  %v31278_v26 = vand.u32 4294901760, %v39637_v20 }
 0x738   : > { %30377 = vmatmul.mubr.f32.vlgmr.msra.gmra.mrb[6].mxu0 %v39455_v53  ;;  %v31279_v33 = vsub.f32 %v39637_v20, %v31278_v26 }
 0x739   : > { %30388 = vmatpush1.msra.mxu0 %v39565_v18  ;;  %30451 = vmatprep.mubr.f32.mxu0 %v36018_v0 }
 0x73a   : > { %30461 = vmatprep.subr.mxu0 %v39547_v4 }
 0x73c   : > { %30842 = vmatmul.mubr.f32.vlgmr.msra.gmra.mrb[6].mxu1 %v39455_v53 }
 0x73d   : > { %30853 = vmatpush1.msra.mxu1 %v39576_v47  ;;  %30916 = vmatprep.mubr.f32.mxu1 %v36018_v0 }
 0x73e   : > { %30926 = vmatprep.subr.mxu1 %v39559_v37 }
 0x740   : > { %30454 = vmatmul.mubr.f32.vlgmr.msra.gmra.mrb[6].mxu0 %v39471_v43 }
 0x741   : > { %30463 = vmatpush1.msra.mxu0 %v39555_v24  ;;  %30526 = vmatprep.mubr.f32.mxu0 %v36018_v0 }
 0x742   : > { %30539 = vmatprep.subr.mxu0 %v30303_v58 }
 0x744   : > { %30919 = vmatmul.mubr.f32.vlgmr.msra.gmra.mrb[6].mxu1 %v39471_v43  ;;  %v31183_v43 = vsel %vm13968_vm10, %v39612_v35, %v31164_v10 }
 0x745   : > { %30928 = vmatpush1.msra.mxu1 %v39567_v41  ;;  %30991 = vmatprep.mubr.f32.mxu1 %v36018_v0  ;;  %v39632_v39 = vand.u32 4294901760, %v31183_v43 }
 0x746   : > { %31004 = vmatprep.subr.mxu1 %v30768_v11 }
 0x747   : > { %v39650_v12 = vsub.f32 %v31183_v43, %v39632_v39 }
 0x748   : > { %30530 = vmatmul.mubr.f32.vlgmr.msra.gmra.mrb[6].mxu0 %v39488_v1 }
 0x749   : > { %30543 = vmatpush1.msra.mxu0 %v30309_v40  ;;  %30606 = vmatprep.mubr.f32.mxu0 %v36018_v0  ;;  %v31284_v3 = vand.u32 4294901760, %v39650_v12 }
 0x74a   : > { %30615 = vmatprep.subr.mxu0 %v39547_v4  ;;  %v31280_v4 = vand.u32 4294901760, %v31279_v33 }
 0x74b   : > { %v31285_v62 = vsub.f32 %v39650_v12, %v31284_v3 }
 0x74c   : > { %30995 = vmatmul.mubr.f32.vlgmr.msra.gmra.mrb[6].mxu1 %v39488_v1  ;;  %v39656_v1 = vand.u32 4294901760, %v39643_v44 }
 0x74d   : > { %31008 = vmatpush1.msra.mxu1 %v30774_v51  ;;  %31071 = vmatprep.mubr.f32.mxu1 %v36018_v0  ;;  %v31286_v57 = vand.u32 4294901760, %v31285_v62 }
 0x74e   : > { %31080 = vmatprep.subr.mxu1 %v39559_v37  ;;  %v31268_v19 = vsub.f32 %v39643_v44, %v39656_v1 }
 0x750   : > { %30608 = vmatmul.mubr.f32.vlgmr.msra.gmra.mrb[6].mxu0 %v39455_v53  ;;  %v39675_v45 = vand.u32 4294901760, %v31268_v19 }
 0x751   : > { %30617 = vmatpush1.msra.mxu0 %v39555_v24  ;;  %30680 = vmatprep.mubr.f32.mxu0 %v36018_v0  ;;  %v31750_v24 = vsub.f32 %v39662_v32, %v31749_v60 }
 0x752   : > { %31199 = vmatprep.subr.mxu0 %v39619_v13 }
 0x753   : > { %v31751_v37 = vand.u32 4294901760, %v31750_v24 }
 0x754   : > { %31073 = vmatmul.mubr.f32.vlgmr.msra.gmra.mrb[6].mxu1 %v39455_v53 }
 0x755   : > { %31082 = vmatpush1.msra.mxu1 %v39567_v41  ;;  %31145 = vmatprep.mubr.f32.mxu1 %v36018_v0  ;;  %v31172_v41 = vpop.permute.xlu0 %31171 }
 0x756   : > { %31664 = vmatprep.subr.mxu1 %v39639_v63  ;;  %v31179_v40 = vsel %vm13968_vm10, %v39617_v49, %v31172_v41 }
 0x757   : > { %v39716_v11 = vand.u32 4294901760, %v31179_v40 }
 0x758   : > { %30682 = vmatmul.mubr.f32.vlgmr.msra.gmra.mrb[6].mxu0 %v39455_v53 }
 0x759   : > { %31201 = vmatpush1.msra.mxu0 %v39632_v39  ;;  %31264 = vmatprep.mubr.f32.mxu0 %v36018_v0  ;;  %v33069_v30 = vpop.permute.xlu0 %33068 }
 0x75a   : > { %31281 = vmatprep.subr.mxu0 %v31280_v4 }
 0x75c   : > { %31147 = vmatmul.mubr.f32.vlgmr.msra.gmra.mrb[6].mxu1 %v39455_v53  ;;  %31270 = vmatmul.mubr.f32.vlgmr.msra.gmra.mrb[4].mxu0 %v39675_v45  ;;  %v31176_v53 = vpop.permute.xlu1 %31175 }
 0x75d   : > { %31666 = vmatpush1.msra.mxu1 %v39647_v61  ;;  %31287 = vmatpush1.msra.mxu0 %v31286_v57  ;;  %v31184_v29 = vsel %vm13968_vm10, %v31176_v53, %v39612_v35 }
 0x75e   : > { %31746 = vmatprep.subr.mxu1 %v31745_v22  ;;  %31360 = vmatprep.subr.mxu0 %v39637_v20  ;;  %v31192_v47 = vmul.f32 %v37936_v42, %v31184_v29  ;;  %v39727_v42 = vsub.f32 %v31179_v40, %v39716_v11 }
 0x75f   : > { %31729 = vmatprep.mubr.f32.mxu1 %v36018_v0  ;;  %31350 = vmatprep.mubr.f32.mxu0 %v36018_v0 }
 0x760   : > { %31735 = vmatmul.mubr.f32.vlgmr.msra.gmra.mrb[4].mxu1 %v39675_v45  ;;  %v31174_v18 = vpop.permute.xlu1 %31173  ;;  %v39718_v51 = vand.u32 4294901760, %v31192_v47  ;;  %v32214_v28 = vand.u32 4294901760, %v39727_v42 }
 0x761   : > { %31752 = vmatpush1.msra.mxu1 %v31751_v37  ;;  %31815 = vmatprep.mubr.f32.mxu1 %v36018_v0  ;;  %v31178_v58 = vsel %vm13968_vm10, %v31172_v41, %v31174_v18  ;;  %v31177_v25 = vsel %vm13968_vm10, %v31174_v18, %v31176_v53 }
 0x762   : > { %31825 = vmatprep.subr.mxu1 %v31742_v27  ;;  %v39711_v16 = vand.u32 4294901760, %v31178_v58  ;;  %v39729_v6 = vand.u32 4294901760, %v31177_v25  ;;  %v39732_v36 = vsub.f32 %v31192_v47, %v39718_v51  ;;  %v32215_v21 = vsub.f32 %v39727_v42, %v32214_v28 }
 0x764   : > { %31352 = vmatmul.mubr.f32.vlgmr.msra.gmra.mrb[4].mxu0 %v39625_v17  ;;  %v32207_v55 = vsub.f32 %v31178_v58, %v39711_v16  ;;  %v39740_v50 = vsub.f32 %v31177_v25, %v39729_v6  ;;  %v32673_v48 = vand.u32 4294901760, %v39732_v36  ;;  %v32216_v49 = vand.u32 4294901760, %v32215_v21  ;;  %v33071_v59 = vpop.permute.xlu1 %33070 }
 0x765   : > { %31363 = vmatpush1.msra.mxu0 %v39650_v12  ;;  %31426 = vmatprep.mubr.f32.mxu0 %v36018_v0  ;;  %v33087_v20 = vsel %vm15914_vm9, %v33069_v30, %v33071_v59  ;;  %v35130_v12 = vld [vmem:[%s39972_s3 + $0x40] sm:$0xff] }
 0x766   : > { %31436 = vmatprep.subr.mxu0 %v39619_v13  ;;  %v32208_v5 = vand.u32 4294901760, %v32207_v55  ;;  %v32679_v23 = vand.u32 4294901760, %v39740_v50  ;;  %v32674_v35 = vsub.f32 %v39732_v36, %v32673_v48  ;;  %v33091_v27 = vmul.f32 %v36683_v46, %v33087_v20 }
 0x768   : > { %31817 = vmatmul.mubr.f32.vlgmr.msra.gmra.mrb[4].mxu1 %v39625_v17  ;;  %v32209_v10 = vsub.f32 %v32207_v55, %v32208_v5  ;;  %v32680_v31 = vsub.f32 %v39740_v50, %v32679_v23  ;;  %v39800_v19 = vand.u32 4294901760, %v33091_v27 }
 0x769   : > { %31828 = vmatpush1.msra.mxu1 %v39662_v32  ;;  %31891 = vmatprep.mubr.f32.mxu1 %v36018_v0 }
 0x76a   : > { %31901 = vmatprep.subr.mxu1 %v39639_v63  ;;  %v32210_v8 = vand.u32 4294901760, %v32209_v10  ;;  %v32681_v43 = vand.u32 4294901760, %v32680_v31  ;;  %v39814_v62 = vsub.f32 %v33091_v27, %v39800_v19 }
 0x76c   : > { %31429 = vmatmul.mubr.f32.vlgmr.msra.gmra.mrb[4].mxu0 %v39643_v44 }
 0x76d   : > { %31438 = vmatpush1.msra.mxu0 %v39632_v39  ;;  %31501 = vmatprep.mubr.f32.mxu0 %v36018_v0 }
 0x76e   : > { %31514 = vmatprep.subr.mxu0 %v31278_v26 }
 0x770   : > { %31894 = vmatmul.mubr.f32.vlgmr.msra.gmra.mrb[4].mxu1 %v39643_v44 }
 0x771   : > { %31903 = vmatpush1.msra.mxu1 %v39647_v61  ;;  %31966 = vmatprep.mubr.f32.mxu1 %v36018_v0 }
 0x772   : > { %31979 = vmatprep.subr.mxu1 %v31743_v7 }
 0x774   : > { %31505 = vmatmul.mubr.f32.vlgmr.msra.gmra.mrb[4].mxu0 %v39656_v1 }
 0x775   : > { %31518 = vmatpush1.msra.mxu0 %v31284_v3  ;;  %31581 = vmatprep.mubr.f32.mxu0 %v36018_v0  ;;  %v33101_v3 = vsel %vm17941_vm2, %v35130_v12, 0 }
 0x776   : > { %31590 = vmatprep.subr.mxu0 %v39619_v13  ;;  %v32675_v13 = vand.u32 4294901760, %v32674_v35  ;;  %v39804_v7 = vand.u32 4294901760, %v33101_v3 }
 0x778   : > { %31970 = vmatmul.mubr.f32.vlgmr.msra.gmra.mrb[4].mxu1 %v39656_v1 }
 0x779   : > { %31983 = vmatpush1.msra.mxu1 %v31749_v60  ;;  %32046 = vmatprep.mubr.f32.mxu1 %v36018_v0 }
 0x77a   : > { %32055 = vmatprep.subr.mxu1 %v39639_v63 }
 0x77c   : > { %31583 = vmatmul.mubr.f32.vlgmr.msra.gmra.mrb[4].mxu0 %v39625_v17 }
 0x77d   : > { %31592 = vmatpush1.msra.mxu0 %v39632_v39  ;;  %31655 = vmatprep.mubr.f32.mxu0 %v36018_v0  ;;  %v33073_v39 = vpop.permute.xlu0 %33072 }
 0x77e   : > { %32129 = vmatprep.subr.mxu0 %v39711_v16  ;;  %v33086_v46 = vsel %vm15914_vm9, %v33071_v59, %v33073_v39 }
 0x780   : > { %32048 = vmatmul.mubr.f32.vlgmr.msra.gmra.mrb[4].mxu1 %v39625_v17 }
 0x781   : > { %32057 = vmatpush1.msra.mxu1 %v39647_v61  ;;  %32120 = vmatprep.mubr.f32.mxu1 %v36018_v0  ;;  %v39777_v63 = vpop.permute.xlu0 %33066  ;;  %v39781_v61 = vpop.permute.xlu1 %33074 }
 0x782   : > { %32594 = vmatprep.subr.mxu1 %v39718_v51  ;;  %v33088_v26 = vsel %vm15914_vm9, %v39777_v63, %v33069_v30  ;;  %v33085_v32 = vsel %vm15914_vm9, %v33073_v39, %v39781_v61 }
 0x783   : > { %v33090_v33 = vmul.f32 %v37418_v2, %v33088_v26  ;;  %v33092_v2 = vmul.f32 %v36670_v38, %v33086_v46 }
 0x784   : > { %31657 = vmatmul.mubr.f32.vlgmr.msra.gmra.mrb[4].mxu0 %v39625_v17 }
 0x785   : > { %32131 = vmatpush1.msra.mxu0 %v39716_v11  ;;  %32194 = vmatprep.mubr.f32.mxu0 %v36018_v0  ;;  %v39811_v60 = vand.u32 4294901760, %v33090_v33  ;;  %v39826_v38 = vand.u32 4294901760, %v33092_v2 }
 0x786   : > { %32211 = vmatprep.subr.mxu0 %v32210_v8 }
 0x787   : > { %v39843_v57 = vsub.f32 %v33092_v2, %v39826_v38 }
 0x788   : > { %32122 = vmatmul.mubr.f32.vlgmr.msra.gmra.mrb[4].mxu1 %v39625_v17  ;;  %32200 = vmatmul.mubr.f32.vlgmr.msra.gmra.mrb[6].mxu0 %v39675_v45 }
 0x789   : > { %32596 = vmatpush1.msra.mxu1 %v39729_v6  ;;  %32217 = vmatpush1.msra.mxu0 %v32216_v49  ;;  %v33654_v41 = vand.u32 4294901760, %v39843_v57 }
 0x78a   : > { %32676 = vmatprep.subr.mxu1 %v32675_v13  ;;  %32290 = vmatprep.subr.mxu0 %v32207_v55  ;;  %v33079_v55 = vpop.permute.xlu0 %33078 }
 0x78b   : > { %32659 = vmatprep.mubr.f32.mxu1 %v36018_v0  ;;  %32280 = vmatprep.mubr.f32.mxu0 %v36018_v0 }
 0x78c   : > { %32665 = vmatmul.mubr.f32.vlgmr.msra.gmra.mrb[6].mxu1 %v39675_v45  ;;  %v39829_v45 = vsub.f32 %v33090_v33, %v39811_v60 }
 0x78d   : > { %32682 = vmatpush1.msra.mxu1 %v32681_v43  ;;  %32745 = vmatprep.mubr.f32.mxu1 %v36018_v0 }
 0x78e   : > { %32755 = vmatprep.subr.mxu1 %v39732_v36  ;;  %v33189_v22 = vand.u32 4294901760, %v39829_v45  ;;  %v34975_v26 = vpop.permute.xlu0 %34974 }
 0x790   : > { %32282 = vmatmul.mubr.f32.vlgmr.msra.gmra.mrb[6].mxu0 %v39625_v17  ;;  %v33190_v29 = vsub.f32 %v39829_v45, %v33189_v22 }
 0x791   : > { %32293 = vmatpush1.msra.mxu0 %v39727_v42  ;;  %32356 = vmatprep.mubr.f32.mxu0 %v36018_v0 }
 0x792   : > { %32366 = vmatprep.subr.mxu0 %v39711_v16 }
 0x794   : > { %32747 = vmatmul.mubr.f32.vlgmr.msra.gmra.mrb[6].mxu1 %v39625_v17 }
 0x795   : > { %32758 = vmatpush1.msra.mxu1 %v39740_v50  ;;  %32821 = vmatprep.mubr.f32.mxu1 %v36018_v0 }
 0x796   : > { %32831 = vmatprep.subr.mxu1 %v39718_v51 }
 0x798   : > { %32359 = vmatmul.mubr.f32.vlgmr.msra.gmra.mrb[6].mxu0 %v39643_v44 }
 0x799   : > { %32368 = vmatpush1.msra.mxu0 %v39716_v11  ;;  %32431 = vmatprep.mubr.f32.mxu0 %v36018_v0 }
 0x79a   : > { %32444 = vmatprep.subr.mxu0 %v32208_v5 }
 0x79c   : > { %32824 = vmatmul.mubr.f32.vlgmr.msra.gmra.mrb[6].mxu1 %v39643_v44  ;;  %v33093_v44 = vmul.f32 %v36647_v56, %v33085_v32  ;;  %v39820_v56 = vsub.f32 %v33101_v3, %v39804_v7 }
 0x79d   : > { %32833 = vmatpush1.msra.mxu1 %v39729_v6  ;;  %32896 = vmatprep.mubr.f32.mxu1 %v36018_v0 }
 0x79e   : > { %32909 = vmatprep.subr.mxu1 %v32673_v48  ;;  %v39816_v4 = vand.u32 4294901760, %v33093_v44  ;;  %v39837_v24 = vand.u32 4294901760, %v39820_v56 }
 0x7a0   : > { %32435 = vmatmul.mubr.f32.vlgmr.msra.gmra.mrb[6].mxu0 %v39656_v1  ;;  %v39832_v34 = vsub.f32 %v33093_v44, %v39816_v4  ;;  %v33173_v53 = vsub.f32 %v39820_v56, %v39837_v24 }
 0x7a1   : > { %32448 = vmatpush1.msra.mxu0 %v32214_v28  ;;  %32511 = vmatprep.mubr.f32.mxu0 %v36018_v0 }
 0x7a2   : > { %32520 = vmatprep.subr.mxu0 %v39711_v16  ;;  %v33648_v18 = vand.u32 4294901760, %v39832_v34  ;;  %v39857_v40 = vand.u32 4294901760, %v33173_v53  ;;  %v33191_v16 = vand.u32 4294901760, %v33190_v29 }
 0x7a4   : > { %32900 = vmatmul.mubr.f32.vlgmr.msra.gmra.mrb[6].mxu1 %v39656_v1  ;;  %v33183_v1 = vand.u32 4294901760, %v39814_v62  ;;  %v33649_v47 = vsub.f32 %v39832_v34, %v33648_v18 }
 0x7a5   : > { %32913 = vmatpush1.msra.mxu1 %v32679_v23  ;;  %32976 = vmatprep.mubr.f32.mxu1 %v36018_v0 }
 0x7a6   : > { %32985 = vmatprep.subr.mxu1 %v39718_v51  ;;  %v33184_v37 = vsub.f32 %v39814_v62, %v33183_v1  ;;  %v33650_v51 = vand.u32 4294901760, %v33649_v47 }
 0x7a8   : > { %32513 = vmatmul.mubr.f32.vlgmr.msra.gmra.mrb[6].mxu0 %v39625_v17  ;;  %v33185_v58 = vand.u32 4294901760, %v33184_v37 }
 0x7a9   : > { %32522 = vmatpush1.msra.mxu0 %v39716_v11  ;;  %32585 = vmatprep.mubr.f32.mxu0 %v36018_v0  ;;  %v33655_v11 = vsub.f32 %v39843_v57, %v33654_v41 }
 0x7aa   : > { %33104 = vmatprep.subr.mxu0 %v39800_v19 }
 0x7ab   : > { %v33656_v25 = vand.u32 4294901760, %v33655_v11 }
 0x7ac   : > { %32978 = vmatmul.mubr.f32.vlgmr.msra.gmra.mrb[6].mxu1 %v39625_v17 }
 0x7ad   : > { %32987 = vmatpush1.msra.mxu1 %v39729_v6  ;;  %33050 = vmatprep.mubr.f32.mxu1 %v36018_v0 }
 0x7ae   : > { %33569 = vmatprep.subr.mxu1 %v39816_v4 }
 0x7b0   : > { %32587 = vmatmul.mubr.f32.vlgmr.msra.gmra.mrb[6].mxu0 %v39625_v17 }
 0x7b1   : > { %33106 = vmatpush1.msra.mxu0 %v39811_v60  ;;  %33169 = vmatprep.mubr.f32.mxu0 %v36018_v0 }
 0x7b2   : > { %33186 = vmatprep.subr.mxu0 %v33185_v58 }
 0x7b4   : > { %33052 = vmatmul.mubr.f32.vlgmr.msra.gmra.mrb[6].mxu1 %v39625_v17  ;;  %33175 = vmatmul.mubr.f32.vlgmr.msra.gmra.mrb[4].mxu0 %v39857_v40  ;;  %v33077_v17 = vpop.permute.xlu1 %33076 }
 0x7b5   : > { %33571 = vmatpush1.msra.mxu1 %v39826_v38  ;;  %33192 = vmatpush1.msra.mxu0 %v33191_v16  ;;  %v33083_v42 = vsel %vm15914_vm9, %v33077_v17, %v33079_v55  ;;  %v33084_v36 = vsel %vm15914_vm9, %v39781_v61, %v33077_v17 }
 0x7b6   : > { %33651 = vmatprep.subr.mxu1 %v33650_v51  ;;  %33265 = vmatprep.subr.mxu0 %v39814_v62  ;;  %v33095_v5 = vmul.f32 %v36855_v54, %v33083_v42  ;;  %v33094_v50 = vmul.f32 %v36878_v15, %v33084_v36 }
 0x7b7   : > { %33634 = vmatprep.mubr.f32.mxu1 %v36018_v0  ;;  %33255 = vmatprep.mubr.f32.mxu0 %v36018_v0 }
 0x7b8   : > { %33640 = vmatmul.mubr.f32.vlgmr.msra.gmra.mrb[4].mxu1 %v39857_v40  ;;  %v33081_v6 = vpop.permute.xlu1 %33080  ;;  %v39896_v10 = vand.u32 4294901760, %v33095_v5  ;;  %v39904_v21 = vand.u32 4294901760, %v33094_v50 }
 0x7b9   : > { %33657 = vmatpush1.msra.mxu1 %v33656_v25  ;;  %33720 = vmatprep.mubr.f32.mxu1 %v36018_v0  ;;  %v33089_v28 = vsel %vm15914_vm9, %v33081_v6, %v39777_v63  ;;  %v33082_v48 = vsel %vm15914_vm9, %v33079_v55, %v33081_v6 }
 0x7ba   : > { %33730 = vmatprep.subr.mxu1 %v39832_v34  ;;  %v33097_v54 = vmul.f32 %v38160_v9, %v33089_v28  ;;  %v33096_v23 = vmul.f32 %v36845_v52, %v33082_v48  ;;  %v34112_v15 = vsub.f32 %v33095_v5, %v39896_v10  ;;  %v34118_v14 = vsub.f32 %v33094_v50, %v39904_v21 }
 0x7bc   : > { %33257 = vmatmul.mubr.f32.vlgmr.msra.gmra.mrb[4].mxu0 %v39804_v7  ;;  %v39908_v8 = vand.u32 4294901760, %v33097_v54  ;;  %v39914_v9 = vand.u32 4294901760, %v33096_v23  ;;  %v34113_v52 = vand.u32 4294901760, %v34112_v15  ;;  %v34119_v31 = vand.u32 4294901760, %v34118_v14 }
 0x7bd   : > { %33268 = vmatpush1.msra.mxu0 %v39829_v45  ;;  %33331 = vmatprep.mubr.f32.mxu0 %v36018_v0 }
 0x7be   : > { %33341 = vmatprep.subr.mxu0 %v39800_v19  ;;  %v34577_v35 = vsub.f32 %v33097_v54, %v39908_v8  ;;  %v34583_v49 = vsub.f32 %v33096_v23, %v39914_v9  ;;  %v34114_v13 = vsub.f32 %v34112_v15, %v34113_v52  ;;  %v34120_v39 = vsub.f32 %v34118_v14, %v34119_v31 }
 0x7c0   : > { %33722 = vmatmul.mubr.f32.vlgmr.msra.gmra.mrb[4].mxu1 %v39804_v7  ;;  %v34578_v43 = vand.u32 4294901760, %v34577_v35  ;;  %v34584_v30 = vand.u32 4294901760, %v34583_v49  ;;  %v34115_v59 = vand.u32 4294901760, %v34114_v13  ;;  %v34121_v63 = vand.u32 4294901760, %v34120_v39 }
 0x7c1   : > { %33733 = vmatpush1.msra.mxu1 %v39843_v57  ;;  %33796 = vmatprep.mubr.f32.mxu1 %v36018_v0 }
 0x7c2   : > { %33806 = vmatprep.subr.mxu1 %v39816_v4  ;;  %v34579_v20 = vsub.f32 %v34577_v35, %v34578_v43  ;;  %v34585_v61 = vsub.f32 %v34583_v49, %v34584_v30 }
 0x7c4   : > { %33334 = vmatmul.mubr.f32.vlgmr.msra.gmra.mrb[4].mxu0 %v39820_v56  ;;  %v34580_v12 = vand.u32 4294901760, %v34579_v20  ;;  %v34586_v27 = vand.u32 4294901760, %v34585_v61 }
 0x7c5   : > { %33343 = vmatpush1.msra.mxu0 %v39811_v60  ;;  %33406 = vmatprep.mubr.f32.mxu0 %v36018_v0 }
 0x7c6   : > { %33419 = vmatprep.subr.mxu0 %v33183_v1 }
 0x7c8   : > { %33799 = vmatmul.mubr.f32.vlgmr.msra.gmra.mrb[4].mxu1 %v39820_v56 }
 0x7c9   : > { %33808 = vmatpush1.msra.mxu1 %v39826_v38  ;;  %33871 = vmatprep.mubr.f32.mxu1 %v36018_v0 }
 0x7ca   : > { %33884 = vmatprep.subr.mxu1 %v33648_v18 }
 0x7cc   : > { %33410 = vmatmul.mubr.f32.vlgmr.msra.gmra.mrb[4].mxu0 %v39837_v24 }
 0x7cd   : > { %33423 = vmatpush1.msra.mxu0 %v33189_v22  ;;  %33486 = vmatprep.mubr.f32.mxu0 %v36018_v0 }
 0x7ce   : > { %33495 = vmatprep.subr.mxu0 %v39800_v19 }
 0x7d0   : > { %33875 = vmatmul.mubr.f32.vlgmr.msra.gmra.mrb[4].mxu1 %v39837_v24 }
 0x7d1   : > { %33888 = vmatpush1.msra.mxu1 %v33654_v41  ;;  %33951 = vmatprep.mubr.f32.mxu1 %v36018_v0 }
 0x7d2   : > { %33960 = vmatprep.subr.mxu1 %v39816_v4 }
 0x7d4   : > { %33488 = vmatmul.mubr.f32.vlgmr.msra.gmra.mrb[4].mxu0 %v39804_v7 }
 0x7d5   : > { %33497 = vmatpush1.msra.mxu0 %v39811_v60  ;;  %33560 = vmatprep.mubr.f32.mxu0 %v36018_v0 }
 0x7d6   : > { %34034 = vmatprep.subr.mxu0 %v39896_v10 }
 0x7d8   : > { %33953 = vmatmul.mubr.f32.vlgmr.msra.gmra.mrb[4].mxu1 %v39804_v7 }
 0x7d9   : > { %33962 = vmatpush1.msra.mxu1 %v39826_v38  ;;  %34025 = vmatprep.mubr.f32.mxu1 %v36018_v0 }
 0x7da   : > { %34499 = vmatprep.subr.mxu1 %v39908_v8 }
 0x7dc   : > { %33562 = vmatmul.mubr.f32.vlgmr.msra.gmra.mrb[4].mxu0 %v39804_v7 }
 0x7dd   : > { %34036 = vmatpush1.msra.mxu0 %v39904_v21  ;;  %34099 = vmatprep.mubr.f32.mxu0 %v36018_v0 }
 0x7de   : > { %34116 = vmatprep.subr.mxu0 %v34115_v59 }
 0x7e0   : > { %34027 = vmatmul.mubr.f32.vlgmr.msra.gmra.mrb[4].mxu1 %v39804_v7  ;;  %34105 = vmatmul.mubr.f32.vlgmr.msra.gmra.mrb[6].mxu0 %v39857_v40 }
 0x7e1   : > { %34501 = vmatpush1.msra.mxu1 %v39914_v9  ;;  %34122 = vmatpush1.msra.mxu0 %v34121_v63 }
 0x7e2   : > { %34581 = vmatprep.subr.mxu1 %v34580_v12  ;;  %34195 = vmatprep.subr.mxu0 %v34112_v15 }
 0x7e3   : > { %34564 = vmatprep.mubr.f32.mxu1 %v36018_v0  ;;  %34185 = vmatprep.mubr.f32.mxu0 %v36018_v0 }
 0x7e4   : > { %34570 = vmatmul.mubr.f32.vlgmr.msra.gmra.mrb[6].mxu1 %v39857_v40 }
 0x7e5   : > { %34587 = vmatpush1.msra.mxu1 %v34586_v27  ;;  %34650 = vmatprep.mubr.f32.mxu1 %v36018_v0 }
 0x7e6   : > { %34660 = vmatprep.subr.mxu1 %v34577_v35 }
 0x7e8   : > { %34187 = vmatmul.mubr.f32.vlgmr.msra.gmra.mrb[6].mxu0 %v39804_v7 }
 0x7e9   : > { %34198 = vmatpush1.msra.mxu0 %v34118_v14  ;;  %34261 = vmatprep.mubr.f32.mxu0 %v36018_v0 }
 0x7ea   : > { %34271 = vmatprep.subr.mxu0 %v39896_v10 }
 0x7ec   : > { %34652 = vmatmul.mubr.f32.vlgmr.msra.gmra.mrb[6].mxu1 %v39804_v7 }
 0x7ed   : > { %34663 = vmatpush1.msra.mxu1 %v34583_v49  ;;  %34726 = vmatprep.mubr.f32.mxu1 %v36018_v0 }
 0x7ee   : > { %34736 = vmatprep.subr.mxu1 %v39908_v8 }
 0x7f0   : > { %34264 = vmatmul.mubr.f32.vlgmr.msra.gmra.mrb[6].mxu0 %v39820_v56 }
 0x7f1   : > { %34273 = vmatpush1.msra.mxu0 %v39904_v21  ;;  %34336 = vmatprep.mubr.f32.mxu0 %v36018_v0 }
 0x7f2   : > { %34349 = vmatprep.subr.mxu0 %v34113_v52 }
 0x7f4   : > { %34729 = vmatmul.mubr.f32.vlgmr.msra.gmra.mrb[6].mxu1 %v39820_v56 }
 0x7f5   : > { %34738 = vmatpush1.msra.mxu1 %v39914_v9  ;;  %34801 = vmatprep.mubr.f32.mxu1 %v36018_v0 }
 0x7f6   : > { %34814 = vmatprep.subr.mxu1 %v34578_v43 }
 0x7f8   : > { %34340 = vmatmul.mubr.f32.vlgmr.msra.gmra.mrb[6].mxu0 %v39837_v24 }
 0x7f9   : > { %34353 = vmatpush1.msra.mxu0 %v34119_v31  ;;  %34416 = vmatprep.mubr.f32.mxu0 %v36018_v0 }
 0x7fa   : > { %34425 = vmatprep.subr.mxu0 %v39896_v10 }
 0x7fc   : > { %34805 = vmatmul.mubr.f32.vlgmr.msra.gmra.mrb[6].mxu1 %v39837_v24 }
 0x7fd   : > { %34818 = vmatpush1.msra.mxu1 %v34584_v30  ;;  %34881 = vmatprep.mubr.f32.mxu1 %v36018_v0 }
 0x7fe   : > { %34890 = vmatprep.subr.mxu1 %v39908_v8 }
 0x800   : > { %34418 = vmatmul.mubr.f32.vlgmr.msra.gmra.mrb[6].mxu0 %v39804_v7 }
 0x801   : > { %34427 = vmatpush1.msra.mxu0 %v39904_v21  ;;  %34490 = vmatprep.mubr.f32.mxu0 %v36018_v0 }
 0x804   : > { %34883 = vmatmul.mubr.f32.vlgmr.msra.gmra.mrb[6].mxu1 %v39804_v7 }
 0x805   : > { %34892 = vmatpush1.msra.mxu1 %v39914_v9  ;;  %34955 = vmatprep.mubr.f32.mxu1 %v36018_v0 }
 0x808   : > { %34492 = vmatmul.mubr.f32.vlgmr.msra.gmra.mrb[6].mxu0 %v39804_v7 }
 0x80c   : > { %34957 = vmatmul.mubr.f32.vlgmr.msra.gmra.mrb[6].mxu1 %v39804_v7 }
 0x8af   : > { %v33563_v32 = vpop.f32.mrb[4].mxu0 }
 0x8b0   : > { %v34977_v3 = vadd.f32 %v34975_v26, %v33563_v32  ;;  %v33565_v33 = vpop.f32.mrb[5].mxu0 }
 0x8b1   : > { %v34978_v46 = vadd.f32 %v34975_v26, %v33565_v33 }
 0x8b2   : > { %v34985_v19 = vmax.f32 %v34977_v3, 0.0 }
 0x8b3   : > { %v34986_v44 = vmax.f32 %v34978_v46, 0.0  ;;  %v34028_v2 = vpop.f32.mrb[4].mxu1 }
 0x8b4   : > { %34993 = vst [vmem:[%s224_s24] sm:$0xff] %v34985_v19  ;;  %v34979_v60 = vadd.f32 %v34975_v26, %v34028_v2  ;;  %v34030_v0 = vpop.f32.mrb[5].mxu1 }
 0x8b5   : > { %34994 = vst [vmem:[%s224_s24 + $0x8] sm:$0xff] %v34986_v44  ;;  %v34980_v62 = vadd.f32 %v34975_v26, %v34030_v0 }
 0x8b6   : > { %v34987_v4 = vmax.f32 %v34979_v60, 0.0 }
 0x8b7   : > { %v34988_v7 = vmax.f32 %v34980_v62, 0.0 }
 0x8b8   : > { %34995 = vst [vmem:[%s224_s24 + $0x10] sm:$0xff] %v34987_v4 }
 0x8b9   : > { %34996 = vst [vmem:[%s224_s24 + $0x18] sm:$0xff] %v34988_v7 }
 0x8db   : > { %v34493_v56 = vpop.f32.mrb[6].mxu0 }
 0x8dc   : > { %v34981_v38 = vadd.f32 %v34975_v26, %v34493_v56  ;;  %v34495_v45 = vpop.f32.mrb[7].mxu0 }
 0x8dd   : > { %v34982_v34 = vadd.f32 %v34975_v26, %v34495_v45 }
 0x8de   : > { %v34989_v1 = vmax.f32 %v34981_v38, 0.0 }
 0x8df   : > { %v34990_v24 = vmax.f32 %v34982_v34, 0.0  ;;  %v34958_v57 = vpop.f32.mrb[6].mxu1 }
 0x8e0   : > { %34997 = vst [vmem:[%s224_s24 + $0x20] sm:$0xff] %v34989_v1  ;;  %v34983_v22 = vadd.f32 %v34975_v26, %v34958_v57  ;;  %v34960_v37 = vpop.f32.mrb[7].mxu1 }
 0x8e1   : > { %34998 = vst [vmem:[%s224_s24 + $0x28] sm:$0xff] %v34990_v24  ;;  %v34984_v53 = vadd.f32 %v34975_v26, %v34960_v37 }
 0x8e2   : > { %v34991_v18 = vmax.f32 %v34983_v22, 0.0 }
 0x8e3   : > { %v34992_v41 = vmax.f32 %v34984_v53, 0.0 }
 0x8e4   : > { %34999 = vst [vmem:[%s224_s24 + $0x30] sm:$0xff] %v34991_v18 }
 0x8e5   : > { %35000 = vst [vmem:[%s224_s24 + $0x38] sm:$0xff] %v34992_v41 }
 0x8e6 PF: > { %s15_s18 = sadd.s32 1, %s36016_s18  }
 0x8e7   : > { %p12_p4 = scmp.ge.s32.totalorder %s15_s18, 4  }
 0x8e9   :  { %14 = sbr.rel (!%p12_p4) target bundleno = 1 (0x1), region = 86 }

</bundles_post_ra>
